<compile_context>
chip_gen: v7x
topology: tpu7x:2x2x1
jax: 0.10.0
libtpu: 0.0.40
codegen_flags: <defaults>
</compile_context>

<pallas_src>
import functools

import jax
import jax.numpy as jnp
from jax.experimental import pallas as pl
from jax.experimental.pallas import tpu as pltpu


HIDDEN_LAYERS = [64, 128, 128, 64]   # packing below assumes exactly these sizes


def _bf16_eup_available():
    """True on TPU generations with bf16-capable VPU/EUP (v6e, v7x)."""
    try:
        if jax.default_backend() != "tpu":
            return False
        kind = jax.devices()[0].device_kind.lower()
    except Exception:  # pragma: no cover - defensive
        return False
    return ("v6" in kind) or ("v7" in kind) or ("tpu7" in kind) or ("7x" in kind)


def _mlp_kernel(x_ref, wbig_ref, f_ref, o_ref, *, act_dtype):
    """Fused MLP + softplus for one lane-dense batch tile (feature-major).

      x_ref    : (2, TM)    f32   row 0 = r, row 1 = t (batch along lanes)
      wbig_ref : (128, 384) bf16  [:,0:128]=W3, [0:64,128:256]=W4, [:,256:320]=W2
      f_ref    : (128, 8)   f32   cols: 0=W1[:,0] 1=W1[:,1] 2=W5 3=b1 4=b2 5=b3 6=b4 7=b5
      o_ref    : (1, TM)    f32
    """
    r = x_ref[0:1, :]                                   # (1, TM)
    t = x_ref[1:2, :]                                   # (1, TM)

    # Small f32 weights / biases (all static, lane-tile-aligned slices).
    w1r = f_ref[0:64, 0:1]                              # (64, 1)
    w1t = f_ref[0:64, 1:2]
    w5 = f_ref[0:64, 2:3]
    b1 = f_ref[0:64, 3:4]
    b2 = f_ref[:, 4:5]                                  # (128, 1)
    b3 = f_ref[:, 5:6]
    b4 = f_ref[0:64, 6:7]
    b5 = f_ref[0:1, 7:8]                                # (1, 1)

    # bf16 MXU weights (lane offsets 0 / 128 / 256 -> no tile-crossing slices).
    w3 = wbig_ref[:, 0:128]                             # (128, 128)
    w4 = wbig_ref[0:64, 128:256]                        # (64, 128)
    w2 = wbig_ref[:, 256:320]                           # (128, 64)

    # Layer 1 (K=2): VPU broadcast-FMA instead of a padded MXU push.
    z = w1r * r + w1t * t + b1                          # (64, TM) f32
    h = jnp.tanh(z.astype(act_dtype))                   # bf16 tanh on v6e/v7x

    # Layers 2-4: bf16 MXU matmuls, f32 accumulation, bias add in f32,
    # tanh in act_dtype (h stays bf16 between layers when act_dtype is bf16).
    z = jnp.dot(w2, h.astype(jnp.bfloat16),
                preferred_element_type=jnp.float32) + b2
    h = jnp.tanh(z.astype(act_dtype))                   # (128, TM)
    z = jnp.dot(w3, h.astype(jnp.bfloat16),
                preferred_element_type=jnp.float32) + b3
    h = jnp.tanh(z.astype(act_dtype))                   # (128, TM)
    z = jnp.dot(w4, h.astype(jnp.bfloat16),
                preferred_element_type=jnp.float32) + b4
    h = jnp.tanh(z.astype(act_dtype))                   # (64, TM)

    # Output layer (N=1): f32 VPU multiply + sublane reduce -> lane-dense row.
    z = jnp.sum(w5 * h.astype(jnp.float32), axis=0, keepdims=True) + b5   # (1, TM)

    # softplus(z) = log(1 + exp(z)), numerically stable form.
    o_ref[...] = jnp.maximum(z, 0.0) + jnp.log1p(jnp.exp(-jnp.abs(z)))


def init_params(key, hidden_layers=HIDDEN_LAYERS,
                initial_alpha=0.01, initial_sigma=30.0, initial_mu_eq=2800.0):
    """Parameter init mirroring nn.Linear defaults, torch layout (out, in)."""
    sizes = [2] + list(hidden_layers) + [1]
    params = {"weights": [], "biases": []}
    for i in range(len(sizes) - 1):
        fan_in, fan_out = sizes[i], sizes[i + 1]
        key, kw, kb = jax.random.split(key, 3)
        bound = 1.0 / jnp.sqrt(jnp.float32(fan_in))
        w = jax.random.uniform(kw, (fan_out, fan_in), jnp.float32, -bound, bound)
        b = jax.random.uniform(kb, (fan_out,), jnp.float32, -bound, bound)
        params["weights"].append(w)
        params["biases"].append(b)
    # Physical OU-process parameters (not used in forward, kept for parity).
    params["log_alpha"] = jnp.log(jnp.float32(initial_alpha))
    params["log_sigma"] = jnp.log(jnp.float32(initial_sigma))
    params["mu_eq"] = jnp.float32(initial_mu_eq)
    return params


@functools.partial(jax.jit, static_argnames=("tile_m", "bf16_act"))
def linear_fp_pinn_forward(r, t, params, tile_m=1024, bf16_act=None):
    """p(r, t) = softplus(MLP(stack([r, t], axis=1)))  -> shape (N, 1)."""
    if bf16_act is None:
        bf16_act = _bf16_eup_available()
    act_dtype = jnp.bfloat16 if bf16_act else jnp.float32

    n = r.shape[0]
    n_tiles = pl.cdiv(n, tile_m)
    n_pad = n_tiles * tile_m

    # Single streamed input: (2, n_pad) f32, batch along the lane axis.
    xs = jnp.stack([r.astype(jnp.float32), t.astype(jnp.float32)], axis=0)
    if n_pad != n:
        xs = jnp.pad(xs, ((0, 0), (0, n_pad - n)))

    ws, bs = params["weights"], params["biases"]
    w1, w2, w3, w4, w5 = ws
    b1, b2, b3, b4, b5 = bs
    assert w1.shape == (64, 2) and w2.shape == (128, 64)
    assert w3.shape == (128, 128) and w4.shape == (64, 128) and w5.shape == (1, 64)

    # Pack the three MXU weights into one lane-tile-aligned bf16 slab.
    wbig = jnp.zeros((128, 384), jnp.bfloat16)
    wbig = wbig.at[:, 0:128].set(w3.astype(jnp.bfloat16))           # W3
    wbig = wbig.at[0:64, 128:256].set(w4.astype(jnp.bfloat16))      # W4
    wbig = wbig.at[:, 256:320].set(w2.astype(jnp.bfloat16))         # W2

    # Pack the tiny f32 weights and all biases into one (128, 8) f32 slab.
    fsmall = jnp.zeros((128, 8), jnp.float32)
    fsmall = fsmall.at[0:64, 0].set(w1[:, 0])
    fsmall = fsmall.at[0:64, 1].set(w1[:, 1])
    fsmall = fsmall.at[0:64, 2].set(w5.reshape(-1))
    fsmall = fsmall.at[0:64, 3].set(b1)
    fsmall = fsmall.at[:, 4].set(b2)
    fsmall = fsmall.at[:, 5].set(b3)
    fsmall = fsmall.at[0:64, 6].set(b4)
    fsmall = fsmall.at[0, 7].set(b5[0])

    def invariant_spec(a):
        # Grid-invariant full-array block: same block index every step, so it
        # stays resident in VMEM and is not re-fetched across the grid.
        return pl.BlockSpec(a.shape, lambda i: (0, 0))

    kernel = functools.partial(_mlp_kernel, act_dtype=act_dtype)

    out = pl.pallas_call(
        kernel,
        out_shape=jax.ShapeDtypeStruct((1, n_pad), jnp.float32),
        grid_spec=pltpu.PrefetchScalarGridSpec(
            num_scalar_prefetch=0,
            grid=(n_tiles,),
            in_specs=[pl.BlockSpec((2, tile_m), lambda i: (0, i)),
                      invariant_spec(wbig),
                      invariant_spec(fsmall)],
            out_specs=pl.BlockSpec((1, tile_m), lambda i: (0, i)),
        ),
        # "parallel" lets independent batch tiles shard across both
        # TensorCores on v7x; default scoped VMEM limit is ample (few MiB).
        compiler_params=pltpu.CompilerParams(
            dimension_semantics=("parallel",),
        ),
    )(xs, wbig, fsmall)

    return out[0, :n].reshape(n, 1)


def _reference_forward(r, t, params):
    """Pure-JAX f32 reference of the PyTorch forward (for correctness check)."""
    x = jnp.stack([r.astype(jnp.float32), t.astype(jnp.float32)], axis=1)
    ws, bs = params["weights"], params["biases"]
    hi = jax.lax.Precision.HIGHEST
    for w, b in zip(ws[:-1], bs[:-1]):
        x = jnp.tanh(jnp.dot(x, w.T, precision=hi) + b)
    x = jnp.dot(x, ws[-1].T, precision=hi) + bs[-1]
    return jax.nn.softplus(x)


if __name__ == "__main__":
    key = jax.random.PRNGKey(0)
    kp, kr, kt = jax.random.split(key, 3)

    params = init_params(kp)

    # Small example inputs: batch of 8 (rating, time) collocation points.
    n = 8
    r = 2400.0 + 200.0 * jax.random.normal(kr, (n,), jnp.float32)
    t = jax.random.uniform(kt, (n,), jnp.float32, 0.0, 10.0)

    p = linear_fp_pinn_forward(r, t, params)
    p = jax.block_until_ready(p)

    p_ref = _reference_forward(r, t, params)
    assert p.shape == (n, 1)
    # Inner matmuls (and, on v6e/v7x, tanh) run in bf16 with f32 accumulation,
    # so tolerance vs the pure-f32 reference is relaxed accordingly.
    assert jnp.allclose(p, p_ref, rtol=5e-2, atol=2e-2), (p, p_ref)

    print("KERNEL_OK")
</pallas_src>

<mosaic_0001>
module attributes {stable_mosaic.version = 11 : i64} {
  func.func @_mlp_kernel(%arg0: i32, %arg1: memref<2x1024xf32, #tpu.memory_space<vmem>>, %arg2: memref<128x384xbf16, #tpu.memory_space<vmem>>, %arg3: memref<128x8xf32, #tpu.memory_space<vmem>>, %arg4: memref<1x1024xf32, #tpu.memory_space<vmem>>) attributes {dimension_semantics = [#tpu.dimension_semantics<parallel>], iteration_bounds = array<i64: 1>, scalar_prefetch = 0 : i64, scratch_operands = 0 : i64, tpu.core_type = #tpu.core_type<tc>, window_params = [{transform_indices = @transform_0, window_bounds = array<i64: 2, 1024>}, {pipeline_mode = #tpu.pipeline_mode<synchronous>, transform_indices = @transform_1, window_bounds = array<i64: 128, 384>}, {pipeline_mode = #tpu.pipeline_mode<synchronous>, transform_indices = @transform_2, window_bounds = array<i64: 128, 8>}, {transform_indices = @transform_3, window_bounds = array<i64: 1, 1024>}]} {
    %c0 = arith.constant 0 : index
    %c0_0 = arith.constant 0 : index
    %0 = vector.load %arg1[%c0, %c0_0] : memref<2x1024xf32, #tpu.memory_space<vmem>>, vector<1x1024xf32>
    %c1 = arith.constant 1 : index
    %c0_1 = arith.constant 0 : index
    %1 = vector.load %arg1[%c1, %c0_1] : memref<2x1024xf32, #tpu.memory_space<vmem>>, vector<1x1024xf32>
    %c0_2 = arith.constant 0 : index
    %c0_3 = arith.constant 0 : index
    %2 = vector.load %arg3[%c0_2, %c0_3] : memref<128x8xf32, #tpu.memory_space<vmem>>, vector<64x1xf32>
    %c0_4 = arith.constant 0 : index
    %c1_5 = arith.constant 1 : index
    %3 = vector.load %arg3[%c0_4, %c1_5] : memref<128x8xf32, #tpu.memory_space<vmem>>, vector<64x1xf32>
    %c0_6 = arith.constant 0 : index
    %c2 = arith.constant 2 : index
    %4 = vector.load %arg3[%c0_6, %c2] : memref<128x8xf32, #tpu.memory_space<vmem>>, vector<64x1xf32>
    %c0_7 = arith.constant 0 : index
    %c3 = arith.constant 3 : index
    %5 = vector.load %arg3[%c0_7, %c3] : memref<128x8xf32, #tpu.memory_space<vmem>>, vector<64x1xf32>
    %c0_8 = arith.constant 0 : index
    %c4 = arith.constant 4 : index
    %6 = vector.load %arg3[%c0_8, %c4] : memref<128x8xf32, #tpu.memory_space<vmem>>, vector<128x1xf32>
    %c0_9 = arith.constant 0 : index
    %c5 = arith.constant 5 : index
    %7 = vector.load %arg3[%c0_9, %c5] : memref<128x8xf32, #tpu.memory_space<vmem>>, vector<128x1xf32>
    %c0_10 = arith.constant 0 : index
    %c6 = arith.constant 6 : index
    %8 = vector.load %arg3[%c0_10, %c6] : memref<128x8xf32, #tpu.memory_space<vmem>>, vector<64x1xf32>
    %c0_11 = arith.constant 0 : index
    %c7 = arith.constant 7 : index
    %9 = vector.load %arg3[%c0_11, %c7] : memref<128x8xf32, #tpu.memory_space<vmem>>, vector<1x1xf32>
    %c0_12 = arith.constant 0 : index
    %c0_13 = arith.constant 0 : index
    %10 = vector.load %arg2[%c0_12, %c0_13] : memref<128x384xbf16, #tpu.memory_space<vmem>>, vector<128x128xbf16>
    %c0_14 = arith.constant 0 : index
    %c128 = arith.constant 128 : index
    %11 = vector.load %arg2[%c0_14, %c128] : memref<128x384xbf16, #tpu.memory_space<vmem>>, vector<64x128xbf16>
    %c0_15 = arith.constant 0 : index
    %c256 = arith.constant 256 : index
    %12 = vector.load %arg2[%c0_15, %c256] : memref<128x384xbf16, #tpu.memory_space<vmem>>, vector<128x64xbf16>
    %13 = vector.broadcast %2 : vector<64x1xf32> to vector<64x1024xf32>
    %14 = vector.broadcast %0 : vector<1x1024xf32> to vector<64x1024xf32>
    %15 = arith.mulf %13, %14 : vector<64x1024xf32>
    %16 = vector.broadcast %3 : vector<64x1xf32> to vector<64x1024xf32>
    %17 = vector.broadcast %1 : vector<1x1024xf32> to vector<64x1024xf32>
    %18 = arith.mulf %16, %17 : vector<64x1024xf32>
    %19 = arith.addf %15, %18 : vector<64x1024xf32>
    %20 = vector.broadcast %5 : vector<64x1xf32> to vector<64x1024xf32>
    %21 = arith.addf %19, %20 : vector<64x1024xf32>
    %22 = math.tanh %21 : vector<64x1024xf32>
    %23 = arith.truncf %22 : vector<64x1024xf32> to vector<64x1024xbf16>
    %cst = arith.constant dense<0.000000e+00> : vector<128x1024xf32>
    %24 = tpu.matmul %12, %23, %cst {dimension_numbers = #tpu.dot_dimension_numbers<[1], [0], [0], [1], [0, 0, 1, 1], [], []>} : vector<128x64xbf16>, vector<64x1024xbf16>, vector<128x1024xf32> -> vector<128x1024xf32>
    %25 = vector.broadcast %6 : vector<128x1xf32> to vector<128x1024xf32>
    %26 = arith.addf %24, %25 : vector<128x1024xf32>
    %27 = math.tanh %26 : vector<128x1024xf32>
    %28 = arith.truncf %27 : vector<128x1024xf32> to vector<128x1024xbf16>
    %cst_16 = arith.constant dense<0.000000e+00> : vector<128x1024xf32>
    %29 = tpu.matmul %10, %28, %cst_16 {dimension_numbers = #tpu.dot_dimension_numbers<[1], [0], [0], [1], [0, 0, 1, 1], [], []>} : vector<128x128xbf16>, vector<128x1024xbf16>, vector<128x1024xf32> -> vector<128x1024xf32>
    %30 = vector.broadcast %7 : vector<128x1xf32> to vector<128x1024xf32>
    %31 = arith.addf %29, %30 : vector<128x1024xf32>
    %32 = math.tanh %31 : vector<128x1024xf32>
    %33 = arith.truncf %32 : vector<128x1024xf32> to vector<128x1024xbf16>
    %cst_17 = arith.constant dense<0.000000e+00> : vector<64x1024xf32>
    %34 = tpu.matmul %11, %33, %cst_17 {dimension_numbers = #tpu.dot_dimension_numbers<[1], [0], [0], [1], [0, 0, 1, 1], [], []>} : vector<64x128xbf16>, vector<128x1024xbf16>, vector<64x1024xf32> -> vector<64x1024xf32>
    %35 = vector.broadcast %8 : vector<64x1xf32> to vector<64x1024xf32>
    %36 = arith.addf %34, %35 : vector<64x1024xf32>
    %37 = math.tanh %36 : vector<64x1024xf32>
    %38 = vector.broadcast %4 : vector<64x1xf32> to vector<64x1024xf32>
    %39 = arith.mulf %38, %37 : vector<64x1024xf32>
    %cst_18 = arith.constant dense<0.000000e+00> : vector<1024xf32>
    %40 = vector.multi_reduction <add>, %39, %cst_18 [0] : vector<64x1024xf32> to vector<1024xf32>
    %41 = vector.shape_cast %40 : vector<1024xf32> to vector<1x1024xf32>
    %42 = vector.broadcast %9 : vector<1x1xf32> to vector<1x1024xf32>
    %43 = arith.addf %41, %42 : vector<1x1024xf32>
    %cst_19 = arith.constant 0.000000e+00 : f32
    %44 = vector.broadcast %cst_19 : f32 to vector<1x1024xf32>
    %45 = arith.maximumf %43, %44 : vector<1x1024xf32>
    %46 = math.absf %43 : vector<1x1024xf32>
    %cst_20 = arith.constant 0.000000e+00 : f32
    %47 = vector.broadcast %cst_20 : f32 to vector<1x1024xf32>
    %48 = arith.subf %47, %46 : vector<1x1024xf32>
    %49 = math.exp %48 : vector<1x1024xf32>
    %50 = math.log1p %49 : vector<1x1024xf32>
    %51 = arith.addf %45, %50 : vector<1x1024xf32>
    %c0_21 = arith.constant 0 : index
    %c0_22 = arith.constant 0 : index
    %52 = vector.load %arg4[%c0_21, %c0_22] : memref<1x1024xf32, #tpu.memory_space<vmem>>, vector<1x1024xf32>
    tpu.vector_store %arg4[%c0_21, %c0_22], %51 {strides = array<i32>} : memref<1x1024xf32, #tpu.memory_space<vmem>>, vector<1x1024xf32>,
    return
  }
  func.func @transform_0(%arg0: i32) -> (i32, i32) {
    %c0_i32 = arith.constant 0 : i32
    %c0_i32_0 = arith.constant 0 : i32
    return %c0_i32, %arg0 : i32, i32
  }
  func.func @transform_1(%arg0: i32) -> (i32, i32) {
    %c0_i32 = arith.constant 0 : i32
    %c0_i32_0 = arith.constant 0 : i32
    %c0_i32_1 = arith.constant 0 : i32
    return %c0_i32, %c0_i32_0 : i32, i32
  }
  func.func @transform_2(%arg0: i32) -> (i32, i32) {
    %c0_i32 = arith.constant 0 : i32
    %c0_i32_0 = arith.constant 0 : i32
    %c0_i32_1 = arith.constant 0 : i32
    return %c0_i32, %c0_i32_0 : i32, i32
  }
  func.func @transform_3(%arg0: i32) -> (i32, i32) {
    %c0_i32 = arith.constant 0 : i32
    %c0_i32_0 = arith.constant 0 : i32
    return %c0_i32, %arg0 : i32, i32
  }
}

</mosaic_0001>

<bundles_post_ra>
// kernel: linear_fp_pinn_forward.1
= control target key start
LH: loop header
LB: loop body
LE: loop exit
PB: predicated region body
PF: predicated region fallthrough
CT: control target
= control target key end

     0   :  { %v3878_v0 = vmov 1   ;;  %v5598_v1 = vmov 0   ;;  %v3880_v7 = vmov 3   ;;  %v116_v11 = vlaneseq  ;;  %s5594_s2 = inlined_call_operand.vmem [shape: f32[128,8], index: 2, kind: input, shape index: {}]   ;;  %s5595_s1 = inlined_call_operand.vmem [shape: bf16[128,384], index: 1, kind: input, shape index: {}]   ;;  %s5596_s0 = inlined_call_operand.vmem [shape: f32[2,1024], index: 0, kind: input, shape index: {}]   ;;  %s5597_s3 = inlined_call_operand.vmem [shape: f32[1,1024], index: 3, kind: output, shape index: {}]  }
   0x1   :  { %3021 = vset.pattern.permute.xlu1 %v3878_v0  ;;  %3020 = vset.pattern.permute.xlu0 %v5598_v1  ;;  %v18_v2 = vld [vmem:[%s5594_s2] sm:$0xff]  ;;  %v19_v3 = vld [vmem:[%s5594_s2 + $0x8] sm:$0xff]  ;;  %v20_v4 = vld [vmem:[%s5594_s2 + $0x10] sm:$0xff]  ;;  %vm725_vm0 = vcmask 523264  }
   0x2   :  { %221 = vperm.xlu1 %3021, %v18_v2   ;;  %77 = vperm.xlu0 %3020, %v18_v2   ;;  %v21_v5 = vld [vmem:[%s5594_s2 + $0x18] sm:$0xff]  ;;  %v22_v6 = vld [vmem:[%s5594_s2 + $0x20] sm:$0xff]  ;;  %v24_v8 = vld [vmem:[%s5594_s2 + $0x30] sm:$0xff]  ;;  %v3937_v12 = vshrl.u32 %v116_v11, 7 }
   0x3   :  { %782 = vmatprep.mubr.bf16.mxu0 %v5598_v1  ;;  %895 = vmatprep.mubr.bf16.mxu1 %v5598_v1  ;;  %v23_v9 = vld [vmem:[%s5594_s2 + $0x28] sm:$0xff]  ;;  %v25_v10 = vld [vmem:[%s5594_s2 + $0x38] sm:$0xff] }
   0x4   :  { %5622 = vst [vmem:[#allocation2_spill] sm:$0xff] %v3937_v12  ;;  %v122_v13 = vsub.s32 1, %v3937_v12  ;;  %v130_v14 = vsub.s32 3, %v3937_v12  ;;  %v134_v15 = vsub.s32 4, %v3937_v12  ;;  %v142_v16 = vsub.s32 6, %v3937_v12 }
   0x5   :  { %v2958_v17 = vld [vmem:[%s5596_s0 + $0x1] ss:$2 sm:$0xff]  ;;  %v15_v18 = vld [vmem:[%s5596_s0] ss:$2 sm:$0xff]  ;;  %v118_v19 = vsub.s32 0, %v3937_v12  ;;  %v126_v20 = vsub.s32 2, %v3937_v12 }
   0x6   :  { %225 = vperm.xlu1 %3021, %v19_v3   ;;  %82 = vperm.xlu0 %3020, %v19_v3   ;;  %v138_v21 = vsub.s32 5, %v3937_v12  ;;  %v3952_v22 = vrot.slane %v15_v18, %v122_v13  ;;  %v3954_v23 = vrot.slane %v2958_v17, %v122_v13  ;;  %v3956_v24 = vrot.slane %v15_v18, %v130_v14 }
   0x7   :  { %v3958_v25 = vrot.slane %v2958_v17, %v130_v14  ;;  %v3962_v27 = vrot.slane %v2958_v17, %v134_v15  ;;  %v3964_v28 = vrot.slane %v2958_v17, %v142_v16  ;;  %v146_v30 = vsub.s32 7, %v3937_v12 }
   0x8   :  { %v3969_v31 = vrot.slane %v15_v18, %v134_v15  ;;  %v3971_v32 = vrot.slane %v15_v18, %v142_v16  ;;  %v3973_v33 = vrot.slane %v15_v18, %v118_v19  ;;  %v3975_v34 = vrot.slane %v2958_v17, %v118_v19 }
   0x9   :  { %v3977_v35 = vrot.slane %v15_v18, %v126_v20  ;;  %v3979_v36 = vrot.slane %v2958_v17, %v126_v20  ;;  %v3981_v37 = vrot.slane %v15_v18, %v138_v21  ;;  %v3983_v38 = vrot.slane %v2958_v17, %v138_v21 }
   0xa   :  { %3022 = vset.pattern.permute.xlu1 %v5598_v1  ;;  %87 = vperm.xlu0 %3020, %v20_v4   ;;  %v4003_v47 = vrot.slane %v15_v18, %v146_v30  ;;  %v4005_v48 = vrot.slane %v2958_v17, %v146_v30 }
   0xb   :  { %92 = vperm.xlu1 %3022, %v21_v5   ;;  %5623 = vst [vmem:[#allocation3_spill] sm:$0xff] %v3979_v36  ;;  %5624 = vst [vmem:[#allocation4_spill] sm:$0xff] %v3981_v37 }
   0xc   :  { %5625 = vst [vmem:[#allocation5_spill] sm:$0xff] %v3983_v38  ;;  %5626 = vst [vmem:[#allocation6_spill] sm:$0xff] %v4003_v47 }
   0xe   :  { %3023 = vset.pattern.permute.xlu0 %v3878_v0 }
   0xf   :  { %3024 = vset.pattern.permute.xlu1 %v3878_v0  ;;  %229 = vperm.xlu0 %3023, %v20_v4  }
  0x10   :  { %233 = vperm.xlu1 %3024, %v21_v5  }
  0x13   :  { %237 = vperm.xlu0 %3023, %v22_v6  }
  0x14   :  { %3025 = vset.pattern.permute.xlu1 %v3880_v7 }
  0x15   :  { %422 = vperm.xlu1 %3025, %v18_v2  }
  0x17   :  { %245 = vperm.xlu0 %3023, %v24_v8  }
  0x19   :  { %3026 = vset.pattern.permute.xlu1 %v5598_v1 }
  0x1a   :  { %97 = vperm.xlu1 %3026, %v22_v6  }
  0x1b   :  { %3030 = vset.pattern.permute.xlu0 %v3880_v7 }
  0x1c   :  { %426 = vperm.xlu0 %3030, %v19_v3  }
  0x1e   :  { %102 = vperm.xlu1 %3026, %v23_v9  }
  0x20   :  { %434 = vperm.xlu0 %3030, %v21_v5  }
  0x22   :  { %3027 = vset.pattern.permute.xlu1 %v3878_v0 }
  0x23   :  { %241 = vperm.xlu1 %3027, %v23_v9  }
  0x24   :  { %442 = vperm.xlu0 %3030, %v23_v9  }
  0x27   :  { %3028 = vset.pattern.permute.xlu1 %v3880_v7 }
  0x28   :  { %430 = vperm.xlu1 %3028, %v20_v4  }
  0x2c   :  { %3029 = vset.pattern.permute.xlu1 %v5598_v1 }
  0x2d   :  { %107 = vperm.xlu1 %3029, %v24_v8  }
  0x31   :  { %112 = vperm.xlu1 %3029, %v25_v10  }
  0x35   :  { %3031 = vset.pattern.permute.xlu1 %v3878_v0 }
  0x36   :  { %249 = vperm.xlu1 %3031, %v25_v10  }
  0x3a   :  { %3032 = vset.pattern.permute.xlu1 %v3880_v7 }
  0x3b   :  { %438 = vperm.xlu1 %3032, %v22_v6  }
  0x3f   :  { %446 = vperm.xlu1 %3032, %v24_v8  }
  0x43   :  { %450 = vperm.xlu1 %3032, %v25_v10  }
  0x81   :  { %v3960_v26 = vpop.permute.xlu1 %221  ;;  %v3966_v29 = vpop.permute.xlu0 %77 }
  0x82   :  { %v157_v39 = vmul.f32 %v3952_v22, %v3966_v29  ;;  %v294_v40 = vmul.f32 %v3954_v23, %v3960_v26  ;;  %v159_v41 = vmul.f32 %v3956_v24, %v3966_v29  ;;  %v296_v42 = vmul.f32 %v3958_v25, %v3960_v26 }
  0x83   :  { %v3995_v43 = vmul.f32 %v3962_v27, %v3960_v26  ;;  %v3999_v44 = vmul.f32 %v3964_v28, %v3960_v26  ;;  %v4009_v49 = vmul.f32 %v3969_v31, %v3966_v29  ;;  %v4013_v50 = vmul.f32 %v3971_v32, %v3966_v29 }
  0x84   :  { %v156_v51 = vmul.f32 %v3973_v33, %v3966_v29  ;;  %v293_v52 = vmul.f32 %v3975_v34, %v3960_v26  ;;  %v158_v55 = vmul.f32 %v3977_v35, %v3966_v29  ;;  %v295_v56 = vmul.f32 %v3979_v36, %v3960_v26 }
  0x85   :  { %v4001_v45 = vpop.permute.xlu1 %225  ;;  %v83_v46 = vpop.permute.xlu0 %82  ;;  %v358_v57 = vadd.f32 %v294_v40, %v157_v39  ;;  %v360_v60 = vadd.f32 %v296_v42, %v159_v41  ;;  %v161_v0 = vmul.f32 %v3981_v37, %v3966_v29  ;;  %v298_v2 = vmul.f32 %v3983_v38, %v3960_v26 }
  0x86   :  { %v165_v53 = vmul.f32 %v3952_v22, %v83_v46  ;;  %v302_v54 = vmul.f32 %v3954_v23, %v4001_v45  ;;  %v167_v58 = vmul.f32 %v3956_v24, %v83_v46  ;;  %v304_v59 = vmul.f32 %v3958_v25, %v4001_v45 }
  0x87   :  { %v164_v62 = vmul.f32 %v3973_v33, %v83_v46  ;;  %v301_v63 = vmul.f32 %v3975_v34, %v4001_v45  ;;  %v4040_v3 = vmul.f32 %v3962_v27, %v4001_v45  ;;  %v4044_v4 = vmul.f32 %v3964_v28, %v4001_v45 }
  0x88   :  { %v166_v6 = vmul.f32 %v3977_v35, %v83_v46  ;;  %v303_v7 = vmul.f32 %v3979_v36, %v4001_v45  ;;  %v4052_v8 = vmul.f32 %v3969_v31, %v83_v46  ;;  %v4055_v9 = vmul.f32 %v3971_v32, %v83_v46 }
  0x89   :  { %v4029_v61 = vpop.permute.xlu0 %87  ;;  %v4057_v10 = vadd.f32 %v302_v54, %v165_v53  ;;  %v357_v11 = vadd.f32 %v293_v52, %v156_v51  ;;  %v4067_v15 = vadd.f32 %v304_v59, %v167_v58  ;;  %v359_v16 = vadd.f32 %v295_v56, %v158_v55 }
  0x8a   :  { %5627 = vst [vmem:[#allocation7_spill] sm:$0xff] %v4029_v61  ;;  %v4046_v5 = vpop.permute.xlu1 %92  ;;  %v4061_v13 = vmul.f32 %v3969_v31, %v4029_v61  ;;  %v4065_v14 = vmul.f32 %v3971_v32, %v4029_v61  ;;  %v4077_v19 = vadd.f32 %v301_v63, %v164_v62  ;;  %v173_v20 = vmul.f32 %v3952_v22, %v4029_v61 }
  0x8b   :  { %5628 = vst [vmem:[#allocation8_spill] sm:$0xff] %v4046_v5  ;;  %v4071_v17 = vmul.f32 %v3969_v31, %v4046_v5  ;;  %v4075_v18 = vmul.f32 %v3971_v32, %v4046_v5  ;;  %v4083_v30 = vadd.f32 %v303_v7, %v166_v6  ;;  %v181_v39 = vmul.f32 %v3952_v22, %v4046_v5 }
  0x8c   :  { %5629 = vst [vmem:[#allocation9_spill] sm:$0xff] %v4061_v13  ;;  %5630 = vst [vmem:[#allocation10_spill] sm:$0xff] %v4065_v14  ;;  %v175_v40 = vmul.f32 %v3956_v24, %v4029_v61  ;;  %v183_v41 = vmul.f32 %v3956_v24, %v4046_v5  ;;  %v172_v51 = vmul.f32 %v3973_v33, %v4029_v61 }
  0x8d   :  { %5631 = vst [vmem:[#allocation11_spill] sm:$0xff] %v4071_v17  ;;  %5632 = vst [vmem:[#allocation12_spill] sm:$0xff] %v4075_v18  ;;  %v180_v52 = vmul.f32 %v3973_v33, %v4046_v5  ;;  %v174_v53 = vmul.f32 %v3977_v35, %v4029_v61  ;;  %v182_v54 = vmul.f32 %v3977_v35, %v4046_v5 }
  0x8e   :  { %v4081_v21 = vpop.permute.xlu0 %229  ;;  %v169_v58 = vmul.f32 %v3981_v37, %v83_v46  ;;  %v306_v59 = vmul.f32 %v3983_v38, %v4001_v45  ;;  %v362_v6 = vadd.f32 %v298_v2, %v161_v0  ;;  %v163_v7 = vmul.f32 %v4003_v47, %v3966_v29 }
  0x8f   :  { %5633 = vst [vmem:[#allocation13_spill] sm:$0xff] %v4081_v21  ;;  %v4091_v42 = vpop.permute.xlu1 %233  ;;  %v310_v55 = vmul.f32 %v3954_v23, %v4081_v21  ;;  %v312_v56 = vmul.f32 %v3958_v25, %v4081_v21  ;;  %v4116_v1 = vmul.f32 %v3962_v27, %v4081_v21  ;;  %v309_v18 = vmul.f32 %v3975_v34, %v4081_v21 }
  0x90   :  { %v318_v62 = vmul.f32 %v3954_v23, %v4091_v42  ;;  %v320_v63 = vmul.f32 %v3958_v25, %v4091_v42  ;;  %v4123_v14 = vmul.f32 %v4003_v47, %v83_v46  ;;  %v300_v17 = vmul.f32 %v4005_v48, %v3960_v26 }
  0x91   :  { %5634 = vst [vmem:[#allocation14_spill] sm:$0xff] %v4116_v1  ;;  %v4129_v0 = vmul.f32 %v3964_v28, %v4081_v21  ;;  %v317_v29 = vmul.f32 %v3975_v34, %v4091_v42  ;;  %v311_v2 = vmul.f32 %v3979_v36, %v4081_v21  ;;  %v319_v1 = vmul.f32 %v3979_v36, %v4091_v42 }
  0x92   :  { %v4118_v12 = vpop.permute.xlu0 %237  ;;  %v4139_v46 = vmul.f32 %v3962_v27, %v4091_v42  ;;  %v4143_v26 = vmul.f32 %v3964_v28, %v4091_v42  ;;  %v4149_v47 = vadd.f32 %v312_v56, %v175_v40  ;;  %v382_v21 = vadd.f32 %v318_v62, %v181_v39 }
  0x93   :  { %5635 = vst [vmem:[#allocation15_spill] sm:$0xff] %v4118_v12  ;;  %5636 = vst [vmem:[#allocation16_spill] sm:$0xff] %v4129_v0  ;;  %v4147_v0 = vadd.f32 %v310_v55, %v173_v20  ;;  %v384_v37 = vadd.f32 %v320_v63, %v183_v41  ;;  %v4155_v61 = vmul.f32 %v3962_v27, %v4118_v12 }
  0x94   :  { %5637 = vst [vmem:[#allocation17_spill] sm:$0xff] %v4139_v46  ;;  %5638 = vst [vmem:[#allocation18_spill] sm:$0xff] %v4143_v26  ;;  %v4145_v13 = vpop.permute.xlu1 %422  ;;  %v4159_v46 = vmul.f32 %v3964_v28, %v4118_v12  ;;  %v4164_v40 = vadd.f32 %v309_v18, %v172_v51  ;;  %v381_v55 = vadd.f32 %v317_v29, %v180_v52 }
  0x95   :  { %v454_v5 = vadd.f32 %v4145_v13, %v358_v57  ;;  %v456_v38 = vadd.f32 %v4145_v13, %v360_v60  ;;  %5639 = vst [vmem:[#allocation19_spill] sm:$0xff] %v4155_v61  ;;  %v453_v20 = vadd.f32 %v4145_v13, %v357_v11  ;;  %v455_v57 = vadd.f32 %v4145_v13, %v359_v16 }
  0x96   :  { %5640 = vst [vmem:[#allocation20_spill] sm:$0xff] %v4159_v46  ;;  %v4161_v26 = vpop.permute.xlu0 %245  ;;  %v4167_v60 = vadd.f32 %v311_v2, %v174_v53  ;;  %v383_v39 = vadd.f32 %v319_v1, %v182_v54  ;;  %v326_v41 = vmul.f32 %v3954_v23, %v4118_v12  ;;  %v328_v56 = vmul.f32 %v3958_v25, %v4118_v12 }
  0x97   :  { %5641 = vst [vmem:[#allocation21_spill] sm:$0xff] %v4161_v26  ;;  %3062 = vtanh.f32 %v454_v5  ;;  %v325_v62 = vmul.f32 %v3975_v34, %v4118_v12  ;;  %v327_v11 = vmul.f32 %v3979_v36, %v4118_v12  ;;  %v370_v16 = vadd.f32 %v306_v59, %v169_v58 }
  0x98   :  { %3064 = vtanh.f32 %v456_v38  ;;  %v458_v18 = vadd.f32 %v4145_v13, %v362_v6  ;;  %v4182_v1 = vmul.f32 %v3962_v27, %v4161_v26  ;;  %v4186_v5 = vmul.f32 %v3964_v28, %v4161_v26 }
  0x99   :  { %v4175_v63 = vpop.permute.xlu1 %97  ;;  %3066 = vtanh.f32 %v453_v20  ;;  %v4190_v51 = vmul.f32 %v3954_v23, %v4161_v26  ;;  %v4198_v53 = vmul.f32 %v3958_v25, %v4161_v26  ;;  %v4202_v54 = vmul.f32 %v3975_v34, %v4161_v26 }
  0x9a   :  { %5642 = vst [vmem:[#allocation22_spill] sm:$0xff] %v4175_v63  ;;  %5643 = vst [vmem:[#allocation23_spill] sm:$0xff] %v4182_v1  ;;  %3068 = vtanh.f32 %v455_v57  ;;  %v189_v52 = vmul.f32 %v3952_v22, %v4175_v63  ;;  %v191_v29 = vmul.f32 %v3956_v24, %v4175_v63  ;;  %v188_v57 = vmul.f32 %v3973_v33, %v4175_v63 }
  0x9b   :  { %5644 = vst [vmem:[#allocation24_spill] sm:$0xff] %v4186_v5  ;;  %v4192_v38 = vpop.permute.xlu0 %426  ;;  %3070 = vtanh.f32 %v458_v18  ;;  %v364_v5 = vadd.f32 %v300_v17, %v163_v7  ;;  %v4228_v1 = vmul.f32 %v3969_v31, %v4175_v63  ;;  %v361_v18 = vadd.f32 %v3995_v43, %v4009_v49 }
  0x9c   :  { %v462_v58 = vadd.f32 %v4192_v38, %v4057_v10  ;;  %v464_v59 = vadd.f32 %v4192_v38, %v4067_v15  ;;  %v461_v6 = vadd.f32 %v4192_v38, %v4077_v19  ;;  %v463_v20 = vadd.f32 %v4192_v38, %v4083_v30 }
  0x9d   :  { %v4212_v2 = vpop.permute.xlu1 %102  ;;  %v190_v10 = vmul.f32 %v3977_v35, %v4175_v63  ;;  %v4222_v15 = vmul.f32 %v3979_v36, %v4161_v26  ;;  %v308_v19 = vmul.f32 %v4005_v48, %v4001_v45  ;;  %5646 = vst [vmem:[#allocation26_spill] sm:$0xff] %v4228_v1  ;;  %v4232_v30 = vmul.f32 %v3971_v32, %v4175_v63 }
  0x9e   :  { %5645 = vst [vmem:[#allocation25_spill] sm:$0xff] %v4212_v2  ;;  %3072 = vtanh.f32 %v462_v58  ;;  %v4239_v26 = vadd.f32 %v326_v41, %v189_v52  ;;  %v4241_v45 = vadd.f32 %v328_v56, %v191_v29  ;;  %v4244_v7 = vadd.f32 %v325_v62, %v188_v57 }
  0x9f   :  { %5647 = vst [vmem:[#allocation27_spill] sm:$0xff] %v4232_v30  ;;  %v4234_v46 = vpop.permute.xlu0 %434  ;;  %3074 = vtanh.f32 %v464_v59  ;;  %v4246_v61 = vadd.f32 %v327_v11, %v190_v10  ;;  %v4250_v59 = vmul.f32 %v3969_v31, %v4212_v2  ;;  %v4254_v43 = vmul.f32 %v3971_v32, %v4212_v2 }
  0xa0   :  { %3076 = vtanh.f32 %v461_v6  ;;  %v478_v58 = vadd.f32 %v4234_v46, %v382_v21  ;;  %v480_v17 = vadd.f32 %v4234_v46, %v384_v37  ;;  %v477_v21 = vadd.f32 %v4234_v46, %v381_v55 }
  0xa1   :  { %3078 = vtanh.f32 %v463_v20  ;;  %5648 = vst [vmem:[#allocation28_spill] sm:$0xff] %v4246_v61  ;;  %v3063_v30 = vpop.eup %3062  ;;  %5649 = vst [vmem:[#allocation29_spill] sm:$0xff] %v4250_v59  ;;  %v197_v37 = vmul.f32 %v3952_v22, %v4212_v2  ;;  %v479_v56 = vadd.f32 %v4234_v46, %v383_v39  ;;  %v199_v11 = vmul.f32 %v3956_v24, %v4212_v2 }
  0xa2   :  { %5650 = vst [vmem:[#allocation30_spill] sm:$0xff] %v4254_v43  ;;  %v4256_v49 = vpop.permute.xlu1 %241  ;;  %v3065_v41 = vpop.eup %3064  ;;  %v196_v52 = vmul.f32 %v3973_v33, %v4212_v2  ;;  %3080 = vtanh.f32 %v478_v58  ;;  %v466_v20 = vadd.f32 %v4192_v38, %v370_v16  ;;  %v198_v57 = vmul.f32 %v3977_v35, %v4212_v2 }
  0xa3   :  { %v334_v62 = vmul.f32 %v3954_v23, %v4256_v49  ;;  %v3067_v6 = vpop.eup %3066  ;;  %v336_v55 = vmul.f32 %v3958_v25, %v4256_v49  ;;  %v333_v29 = vmul.f32 %v3975_v34, %v4256_v49  ;;  %3082 = vtanh.f32 %v480_v17  ;;  %v4288_v61 = vpop.permute.xlu0 %442 }
  0xa4   :  { %v3069_v39 = vpop.eup %3068  ;;  %v335_v10 = vmul.f32 %v3979_v36, %v4256_v49  ;;  %v460_v43 = vadd.f32 %v4145_v13, %v364_v5  ;;  %3084 = vtanh.f32 %v477_v21  ;;  %v372_v58 = vadd.f32 %v308_v19, %v4123_v14 }
  0xa5   :  { %v369_v1 = vadd.f32 %v4040_v3, %v4052_v8  ;;  %v4282_v59 = vadd.f32 %v4145_v13, %v361_v18  ;;  %v4284_v16 = vpop.eup %3070  ;;  %3086 = vtanh.f32 %v479_v56  ;;  %v398_v12 = vadd.f32 %v334_v62, %v197_v37 }
  0xa6   :  { %v400_v2 = vadd.f32 %v336_v55, %v199_v11  ;;  %v397_v63 = vadd.f32 %v333_v29, %v196_v52  ;;  %3088 = vtanh.f32 %v466_v20  ;;  %v399_v21 = vadd.f32 %v335_v10, %v198_v57  ;;  %v5651_v20 = vld [vmem:[#allocation7_spill] sm:$0xff]  ;;  %v5654_v57 = vld [vmem:[#allocation5_spill] sm:$0xff] }
  0xa7   :  { %v4286_v17 = vpop.permute.xlu1 %430  ;;  %3090 = vtanh.f32 %v460_v43  ;;  %v4300_v56 = vmul.f32 %v3962_v27, %v4256_v49  ;;  %v363_v52 = vadd.f32 %v3999_v44, %v4013_v50  ;;  %v5653_v50 = vld [vmem:[#allocation13_spill] sm:$0xff] }
  0xa8   :  { %v3073_v36 = vpop.eup %3072  ;;  %v470_v14 = vadd.f32 %v4286_v17, %v4147_v0  ;;  %v472_v3 = vadd.f32 %v4286_v17, %v4149_v47  ;;  %v469_v8 = vadd.f32 %v4286_v17, %v4164_v40  ;;  %v471_v18 = vadd.f32 %v4286_v17, %v4167_v60 }
  0xa9   :  { %v3075_v5 = vpop.eup %3074  ;;  %v582_v19 = vpack.c.bf16 %v3073_v36, %v3063_v30  ;;  %v4304_v0 = vmul.f32 %v3964_v28, %v4256_v49  ;;  %v494_v36 = vadd.f32 %v4288_v61, %v398_v12  ;;  %v468_v60 = vadd.f32 %v4192_v38, %v372_v58 }
  0xaa   :  { %v3077_v37 = vpop.eup %3076  ;;  %v584_v47 = vpack.c.bf16 %v3075_v5, %v3065_v41  ;;  %3092 = vtanh.f32 %v470_v14  ;;  %v496_v11 = vadd.f32 %v4288_v61, %v400_v2  ;;  %v493_v41 = vadd.f32 %v4288_v61, %v397_v63 }
  0xab   :  { %v3079_v40 = vpop.eup %3078  ;;  %750 = vmatprep.subr.bf16.mxu0 %v582_v19  ;;  %v581_v62 = vpack.c.bf16 %v3077_v37, %v3067_v6  ;;  %3094 = vtanh.f32 %v472_v3  ;;  %v495_v6 = vadd.f32 %v4288_v61, %v399_v21  ;;  %v371_v12 = vadd.f32 %v4044_v4, %v4055_v9  ;;  %v5655_v19 = vld [vmem:[#allocation8_spill] sm:$0xff] }
  0xac   :  { %863 = vmatprep.subr.bf16.mxu1 %v584_v47  ;;  %v4308_v30 = vpop.permute.xlu1 %107  ;;  %v583_v43 = vpack.c.bf16 %v3079_v40, %v3069_v39  ;;  %3096 = vtanh.f32 %v469_v8  ;;  %v3081_v55 = vpop.eup %3080  ;;  %v5652_v39 = vld [vmem:[#allocation4_spill] sm:$0xff]  ;;  %v314_v10 = vmul.f32 %v5654_v57, %v5653_v50  ;;  %v465_v9 = vadd.f32 %v4192_v38, %v369_v1 }
  0xad   :  { %751 = vmatpush1.bf16.msra.mxu0 %v581_v62  ;;  %3098 = vtanh.f32 %v471_v18  ;;  %v205_v29 = vmul.f32 %v3952_v22, %v4308_v30  ;;  %v207_v2 = vmul.f32 %v3956_v24, %v4308_v30  ;;  %v177_v44 = vmul.f32 %v5652_v39, %v5651_v20  ;;  %v3083_v63 = vpop.eup %3082 }
  0xae   :  { %864 = vmatpush1.bf16.msra.mxu1 %v583_v43  ;;  %3100 = vtanh.f32 %v494_v36  ;;  %v204_v58 = vmul.f32 %v3973_v33, %v4308_v30  ;;  %v206_v4 = vmul.f32 %v3977_v35, %v4308_v30  ;;  %v3085_v14 = vpop.eup %3084  ;;  %v459_v8 = vadd.f32 %v4145_v13, %v363_v52 }
  0xaf   :  { %3102 = vtanh.f32 %v496_v11  ;;  %v467_v5 = vadd.f32 %v4192_v38, %v371_v12  ;;  %v185_v18 = vmul.f32 %v5652_v39, %v5655_v19  ;;  %v3087_v21 = vpop.eup %3086  ;;  %v4338_v37 = vmul.f32 %v3969_v31, %v4308_v30 }
  0xb0   :  { %v4330_v3 = vpop.permute.xlu1 %112  ;;  %v4342_v47 = vmul.f32 %v3971_v32, %v4308_v30  ;;  %3104 = vtanh.f32 %v493_v41  ;;  %v322_v1 = vmul.f32 %v5654_v57, %v4091_v42  ;;  %v4346_v40 = vpop.eup %3088  ;;  %v4349_v13 = vadd.f32 %v4190_v51, %v205_v29 }
  0xb1   :  { %3106 = vtanh.f32 %v495_v6  ;;  %v4352_v38 = vadd.f32 %v4198_v53, %v207_v2  ;;  %v378_v62 = vadd.f32 %v314_v10, %v177_v44  ;;  %v4354_v36 = vpop.eup %3090  ;;  %v4358_v43 = vmul.f32 %v3969_v31, %v4330_v3  ;;  %v5656_v31 = vld [vmem:[#allocation6_spill] sm:$0xff] }
  0xb2   :  { %v4362_v11 = vmul.f32 %v3971_v32, %v4330_v3  ;;  %v4365_v52 = vadd.f32 %v4202_v54, %v204_v58  ;;  %v4368_v51 = vadd.f32 %v4222_v15, %v206_v4  ;;  %v213_v53 = vmul.f32 %v3952_v22, %v4330_v3 }
  0xb3   :  { %v215_v6 = vmul.f32 %v3956_v24, %v4330_v3  ;;  %v179_v12 = vmul.f32 %v5656_v31, %v5651_v20  ;;  %v316_v32 = vmul.f32 %v4005_v48, %v5653_v50  ;;  %v212_v15 = vmul.f32 %v3973_v33, %v4330_v3 }
  0xb4   :  { %v3093_v41 = vpop.eup %3092  ;;  %3108 = vtanh.f32 %v468_v60  ;;  %v386_v44 = vadd.f32 %v322_v1, %v185_v18  ;;  %v214_v24 = vmul.f32 %v3977_v35, %v4330_v3  ;;  %v474_v20 = vadd.f32 %v4286_v17, %v378_v62  ;;  %v5657_v1 = vld [vmem:[#allocation9_spill] sm:$0xff] }
  0xb5   :  { %v3095_v29 = vpop.eup %3094  ;;  %v4378_v2 = vpop.permute.xlu1 %249  ;;  %v590_v54 = vpack.c.bf16 %v3081_v55, %v3093_v41  ;;  %3110 = vtanh.f32 %v4282_v59  ;;  %v586_v55 = vpack.c.bf16 %v4346_v40, %v4284_v16  ;;  %v380_v35 = vadd.f32 %v316_v32, %v179_v12  ;;  %v5659_v32 = vld [vmem:[#allocation28_spill] sm:$0xff] }
  0xb6   :  { %v3097_v10 = vpop.eup %3096  ;;  %v592_v22 = vpack.c.bf16 %v3083_v63, %v3095_v29  ;;  %3112 = vtanh.f32 %v465_v9  ;;  %v482_v33 = vadd.f32 %v4234_v46, %v386_v44  ;;  %v187_v63 = vmul.f32 %v5656_v31, %v5655_v19  ;;  %v5678_v40 = vld [vmem:[#allocation24_spill] sm:$0xff] }
  0xb7   :  { %v3099_v58 = vpop.eup %3098  ;;  %752 = vmatprep.subr.bf16.mxu0 %v590_v54  ;;  %v589_v50 = vpack.c.bf16 %v3085_v14, %v3097_v10  ;;  %3114 = vtanh.f32 %v459_v8  ;;  %v350_v59 = vmul.f32 %v3954_v23, %v4378_v2  ;;  %v352_v14 = vmul.f32 %v3958_v25, %v4378_v2  ;;  %v5658_v23 = vld [vmem:[#allocation14_spill] sm:$0xff]  ;;  %v5660_v54 = vld [vmem:[#allocation3_spill] sm:$0xff] }
  0xb8   :  { %865 = vmatprep.subr.bf16.mxu1 %v592_v22  ;;  %v591_v60 = vpack.c.bf16 %v3087_v21, %v3099_v58  ;;  %v4391_v4 = vpop.eup %3100  ;;  %3116 = vtanh.f32 %v467_v5  ;;  %v324_v9 = vmul.f32 %v4005_v48, %v4091_v42  ;;  %v349_v19 = vmul.f32 %v3975_v34, %v4378_v2  ;;  %v5662_v58 = vld [vmem:[#allocation17_spill] sm:$0xff] }
  0xb9   :  { %753 = vmatpush1.bf16.msra.mxu0 %v589_v50  ;;  %v4399_v18 = vpop.eup %3102  ;;  %3118 = vtanh.f32 %v474_v20  ;;  %v476_v21 = vadd.f32 %v4286_v17, %v380_v35  ;;  %v377_v62 = vadd.f32 %v5658_v23, %v5657_v1  ;;  %v4420_v34 = vmul.f32 %v3962_v27, %v4378_v2  ;;  %v5661_v20 = vld [vmem:[#allocation11_spill] sm:$0xff] }
  0xba   :  { %866 = vmatpush1.bf16.msra.mxu1 %v591_v60  ;;  %v4401_v8 = vpop.permute.xlu1 %438  ;;  %v4408_v41 = vpop.eup %3104  ;;  %3120 = vtanh.f32 %v482_v33  ;;  %v351_v44 = vmul.f32 %v5660_v54, %v4378_v2  ;;  %v413_v22 = vadd.f32 %v349_v19, %v212_v15  ;;  %v388_v27 = vadd.f32 %v324_v9, %v187_v63  ;;  %v5664_v19 = vld [vmem:[#allocation25_spill] sm:$0xff]  ;;  %v5665_v1 = vld [vmem:[#allocation15_spill] sm:$0xff] }
  0xbb   :  { %v486_v25 = vadd.f32 %v4401_v8, %v4239_v26  ;;  %v488_v42 = vadd.f32 %v4401_v8, %v4241_v45  ;;  %v485_v5 = vadd.f32 %v4401_v8, %v4244_v7  ;;  %v4416_v12 = vpop.eup %3106  ;;  %v487_v29 = vadd.f32 %v4401_v8, %v5659_v32 }
  0xbc   :  { %3122 = vtanh.f32 %v476_v21  ;;  %v4428_v26 = vmul.f32 %v3964_v28, %v4378_v2  ;;  %v414_v45 = vadd.f32 %v350_v59, %v213_v53  ;;  %v416_v7 = vadd.f32 %v352_v14, %v215_v6 }
  0xbd   :  { %3124 = vtanh.f32 %v486_v25  ;;  %v385_v50 = vadd.f32 %v5662_v58, %v5661_v20  ;;  %v415_v15 = vadd.f32 %v351_v44, %v214_v24  ;;  %v484_v35 = vadd.f32 %v4234_v46, %v388_v27  ;;  %v5663_v24 = vld [vmem:[#allocation22_spill] sm:$0xff]  ;;  %v5667_v58 = vld [vmem:[#allocation16_spill] sm:$0xff] }
  0xbe   :  { %v4430_v10 = vpop.permute.xlu1 %446  ;;  %3126 = vtanh.f32 %v488_v42  ;;  %v4434_v33 = vpop.eup %3108  ;;  %v201_v21 = vmul.f32 %v5652_v39, %v5664_v19  ;;  %v330_v23 = vmul.f32 %v5654_v57, %v5665_v1  ;;  %v5666_v20 = vld [vmem:[#allocation10_spill] sm:$0xff] }
  0xbf   :  { %3128 = vtanh.f32 %v485_v5  ;;  %v502_v60 = vadd.f32 %v4430_v10, %v4349_v13  ;;  %v504_v28 = vadd.f32 %v4430_v10, %v4352_v38  ;;  %v501_v53 = vadd.f32 %v4430_v10, %v4365_v52  ;;  %v4442_v6 = vpop.eup %3110 }
  0xc0   :  { %3130 = vtanh.f32 %v487_v29  ;;  %v503_v63 = vadd.f32 %v4430_v10, %v4368_v51  ;;  %v4447_v59 = vpop.eup %3112  ;;  %v473_v13 = vadd.f32 %v4286_v17, %v377_v62  ;;  %v481_v14 = vadd.f32 %v4234_v46, %v385_v50  ;;  %v5668_v50 = vld [vmem:[#allocation12_spill] sm:$0xff] }
  0xc1   :  { %3132 = vtanh.f32 %v502_v60  ;;  %v338_v38 = vmul.f32 %v5654_v57, %v4256_v49  ;;  %v4453_v52 = vpop.eup %3114  ;;  %v193_v51 = vmul.f32 %v5652_v39, %v5663_v24  ;;  %v588_v54 = vpack.c.bf16 %v4434_v33, %v4354_v36 }
  0xc2   :  { %v4455_v9 = vpop.permute.xlu1 %450  ;;  %3134 = vtanh.f32 %v504_v28  ;;  %v4463_v62 = vpop.eup %3116 }
  0xc3   :  { %v510_v25 = vadd.f32 %v4455_v9, %v414_v45  ;;  %v512_v42 = vadd.f32 %v4455_v9, %v416_v7  ;;  %v509_v5 = vadd.f32 %v4455_v9, %v413_v22  ;;  %3136 = vtanh.f32 %v501_v53  ;;  %v4468_v32 = vpop.eup %3118  ;;  %v5669_v7 = vld [vmem:[#allocation18_spill] sm:$0xff] }
  0xc4   :  { %v511_v29 = vadd.f32 %v4455_v9, %v415_v15  ;;  %3138 = vtanh.f32 %v503_v63  ;;  %v402_v44 = vadd.f32 %v338_v38, %v201_v21  ;;  %v4473_v27 = vpop.eup %3120  ;;  %v379_v45 = vadd.f32 %v5667_v58, %v5666_v20 }
  0xc5   :  { %3140 = vtanh.f32 %v510_v25  ;;  %v387_v60 = vadd.f32 %v5669_v7, %v5668_v50  ;;  %v340_v22 = vmul.f32 %v4005_v48, %v4256_v49  ;;  %v394_v53 = vadd.f32 %v330_v23, %v193_v51 }
  0xc6   :  { %v4481_v28 = vpop.eup %3122  ;;  %3142 = vtanh.f32 %v512_v42  ;;  %v195_v15 = vmul.f32 %v5656_v31, %v5663_v24  ;;  %v332_v63 = vmul.f32 %v4005_v48, %v5665_v1  ;;  %v475_v21 = vadd.f32 %v4286_v17, %v379_v45 }
  0xc7   :  { %v3125_v38 = vpop.eup %3124  ;;  %3144 = vtanh.f32 %v509_v5  ;;  %v483_v25 = vadd.f32 %v4234_v46, %v387_v60  ;;  %v203_v20 = vmul.f32 %v5656_v31, %v5664_v19  ;;  %v490_v51 = vadd.f32 %v4401_v8, %v394_v53  ;;  %v5670_v5 = vld [vmem:[#allocation29_spill] sm:$0xff] }
  0xc8   :  { %v3127_v49 = vpop.eup %3126  ;;  %v598_v58 = vpack.c.bf16 %v4391_v4, %v3125_v38  ;;  %3146 = vtanh.f32 %v511_v29  ;;  %v498_v24 = vadd.f32 %v4288_v61, %v402_v44  ;;  %v401_v17 = vadd.f32 %v4300_v56, %v5670_v5  ;;  %v5671_v4 = vld [vmem:[#allocation26_spill] sm:$0xff]  ;;  %v5672_v29 = vld [vmem:[#allocation19_spill] sm:$0xff] }
  0xc9   :  { %v3129_v23 = vpop.eup %3128  ;;  %v600_v1 = vpack.c.bf16 %v4399_v18, %v3127_v49  ;;  %3148 = vtanh.f32 %v484_v35  ;;  %v404_v42 = vadd.f32 %v340_v22, %v203_v20  ;;  %v396_v45 = vadd.f32 %v332_v63, %v195_v15  ;;  %v5673_v18 = vld [vmem:[#allocation27_spill] sm:$0xff]  ;;  %v5674_v35 = vld [vmem:[#allocation20_spill] sm:$0xff]  ;;  %v5675_v22 = vld [vmem:[#allocation30_spill] sm:$0xff] }
  0xca   :  { %v3131_v46 = vpop.eup %3130  ;;  %754 = vmatprep.subr.bf16.mxu0 %v598_v58  ;;  %v597_v19 = vpack.c.bf16 %v4408_v41, %v3129_v23  ;;  %3150 = vtanh.f32 %v473_v13  ;;  %v393_v50 = vadd.f32 %v5672_v29, %v5671_v4  ;;  %v395_v60 = vadd.f32 %v5674_v35, %v5673_v18  ;;  %v5676_v20 = vld [vmem:[#allocation21_spill] sm:$0xff] }
  0xcb   :  { %v3133_v7 = vpop.eup %3132  ;;  %867 = vmatprep.subr.bf16.mxu1 %v600_v1  ;;  %v599_v44 = vpack.c.bf16 %v4416_v12, %v3131_v46  ;;  %3152 = vtanh.f32 %v481_v14  ;;  %v403_v56 = vadd.f32 %v4304_v0, %v5675_v22  ;;  %v492_v41 = vadd.f32 %v4401_v8, %v396_v45 }
  0xcc   :  { %v3135_v53 = vpop.eup %3134  ;;  %755 = vmatpush1.bf16.msra.mxu0 %v597_v19  ;;  %3154 = vtanh.f32 %v475_v21  ;;  %v489_v13 = vadd.f32 %v4401_v8, %v393_v50  ;;  %v209_v15 = vmul.f32 %v5652_v39, %v4308_v30  ;;  %v500_v12 = vadd.f32 %v4288_v61, %v404_v42 }
  0xcd   :  { %v3137_v63 = vpop.eup %3136  ;;  %868 = vmatpush1.bf16.msra.mxu1 %v599_v44  ;;  %3156 = vtanh.f32 %v483_v25  ;;  %v497_v14 = vadd.f32 %v4288_v61, %v401_v17  ;;  %v354_v0 = vmul.f32 %v5654_v57, %v4378_v2  ;;  %v491_v21 = vadd.f32 %v4401_v8, %v395_v60 }
  0xce   :  { %v3139_v38 = vpop.eup %3138  ;;  %3158 = vtanh.f32 %v490_v51  ;;  %v346_v49 = vmul.f32 %v5654_v57, %v5676_v20  ;;  %v211_v58 = vmul.f32 %v5656_v31, %v4308_v30  ;;  %v499_v25 = vadd.f32 %v4288_v61, %v403_v56 }
  0xcf   :  { %v3141_v23 = vpop.eup %3140  ;;  %3160 = vtanh.f32 %v498_v24  ;;  %v217_v1 = vmul.f32 %v5652_v39, %v4330_v3  ;;  %v356_v42 = vmul.f32 %v4005_v48, %v4378_v2  ;;  %v348_v57 = vmul.f32 %v4005_v48, %v5676_v20  ;;  %v4531_v48 = vld [vmem:[%s5595_s1 + $0x8] ss:$12 sps:$4 sm:$0xff]  }
  0xd0   :  { %v3143_v5 = vpop.eup %3142  ;;  %v606_v51 = vpack.c.bf16 %v3141_v23, %v3133_v7  ;;  %3162 = vtanh.f32 %v492_v41  ;;  %v410_v8 = vadd.f32 %v346_v49, %v209_v15  ;;  %v219_v61 = vmul.f32 %v5656_v31, %v4330_v3  ;;  %v5677_v7 = vld [vmem:[#allocation23_spill] sm:$0xff]  ;;  %v4581_v15 = vld [vmem:[%s5594_s2] sm:$0xff] }
  0xd1   :  { %v3145_v17 = vpop.eup %3144  ;;  %v608_v46 = vpack.c.bf16 %v3143_v5, %v3135_v53  ;;  %3164 = vtanh.f32 %v500_v12  ;;  %v418_v30 = vadd.f32 %v354_v0, %v217_v1  ;;  %v412_v19 = vadd.f32 %v348_v57, %v211_v58  ;;  %v4610_v5 = vld [vmem:[%s5594_s2 + $0x20] sm:$0xff] }
  0xd2   :  { %v3147_v24 = vpop.eup %3146  ;;  %756 = vmatprep.subr.bf16.mxu0 %v606_v51  ;;  %v605_v39 = vpack.c.bf16 %v3145_v17, %v3137_v63  ;;  %3166 = vtanh.f32 %v489_v13  ;;  %v506_v2 = vadd.f32 %v4430_v10, %v410_v8  ;;  %v420_v50 = vadd.f32 %v356_v42, %v219_v61  ;;  %v4605_v42 = vld [vmem:[%s5595_s1 + $0x38] ss:$12 sps:$4 sm:$0xff]  }
  0xd3   :  { %v3149_v45 = vpop.eup %3148  ;;  %869 = vmatprep.subr.bf16.mxu1 %v608_v46  ;;  %v607_v4 = vpack.c.bf16 %v3147_v24, %v3139_v38  ;;  %3168 = vtanh.f32 %v497_v14  ;;  %v514_v29 = vadd.f32 %v4455_v9, %v418_v30  ;;  %v508_v31 = vadd.f32 %v4430_v10, %v412_v19  ;;  %v4589_v38 = vld [vmem:[%s5594_s2 + $0x10] sm:$0xff]  ;;  %v4616_v30 = vld [vmem:[%s5594_s2 + $0x28] sm:$0xff]  ;;  %v4639_v19 = vld [vmem:[%s5594_s2 + $0x38] sm:$0xff] }
  0xd4   :  { %v3151_v3 = vpop.eup %3150  ;;  %757 = vmatpush1.bf16.msra.mxu0 %v605_v39  ;;  %3170 = vtanh.f32 %v491_v21  ;;  %v409_v44 = vadd.f32 %v5677_v7, %v4338_v37  ;;  %v585_v35 = vpack.c.bf16 %v4447_v59, %v4442_v6  ;;  %v516_v60 = vadd.f32 %v4455_v9, %v420_v50  ;;  %v4624_v24 = vld [vmem:[%s5594_s2 + $0x30] sm:$0xff]  ;;  %v4662_v50 = vld [vmem:[%s5594_s2 + $0x58] sm:$0xff]  ;;  %v4680_v7 = vld [vmem:[%s5594_s2 + $0x68] sm:$0xff] }
  0xd5   :  { %v3153_v18 = vpop.eup %3152  ;;  %870 = vmatpush1.bf16.msra.mxu1 %v607_v4  ;;  %976 = vmatprep.subr.bf16.mxu0 %v586_v55  ;;  %3172 = vtanh.f32 %v499_v25  ;;  %v417_v22 = vadd.f32 %v4420_v34, %v4358_v43  ;;  %v587_v37 = vpack.c.bf16 %v4463_v62, %v4453_v52  ;;  %v411_v55 = vadd.f32 %v5678_v40, %v4342_v47  ;;  %v4599_v25 = vld [vmem:[%s5594_s2 + $0x18] sm:$0xff]  ;;  %v4649_v4 = vld [vmem:[%s5594_s2 + $0x48] sm:$0xff] }
  0xd6   :  { %v3155_v56 = vpop.eup %3154  ;;  %1089 = vmatprep.subr.bf16.mxu1 %v588_v54  ;;  %3174 = vtanh.f32 %v506_v2  ;;  %v505_v16 = vadd.f32 %v4430_v10, %v409_v44  ;;  %v3881_v6 = vmov 4   ;;  %v594_v43 = vpack.c.bf16 %v4473_v27, %v4468_v32  ;;  %v4632_v2 = vld [vmem:[%s5594_s2 + $0x40] sm:$0xff]  ;;  %v4685_v44 = vld [vmem:[%s5594_s2 + $0x70] sm:$0xff] }
  0xd7   :  { %3034 = vset.pattern.permute.xlu1 %v3881_v6  ;;  %v3157_v59 = vpop.eup %3156  ;;  %2967 = vmatmul.mubr.msk.bf16.vlgmr.msra.gmra.mrb[0].mxu0 %vm725_vm0, %v4531_v48  ;;  %3176 = vtanh.f32 %v514_v29  ;;  %v513_v36 = vadd.f32 %v4455_v9, %v417_v22  ;;  %v419_v34 = vadd.f32 %v4428_v26, %v4362_v11  ;;  %v596_v47 = vpack.c.bf16 %v3149_v45, %v4481_v28  ;;  %v3045_v45 = vld [vmem:[%s5595_s1 + $0x50] ss:$12 sps:$4 sm:$0xff]  }
  0xd8   :  { %3033 = vset.pattern.permute.xlu0 %v3881_v6  ;;  %v3159_v33 = vpop.eup %3158  ;;  %2975 = vmatmul.mubr.msk.bf16.vlgmr.msra.gmra.mrb[0].mxu1 %vm725_vm0, %v4531_v48  ;;  %3178 = vtanh.f32 %v508_v31  ;;  %v507_v52 = vadd.f32 %v4430_v10, %v411_v55  ;;  %v593_v11 = vpack.c.bf16 %v3153_v18, %v3151_v3  ;;  %v5679_v26 = vmov 0   ;;  %v4570_v10 = vld [vmem:[%s5595_s1 + $0x20] ss:$12 sps:$4 sm:$0xff]   ;;  %v4654_v29 = vld [vmem:[%s5594_s2 + $0x50] sm:$0xff]  ;;  %v4693_v18 = vld [vmem:[%s5594_s2 + $0x78] sm:$0xff] }
  0xd9   :  { %977 = vmatpush1.bf16.msra.mxu0 %v585_v35  ;;  %v3161_v62 = vpop.eup %3160  ;;  %1090 = vmatpush1.bf16.msra.mxu1 %v587_v37  ;;  %3180 = vtanh.f32 %v516_v60  ;;  %v515_v32 = vadd.f32 %v4455_v9, %v419_v34  ;;  %v595_v53 = vpack.c.bf16 %v3157_v59, %v3155_v56  ;;  %v4575_v9 = vld [vmem:[%s5594_s2 + $0x8] sm:$0xff]  ;;  %v4669_v3 = vld [vmem:[%s5594_s2 + $0x60] sm:$0xff]  ;;  %v3049_v22 = vld [vmem:[%s5595_s1 + $0xb0] ss:$12 sps:$4 sm:$0xff]  }
  0xda   :  { %978 = vmatprep.subr.bf16.mxu0 %v594_v43  ;;  %v3163_v54 = vpop.eup %3162  ;;  %1091 = vmatprep.subr.bf16.mxu1 %v596_v47  ;;  %3182 = vtanh.f32 %v505_v16  ;;  %v602_v41 = vpack.c.bf16 %v3161_v62, %v3159_v33  ;;  %v3046_v31 = vld [vmem:[%s5595_s1 + $0x68] ss:$12 sps:$4 sm:$0xff]   ;;  %v3047_v35 = vld [vmem:[%s5595_s1 + $0x80] ss:$12 sps:$4 sm:$0xff]   ;;  %v3048_v60 = vld [vmem:[%s5595_s1 + $0x98] ss:$12 sps:$4 sm:$0xff]  }
  0xdb   :  { %792 = vmatprep.mubr.bf16.mxu0 %v5679_v26  ;;  %v3165_v27 = vpop.eup %3164  ;;  %905 = vmatprep.mubr.bf16.mxu1 %v5679_v26  ;;  %3184 = vtanh.f32 %v513_v36 }
  0xdc   :  { %618 = vperm.xlu1 %3034, %v4575_v9   ;;  %v3167_v28 = vpop.eup %3166  ;;  %v604_v13 = vpack.c.bf16 %v3165_v27, %v3163_v54  ;;  %3186 = vtanh.f32 %v507_v52  ;;  %614 = vperm.xlu0 %3033, %v4581_v15  }
  0xdd   :  { %979 = vmatpush1.bf16.msra.mxu0 %v593_v11  ;;  %v3169_v63 = vpop.eup %3168  ;;  %1092 = vmatpush1.bf16.msra.mxu1 %v595_v53  ;;  %3188 = vtanh.f32 %v515_v32 }
  0xde   :  { %980 = vmatprep.subr.bf16.mxu0 %v602_v41  ;;  %v3171_v12 = vpop.eup %3170  ;;  %1093 = vmatprep.subr.bf16.mxu1 %v604_v13  ;;  %v601_v14 = vpack.c.bf16 %v3169_v63, %v3167_v28 }
  0xdf   :  { %v3173_v0 = vpop.eup %3172  ;;  %2968 = vmatmul.mubr.msk.bf16.gmra.mrb[4].mxu0 %vm725_vm0, %v4570_v10 }
  0xe0   :  { %622 = vperm.xlu1 %3034, %v4589_v38   ;;  %v3175_v21 = vpop.eup %3174  ;;  %2976 = vmatmul.mubr.msk.bf16.gmra.mrb[4].mxu1 %vm725_vm0, %v4570_v10  ;;  %v603_v20 = vpack.c.bf16 %v3173_v0, %v3171_v12 }
  0xe1   :  { %981 = vmatpush1.bf16.msra.mxu0 %v601_v14  ;;  %v3177_v49 = vpop.eup %3176  ;;  %802 = vmatprep.mubr.bf16.mxu0 %v5679_v26 }
  0xe2   :  { %915 = vmatprep.mubr.bf16.mxu1 %v5679_v26  ;;  %v3179_v58 = vpop.eup %3178  ;;  %1094 = vmatpush1.bf16.msra.mxu1 %v603_v20  ;;  %v610_v23 = vpack.c.bf16 %v3177_v49, %v3175_v21 }
  0xe3   :  { %626 = vperm.xlu0 %3033, %v4599_v25   ;;  %v3181_v1 = vpop.eup %3180 }
  0xe4   :  { %630 = vperm.xlu1 %3034, %v4610_v5   ;;  %v3183_v51 = vpop.eup %3182  ;;  %982 = vmatprep.subr.bf16.mxu0 %v610_v23  ;;  %v612_v8 = vpack.c.bf16 %v3181_v1, %v3179_v58 }
  0xe5   :  { %v3185_v57 = vpop.eup %3184 }
  0xe6   :  { %v3187_v17 = vpop.eup %3186  ;;  %1095 = vmatprep.subr.bf16.mxu1 %v612_v8  ;;  %v609_v46 = vpack.c.bf16 %v3185_v57, %v3183_v51 }
  0xe7   :  { %634 = vperm.xlu0 %3033, %v4616_v30   ;;  %v3189_v61 = vpop.eup %3188  ;;  %2969 = vmatmul.mubr.msk.bf16.gmra.mrb[8].mxu0 %vm725_vm0, %v4605_v42 }
  0xe8   :  { %638 = vperm.xlu1 %3034, %v4624_v24   ;;  %983 = vmatpush1.bf16.msra.mxu0 %v609_v46  ;;  %v611_v39 = vpack.c.bf16 %v3189_v61, %v3187_v17 }
  0xe9   :  { %2977 = vmatmul.mubr.msk.bf16.gmra.mrb[8].mxu1 %vm725_vm0, %v4605_v42  ;;  %812 = vmatprep.mubr.bf16.mxu0 %v5679_v26 }
  0xea   :  { %925 = vmatprep.mubr.bf16.mxu1 %v5679_v26  ;;  %1096 = vmatpush1.bf16.msra.mxu1 %v611_v39 }
  0xeb   :  { %642 = vperm.xlu0 %3033, %v4639_v19  }
  0xec   :  { %647 = vperm.xlu1 %3034, %v4632_v2  }
  0xef   :  { %652 = vperm.xlu0 %3033, %v4649_v4   ;;  %2970 = vmatmul.mubr.msk.bf16.gmra.mrb[12].mxu0 %vm725_vm0, %v3045_v45 }
  0xf0   :  { %657 = vperm.xlu1 %3034, %v4654_v29   ;;  %822 = vmatprep.mubr.bf16.mxu0 %v5679_v26 }
  0xf1   :  { %2978 = vmatmul.mubr.msk.bf16.gmra.mrb[12].mxu1 %vm725_vm0, %v3045_v45 }
  0xf2   :  { %935 = vmatprep.mubr.bf16.mxu1 %v5679_v26 }
  0xf3   :  { %662 = vperm.xlu0 %3033, %v4662_v50  }
  0xf4   :  { %667 = vperm.xlu1 %3034, %v4669_v3  }
  0xf7   :  { %672 = vperm.xlu0 %3033, %v4680_v7   ;;  %2971 = vmatmul.mubr.msk.bf16.gmra.mrb[16].mxu0 %vm725_vm0, %v3046_v31 }
  0xf8   :  { %677 = vperm.xlu1 %3034, %v4685_v44   ;;  %832 = vmatprep.mubr.bf16.mxu0 %v5679_v26 }
  0xf9   :  { %2979 = vmatmul.mubr.msk.bf16.gmra.mrb[16].mxu1 %vm725_vm0, %v3046_v31 }
  0xfa   :  { %945 = vmatprep.mubr.bf16.mxu1 %v5679_v26 }
  0xfb   :  { %682 = vperm.xlu0 %3033, %v4693_v18  }
  0xff   :  { %2972 = vmatmul.mubr.msk.bf16.gmra.mrb[20].mxu0 %vm725_vm0, %v3047_v35 }
 0x100   :  { %842 = vmatprep.mubr.bf16.mxu0 %v5679_v26 }
 0x101   :  { %2980 = vmatmul.mubr.msk.bf16.gmra.mrb[20].mxu1 %vm725_vm0, %v3047_v35 }
 0x102   :  { %955 = vmatprep.mubr.bf16.mxu1 %v5679_v26 }
 0x107   :  { %2973 = vmatmul.mubr.msk.bf16.gmra.mrb[24].mxu0 %vm725_vm0, %v3048_v60 }
 0x108   :  { %852 = vmatprep.mubr.bf16.mxu0 %v5679_v26 }
 0x109   :  { %2981 = vmatmul.mubr.msk.bf16.gmra.mrb[24].mxu1 %vm725_vm0, %v3048_v60 }
 0x10a   :  { %965 = vmatprep.mubr.bf16.mxu1 %v5679_v26 }
 0x10f   :  { %2974 = vmatmul.mubr.msk.bf16.gmra.mrb[28].mxu0 %vm725_vm0, %v3049_v22 }
 0x110   :  { %1008 = vmatprep.mubr.bf16.mxu0 %v5679_v26 }
 0x111   :  { %2982 = vmatmul.mubr.msk.bf16.gmra.mrb[28].mxu1 %vm725_vm0, %v3049_v22 }
 0x112   :  { %1121 = vmatprep.mubr.bf16.mxu1 %v5679_v26 }
 0x117   :  { %2983 = vmatmul.mubr.msk.bf16.vlgmr.msra.gmra.mrb[32].mxu0 %vm725_vm0, %v4531_v48 }
 0x118   :  { %1018 = vmatprep.mubr.bf16.mxu0 %v5679_v26 }
 0x119   :  { %2991 = vmatmul.mubr.msk.bf16.vlgmr.msra.gmra.mrb[32].mxu1 %vm725_vm0, %v4531_v48 }
 0x11a   :  { %1131 = vmatprep.mubr.bf16.mxu1 %v5679_v26 }
 0x11f   :  { %2984 = vmatmul.mubr.msk.bf16.gmra.mrb[36].mxu0 %vm725_vm0, %v4570_v10 }
 0x120   :  { %1028 = vmatprep.mubr.bf16.mxu0 %v5679_v26 }
 0x121   :  { %2992 = vmatmul.mubr.msk.bf16.gmra.mrb[36].mxu1 %vm725_vm0, %v4570_v10 }
 0x122   :  { %1141 = vmatprep.mubr.bf16.mxu1 %v5679_v26 }
 0x127   :  { %2985 = vmatmul.mubr.msk.bf16.gmra.mrb[40].mxu0 %vm725_vm0, %v4605_v42 }
 0x128   :  { %1038 = vmatprep.mubr.bf16.mxu0 %v5679_v26 }
 0x129   :  { %2993 = vmatmul.mubr.msk.bf16.gmra.mrb[40].mxu1 %vm725_vm0, %v4605_v42 }
 0x12a   :  { %1151 = vmatprep.mubr.bf16.mxu1 %v5679_v26 }
 0x12f   :  { %2986 = vmatmul.mubr.msk.bf16.gmra.mrb[44].mxu0 %vm725_vm0, %v3045_v45 }
 0x130   :  { %1048 = vmatprep.mubr.bf16.mxu0 %v5679_v26 }
 0x131   :  { %2994 = vmatmul.mubr.msk.bf16.gmra.mrb[44].mxu1 %vm725_vm0, %v3045_v45 }
 0x132   :  { %1161 = vmatprep.mubr.bf16.mxu1 %v5679_v26 }
 0x137   :  { %2987 = vmatmul.mubr.msk.bf16.gmra.mrb[48].mxu0 %vm725_vm0, %v3046_v31 }
 0x138   :  { %1058 = vmatprep.mubr.bf16.mxu0 %v5679_v26 }
 0x139   :  { %2995 = vmatmul.mubr.msk.bf16.gmra.mrb[48].mxu1 %vm725_vm0, %v3046_v31 }
 0x13a   :  { %1171 = vmatprep.mubr.bf16.mxu1 %v5679_v26 }
 0x13f   :  { %2988 = vmatmul.mubr.msk.bf16.gmra.mrb[52].mxu0 %vm725_vm0, %v3047_v35 }
 0x140   :  { %1068 = vmatprep.mubr.bf16.mxu0 %v5679_v26 }
 0x141   :  { %2996 = vmatmul.mubr.msk.bf16.gmra.mrb[52].mxu1 %vm725_vm0, %v3047_v35 }
 0x142   :  { %1181 = vmatprep.mubr.bf16.mxu1 %v5679_v26 }
 0x147   :  { %2989 = vmatmul.mubr.msk.bf16.gmra.mrb[56].mxu0 %vm725_vm0, %v3048_v60 }
 0x148   :  { %1078 = vmatprep.mubr.bf16.mxu0 %v5679_v26 }
 0x149   :  { %2997 = vmatmul.mubr.msk.bf16.gmra.mrb[56].mxu1 %vm725_vm0, %v3048_v60 }
 0x14a   :  { %1191 = vmatprep.mubr.bf16.mxu1 %v5679_v26 }
 0x14f   :  { %2990 = vmatmul.mubr.msk.bf16.gmra.mrb[60].mxu0 %vm725_vm0, %v3049_v22 }
 0x150   :  { %1538 = vmatprep.mubr.bf16.mxu0 %v5679_v26 }
 0x151   :  { %2998 = vmatmul.mubr.msk.bf16.gmra.mrb[60].mxu1 %vm725_vm0, %v3049_v22 }
 0x152   :  { %1651 = vmatprep.mubr.bf16.mxu1 %v5679_v26 }
 0x15b   :  { %v4758_v48 = vpop.permute.xlu0 %614  ;;  %v4760_v56 = vpop.permute.xlu1 %618 }
 0x15f   :  { %v4769_v11 = vpop.permute.xlu1 %622 }
 0x162   :  { %v4772_v53 = vpop.permute.xlu0 %626 }
 0x163   :  { %v4782_v46 = vpop.permute.xlu1 %630 }
 0x166   :  { %v4784_v39 = vpop.permute.xlu0 %634 }
 0x1aa   :  { %v784_v37 = vpop.f32.mrb[0].mxu0 }
 0x1ab   :  { %v785_v16 = vadd.f32 %v784_v37, %v4758_v48  ;;  %v897_v40 = vpop.f32.mrb[0].mxu1  ;;  %v786_v55 = vpop.f32.mrb[1].mxu0 }
 0x1ac   :  { %v898_v6 = vadd.f32 %v897_v40, %v4758_v48  ;;  %v787_v59 = vadd.f32 %v786_v55, %v4758_v48  ;;  %v899_v43 = vpop.f32.mrb[1].mxu1  ;;  %v788_v36 = vpop.f32.mrb[2].mxu0 }
 0x1ad   :  { %3190 = vtanh.f32 %v785_v16  ;;  %v900_v34 = vadd.f32 %v899_v43, %v4758_v48  ;;  %v789_v33 = vadd.f32 %v788_v36, %v4760_v56  ;;  %v901_v47 = vpop.f32.mrb[2].mxu1  ;;  %v790_v52 = vpop.f32.mrb[3].mxu0 }
 0x1ae   :  { %3192 = vtanh.f32 %v898_v6  ;;  %v902_v62 = vadd.f32 %v901_v47, %v4760_v56  ;;  %v903_v32 = vpop.f32.mrb[3].mxu1  ;;  %v791_v54 = vadd.f32 %v790_v52, %v4760_v56 }
 0x1af   :  { %3194 = vtanh.f32 %v787_v59  ;;  %v904_v27 = vadd.f32 %v903_v32, %v4760_v56 }
 0x1b0   :  { %3196 = vtanh.f32 %v900_v34 }
 0x1b1   :  { %3198 = vtanh.f32 %v789_v33 }
 0x1b2   :  { %3200 = vtanh.f32 %v902_v62  ;;  %v794_v41 = vpop.f32.mrb[4].mxu0 }
 0x1b3   :  { %3202 = vtanh.f32 %v791_v54  ;;  %v795_v10 = vadd.f32 %v794_v41, %v4769_v11  ;;  %v907_v28 = vpop.f32.mrb[4].mxu1  ;;  %v796_v13 = vpop.f32.mrb[5].mxu0 }
 0x1b4   :  { %3204 = vtanh.f32 %v904_v27  ;;  %v908_v63 = vadd.f32 %v907_v28, %v4769_v11  ;;  %v797_v12 = vadd.f32 %v796_v13, %v4769_v11  ;;  %v909_v14 = vpop.f32.mrb[5].mxu1  ;;  %v798_v0 = vpop.f32.mrb[6].mxu0 }
 0x1b5   :  { %3206 = vtanh.f32 %v795_v10  ;;  %v910_v21 = vadd.f32 %v909_v14, %v4769_v11  ;;  %v799_v20 = vadd.f32 %v798_v0, %v4772_v53  ;;  %v911_v49 = vpop.f32.mrb[6].mxu1  ;;  %v800_v58 = vpop.f32.mrb[7].mxu0 }
 0x1b6   :  { %3208 = vtanh.f32 %v908_v63  ;;  %v912_v23 = vadd.f32 %v911_v49, %v4772_v53  ;;  %v913_v1 = vpop.f32.mrb[7].mxu1  ;;  %v801_v51 = vadd.f32 %v800_v58, %v4772_v53  ;;  %v4794_v14 = vpop.permute.xlu1 %638 }
 0x1b7   :  { %v3191_v42 = vpop.eup %3190  ;;  %3210 = vtanh.f32 %v797_v12  ;;  %v914_v57 = vadd.f32 %v913_v1, %v4772_v53 }
 0x1b8   :  { %v3193_v8 = vpop.eup %3192  ;;  %3212 = vtanh.f32 %v910_v21  ;;  %v4796_v21 = vpop.permute.xlu0 %642 }
 0x1b9   :  { %v3195_v17 = vpop.eup %3194  ;;  %3214 = vtanh.f32 %v799_v20 }
 0x1ba   :  { %v3197_v61 = vpop.eup %3196  ;;  %3216 = vtanh.f32 %v912_v23  ;;  %v804_v45 = vpop.f32.mrb[8].mxu0 }
 0x1bb   :  { %v3199_v31 = vpop.eup %3198  ;;  %3218 = vtanh.f32 %v801_v51  ;;  %v805_v35 = vadd.f32 %v804_v45, %v4782_v46  ;;  %v806_v22 = vpop.f32.mrb[9].mxu0 }
 0x1bc   :  { %v917_v60 = vpop.f32.mrb[8].mxu1  ;;  %v3201_v37 = vpop.eup %3200  ;;  %3220 = vtanh.f32 %v914_v57  ;;  %v807_v40 = vadd.f32 %v806_v22, %v4782_v46  ;;  %v1330_v59 = vpack.c.bf16 %v3199_v31, %v3191_v42 }
 0x1bd   :  { %v918_v16 = vadd.f32 %v917_v60, %v4782_v46  ;;  %v919_v55 = vpop.f32.mrb[9].mxu1  ;;  %v808_v6 = vpop.f32.mrb[10].mxu0  ;;  %3222 = vtanh.f32 %v805_v35  ;;  %v1332_v52 = vpack.c.bf16 %v3201_v37, %v3193_v8 }
 0x1be   :  { %v3203_v43 = vpop.eup %3202  ;;  %v920_v36 = vadd.f32 %v919_v55, %v4782_v46  ;;  %v809_v34 = vadd.f32 %v808_v6, %v4784_v39  ;;  %v921_v33 = vpop.f32.mrb[10].mxu1 }
 0x1bf   :  { %v810_v47 = vpop.f32.mrb[11].mxu0  ;;  %v3205_v62 = vpop.eup %3204  ;;  %3224 = vtanh.f32 %v918_v16  ;;  %v922_v32 = vadd.f32 %v921_v33, %v4784_v39  ;;  %v1331_v27 = vpack.c.bf16 %v3203_v43, %v3195_v17 }
 0x1c0   :  { %v923_v54 = vpop.f32.mrb[11].mxu1  ;;  %v3207_v41 = vpop.eup %3206  ;;  %3226 = vtanh.f32 %v807_v40  ;;  %v811_v10 = vadd.f32 %v810_v47, %v4784_v39  ;;  %v1333_v28 = vpack.c.bf16 %v3205_v62, %v3197_v61 }
 0x1c1   :  { %v3209_v13 = vpop.eup %3208  ;;  %3228 = vtanh.f32 %v920_v36  ;;  %v924_v63 = vadd.f32 %v923_v54, %v4784_v39  ;;  %1506 = vmatprep.subr.bf16.mxu0 %v1331_v27 }
 0x1c2   :  { %v3211_v12 = vpop.eup %3210  ;;  %3230 = vtanh.f32 %v809_v34  ;;  %1619 = vmatprep.subr.bf16.mxu1 %v1333_v28  ;;  %1507 = vmatpush1.bf16.msra.mxu0 %v1330_v59  ;;  %v814_v20 = vpop.f32.mrb[12].mxu0 }
 0x1c3   :  { %v3213_v0 = vpop.eup %3212  ;;  %3232 = vtanh.f32 %v922_v32  ;;  %1620 = vmatpush1.bf16.msra.mxu1 %v1332_v52  ;;  %v815_v58 = vadd.f32 %v814_v20, %v4794_v14  ;;  %v816_v1 = vpop.f32.mrb[13].mxu0 }
 0x1c4   :  { %v3215_v49 = vpop.eup %3214  ;;  %3234 = vtanh.f32 %v811_v10  ;;  %v927_v23 = vpop.f32.mrb[12].mxu1  ;;  %v817_v8 = vadd.f32 %v816_v1, %v4794_v14 }
 0x1c5   :  { %v3217_v42 = vpop.eup %3216  ;;  %3236 = vtanh.f32 %v924_v63  ;;  %v928_v51 = vadd.f32 %v927_v23, %v4794_v14  ;;  %v929_v57 = vpop.f32.mrb[13].mxu1  ;;  %v1338_v61 = vpack.c.bf16 %v3215_v49, %v3207_v41 }
 0x1c6   :  { %v818_v17 = vpop.f32.mrb[14].mxu0  ;;  %v3219_v45 = vpop.eup %3218  ;;  %3238 = vtanh.f32 %v815_v58  ;;  %v930_v31 = vadd.f32 %v929_v57, %v4794_v14  ;;  %v1340_v37 = vpack.c.bf16 %v3217_v42, %v3209_v13 }
 0x1c7   :  { %v819_v35 = vadd.f32 %v818_v17, %v4796_v21  ;;  %v931_v60 = vpop.f32.mrb[14].mxu1  ;;  %v820_v22 = vpop.f32.mrb[15].mxu0  ;;  %3240 = vtanh.f32 %v928_v51  ;;  %v1339_v6 = vpack.c.bf16 %v3219_v45, %v3211_v12 }
 0x1c8   :  { %v3221_v16 = vpop.eup %3220  ;;  %v932_v40 = vadd.f32 %v931_v60, %v4796_v21  ;;  %v933_v55 = vpop.f32.mrb[15].mxu1  ;;  %3242 = vtanh.f32 %v817_v8  ;;  %v821_v43 = vadd.f32 %v820_v22, %v4796_v21 }
 0x1c9   :  { %v3223_v59 = vpop.eup %3222  ;;  %v1341_v36 = vpack.c.bf16 %v3221_v16, %v3213_v0  ;;  %3244 = vtanh.f32 %v930_v31  ;;  %v934_v33 = vadd.f32 %v933_v55, %v4796_v21  ;;  %1508 = vmatprep.subr.bf16.mxu0 %v1339_v6  ;;  %v4806_v52 = vpop.permute.xlu1 %647  ;;  %v3882_v16 = vmov 5  }
 0x1ca   :  { %v3225_v34 = vpop.eup %3224  ;;  %3246 = vtanh.f32 %v819_v35  ;;  %1509 = vmatpush1.bf16.msra.mxu0 %v1338_v61  ;;  %v4808_v32 = vpop.permute.xlu0 %652  ;;  %3035 = vset.pattern.permute.xlu1 %v3882_v16 }
 0x1cb   :  { %v3227_v47 = vpop.eup %3226  ;;  %1621 = vmatprep.subr.bf16.mxu1 %v1341_v36  ;;  %3248 = vtanh.f32 %v932_v40  ;;  %v824_v54 = vpop.f32.mrb[16].mxu0  ;;  %3036 = vset.pattern.permute.xlu0 %v3882_v16 }
 0x1cc   :  { %v3229_v62 = vpop.eup %3228  ;;  %1622 = vmatpush1.bf16.msra.mxu1 %v1340_v37  ;;  %3250 = vtanh.f32 %v821_v43  ;;  %v825_v41 = vadd.f32 %v824_v54, %v4806_v52  ;;  %v937_v10 = vpop.f32.mrb[16].mxu1  ;;  %1395 = vperm.xlu1 %3035, %v4581_v15  }
 0x1cd   :  { %v3231_v27 = vpop.eup %3230  ;;  %v826_v28 = vpop.f32.mrb[17].mxu0  ;;  %3252 = vtanh.f32 %v934_v33  ;;  %v938_v63 = vadd.f32 %v937_v10, %v4806_v52  ;;  %1399 = vperm.xlu0 %3036, %v4575_v9  }
 0x1ce   :  { %v3233_v13 = vpop.eup %3232  ;;  %v827_v12 = vadd.f32 %v826_v28, %v4806_v52  ;;  %v939_v0 = vpop.f32.mrb[17].mxu1  ;;  %v1346_v49 = vpack.c.bf16 %v3231_v27, %v3223_v59  ;;  %3254 = vtanh.f32 %v825_v41 }
 0x1cf   :  { %v828_v20 = vpop.f32.mrb[18].mxu0  ;;  %v3235_v58 = vpop.eup %3234  ;;  %v940_v23 = vadd.f32 %v939_v0, %v4806_v52  ;;  %v1348_v8 = vpack.c.bf16 %v3233_v13, %v3225_v34  ;;  %3256 = vtanh.f32 %v938_v63 }
 0x1d0   :  { %v829_v1 = vadd.f32 %v828_v20, %v4808_v32  ;;  %v941_v42 = vpop.f32.mrb[18].mxu1  ;;  %v830_v51 = vpop.f32.mrb[19].mxu0  ;;  %v1347_v45 = vpack.c.bf16 %v3235_v58, %v3227_v47  ;;  %3258 = vtanh.f32 %v827_v12  ;;  %1403 = vperm.xlu1 %3035, %v4589_v38  }
 0x1d1   :  { %v3237_v57 = vpop.eup %3236  ;;  %v942_v17 = vadd.f32 %v941_v42, %v4808_v32  ;;  %v943_v61 = vpop.f32.mrb[19].mxu1  ;;  %v831_v35 = vadd.f32 %v830_v51, %v4808_v32  ;;  %3260 = vtanh.f32 %v940_v23  ;;  %1411 = vperm.xlu0 %3036, %v4610_v5  }
 0x1d2   :  { %v3239_v31 = vpop.eup %3238  ;;  %v1349_v60 = vpack.c.bf16 %v3237_v57, %v3229_v62  ;;  %v944_v37 = vadd.f32 %v943_v61, %v4808_v32  ;;  %1510 = vmatprep.subr.bf16.mxu0 %v1347_v45  ;;  %v4818_v55 = vpop.permute.xlu1 %657  ;;  %3262 = vtanh.f32 %v829_v1 }
 0x1d3   :  { %v3241_v22 = vpop.eup %3240  ;;  %1511 = vmatpush1.bf16.msra.mxu0 %v1346_v49  ;;  %v4820_v59 = vpop.permute.xlu0 %662  ;;  %3264 = vtanh.f32 %v942_v17 }
 0x1d4   :  { %v3243_v40 = vpop.eup %3242  ;;  %1623 = vmatprep.subr.bf16.mxu1 %v1349_v60  ;;  %v834_v43 = vpop.f32.mrb[20].mxu0  ;;  %3266 = vtanh.f32 %v831_v35  ;;  %1407 = vperm.xlu1 %3035, %v4599_v25  }
 0x1d5   :  { %v3245_v6 = vpop.eup %3244  ;;  %1624 = vmatpush1.bf16.msra.mxu1 %v1348_v8  ;;  %v835_v34 = vadd.f32 %v834_v43, %v4818_v55  ;;  %v947_v33 = vpop.f32.mrb[20].mxu1  ;;  %3268 = vtanh.f32 %v944_v37  ;;  %1419 = vperm.xlu0 %3036, %v4624_v24  }
 0x1d6   :  { %v3247_v36 = vpop.eup %3246  ;;  %v836_v47 = vpop.f32.mrb[21].mxu0  ;;  %v948_v54 = vadd.f32 %v947_v33, %v4818_v55 }
 0x1d7   :  { %v3249_v62 = vpop.eup %3248  ;;  %v837_v27 = vadd.f32 %v836_v47, %v4818_v55  ;;  %v949_v41 = vpop.f32.mrb[21].mxu1  ;;  %v1354_v28 = vpack.c.bf16 %v3247_v36, %v3239_v31  ;;  %3270 = vtanh.f32 %v835_v34 }
 0x1d8   :  { %v838_v10 = vpop.f32.mrb[22].mxu0  ;;  %v3251_v13 = vpop.eup %3250  ;;  %v950_v63 = vadd.f32 %v949_v41, %v4818_v55  ;;  %v1356_v15 = vpack.c.bf16 %v3249_v62, %v3241_v22  ;;  %3272 = vtanh.f32 %v948_v54  ;;  %1415 = vperm.xlu1 %3035, %v4616_v30  }
 0x1d9   :  { %v839_v12 = vadd.f32 %v838_v10, %v4820_v59  ;;  %v951_v0 = vpop.f32.mrb[22].mxu1  ;;  %v840_v20 = vpop.f32.mrb[23].mxu0  ;;  %v1355_v23 = vpack.c.bf16 %v3251_v13, %v3243_v40  ;;  %3274 = vtanh.f32 %v837_v27  ;;  %1427 = vperm.xlu0 %3036, %v4632_v2  }
 0x1da   :  { %v3253_v49 = vpop.eup %3252  ;;  %v952_v9 = vadd.f32 %v951_v0, %v4820_v59  ;;  %v953_v58 = vpop.f32.mrb[23].mxu1  ;;  %v841_v42 = vadd.f32 %v840_v20, %v4820_v59  ;;  %3276 = vtanh.f32 %v950_v63 }
 0x1db   :  { %v3255_v1 = vpop.eup %3254  ;;  %v1357_v51 = vpack.c.bf16 %v3253_v49, %v3245_v6  ;;  %v954_v57 = vadd.f32 %v953_v58, %v4820_v59  ;;  %1512 = vmatprep.subr.bf16.mxu0 %v1355_v23  ;;  %v4834_v61 = vpop.permute.xlu1 %667  ;;  %3278 = vtanh.f32 %v839_v12 }
 0x1dc   :  { %v3257_v8 = vpop.eup %3256  ;;  %1513 = vmatpush1.bf16.msra.mxu0 %v1354_v28  ;;  %v4836_v31 = vpop.permute.xlu0 %672  ;;  %3280 = vtanh.f32 %v952_v9  ;;  %1423 = vperm.xlu1 %3035, %v4639_v19  }
 0x1dd   :  { %v3259_v17 = vpop.eup %3258  ;;  %1625 = vmatprep.subr.bf16.mxu1 %v1357_v51  ;;  %v844_v35 = vpop.f32.mrb[24].mxu0  ;;  %3282 = vtanh.f32 %v841_v42  ;;  %1435 = vperm.xlu0 %3036, %v4654_v29  }
 0x1de   :  { %v3261_v45 = vpop.eup %3260  ;;  %1626 = vmatpush1.bf16.msra.mxu1 %v1356_v15  ;;  %v845_v5 = vadd.f32 %v844_v35, %v4834_v61  ;;  %v957_v60 = vpop.f32.mrb[24].mxu1  ;;  %3284 = vtanh.f32 %v954_v57 }
 0x1df   :  { %v3263_v38 = vpop.eup %3262  ;;  %v846_v22 = vpop.f32.mrb[25].mxu0  ;;  %v958_v16 = vadd.f32 %v957_v60, %v4834_v61 }
 0x1e0   :  { %v3265_v37 = vpop.eup %3264  ;;  %v847_v40 = vadd.f32 %v846_v22, %v4834_v61  ;;  %v959_v6 = vpop.f32.mrb[25].mxu1  ;;  %v1362_v36 = vpack.c.bf16 %v3263_v38, %v3255_v1  ;;  %3286 = vtanh.f32 %v845_v5  ;;  %1431 = vperm.xlu1 %3035, %v4649_v4  }
 0x1e1   :  { %v848_v43 = vpop.f32.mrb[26].mxu0  ;;  %v3267_v34 = vpop.eup %3266  ;;  %v960_v33 = vadd.f32 %v959_v6, %v4834_v61  ;;  %v1364_v25 = vpack.c.bf16 %v3265_v37, %v3257_v8  ;;  %3288 = vtanh.f32 %v958_v16  ;;  %1443 = vperm.xlu0 %3036, %v4669_v3  }
 0x1e2   :  { %v849_v47 = vadd.f32 %v848_v43, %v4836_v31  ;;  %v961_v62 = vpop.f32.mrb[26].mxu1  ;;  %v850_v54 = vpop.f32.mrb[27].mxu0  ;;  %v1363_v10 = vpack.c.bf16 %v3267_v34, %v3259_v17  ;;  %3290 = vtanh.f32 %v847_v40 }
 0x1e3   :  { %v3269_v27 = vpop.eup %3268  ;;  %v962_v24 = vadd.f32 %v961_v62, %v4836_v31  ;;  %v963_v41 = vpop.f32.mrb[27].mxu1  ;;  %v851_v13 = vadd.f32 %v850_v54, %v4836_v31  ;;  %3292 = vtanh.f32 %v960_v33 }
 0x1e4   :  { %v3271_v28 = vpop.eup %3270  ;;  %v1365_v63 = vpack.c.bf16 %v3269_v27, %v3261_v45  ;;  %v964_v0 = vadd.f32 %v963_v41, %v4836_v31  ;;  %1514 = vmatprep.subr.bf16.mxu0 %v1363_v10  ;;  %v4850_v15 = vpop.permute.xlu1 %677  ;;  %3294 = vtanh.f32 %v849_v47  ;;  %1439 = vperm.xlu1 %3035, %v4662_v50  }
 0x1e5   :  { %v3273_v12 = vpop.eup %3272  ;;  %1515 = vmatpush1.bf16.msra.mxu0 %v1362_v36  ;;  %v4852_v9 = vpop.permute.xlu0 %682  ;;  %3296 = vtanh.f32 %v962_v24  ;;  %1451 = vperm.xlu0 %3036, %v4685_v44  }
 0x1e6   :  { %v3275_v20 = vpop.eup %3274  ;;  %1627 = vmatprep.subr.bf16.mxu1 %v1365_v63  ;;  %v854_v58 = vpop.f32.mrb[28].mxu0  ;;  %3298 = vtanh.f32 %v851_v13 }
 0x1e7   :  { %v3277_v49 = vpop.eup %3276  ;;  %1628 = vmatpush1.bf16.msra.mxu1 %v1364_v25  ;;  %v855_v2 = vadd.f32 %v854_v58, %v4850_v15  ;;  %v967_v23 = vpop.f32.mrb[28].mxu1  ;;  %3300 = vtanh.f32 %v964_v0 }
 0x1e8   :  { %v3279_v30 = vpop.eup %3278  ;;  %v856_v1 = vpop.f32.mrb[29].mxu0  ;;  %v968_v51 = vadd.f32 %v967_v23, %v4850_v15  ;;  %1447 = vperm.xlu1 %3035, %v4680_v7  }
 0x1e9   :  { %v3281_v42 = vpop.eup %3280  ;;  %v857_v8 = vadd.f32 %v856_v1, %v4850_v15  ;;  %v969_v57 = vpop.f32.mrb[29].mxu1  ;;  %v1370_v45 = vpack.c.bf16 %v3279_v30, %v3271_v28  ;;  %3302 = vtanh.f32 %v855_v2 }
 0x1ea   :  { %v858_v17 = vpop.f32.mrb[30].mxu0  ;;  %v3283_v35 = vpop.eup %3282  ;;  %v970_v38 = vadd.f32 %v969_v57, %v4850_v15  ;;  %v1372_v19 = vpack.c.bf16 %v3281_v42, %v3273_v12  ;;  %3304 = vtanh.f32 %v968_v51 }
 0x1eb   :  { %v859_v5 = vadd.f32 %v858_v17, %v4852_v9  ;;  %v971_v60 = vpop.f32.mrb[30].mxu1  ;;  %v860_v22 = vpop.f32.mrb[31].mxu0  ;;  %v1371_v40 = vpack.c.bf16 %v3283_v35, %v3275_v20  ;;  %3306 = vtanh.f32 %v857_v8 }
 0x1ec   :  { %v3285_v37 = vpop.eup %3284  ;;  %v972_v29 = vadd.f32 %v971_v60, %v4852_v9  ;;  %v973_v16 = vpop.f32.mrb[31].mxu1  ;;  %v861_v43 = vadd.f32 %v860_v22, %v4852_v9  ;;  %3308 = vtanh.f32 %v970_v38  ;;  %1455 = vperm.xlu1 %3035, %v4693_v18  }
 0x1ed   :  { %v3287_v6 = vpop.eup %3286  ;;  %v1373_v36 = vpack.c.bf16 %v3285_v37, %v3277_v49  ;;  %v974_v33 = vadd.f32 %v973_v16, %v4852_v9  ;;  %1516 = vmatprep.subr.bf16.mxu0 %v1371_v40  ;;  %3310 = vtanh.f32 %v859_v5  ;;  %v1010_v54 = vpop.f32.mrb[32].mxu0 }
 0x1ee   :  { %v3289_v34 = vpop.eup %3288  ;;  %1517 = vmatpush1.bf16.msra.mxu0 %v1370_v45  ;;  %3312 = vtanh.f32 %v972_v29  ;;  %v1011_v27 = vadd.f32 %v1010_v54, %v4758_v48  ;;  %v1123_v4 = vpop.f32.mrb[32].mxu1 }
 0x1ef   :  { %v3291_v47 = vpop.eup %3290  ;;  %1629 = vmatprep.subr.bf16.mxu1 %v1373_v36  ;;  %3314 = vtanh.f32 %v861_v43  ;;  %v1012_v24 = vpop.f32.mrb[33].mxu0  ;;  %v1124_v41 = vadd.f32 %v1123_v4, %v4758_v48 }
 0x1f0   :  { %v3293_v62 = vpop.eup %3292  ;;  %1630 = vmatpush1.bf16.msra.mxu1 %v1372_v19  ;;  %3316 = vtanh.f32 %v974_v33  ;;  %v1013_v10 = vadd.f32 %v1012_v24, %v4758_v48  ;;  %v1125_v28 = vpop.f32.mrb[33].mxu1  ;;  %v4889_v24 = vld [vmem:[%s5595_s1] ss:$12 sps:$4 sm:$0xff]  }
 0x1f1   :  { %v3295_v25 = vpop.eup %3294  ;;  %v1014_v13 = vpop.f32.mrb[34].mxu0  ;;  %3318 = vtanh.f32 %v1011_v27  ;;  %v1126_v0 = vadd.f32 %v1125_v28, %v4758_v48 }
 0x1f2   :  { %v3297_v3 = vpop.eup %3296  ;;  %v1378_v63 = vpack.c.bf16 %v3295_v25, %v3287_v6  ;;  %v1015_v20 = vadd.f32 %v1014_v13, %v4760_v56  ;;  %v1127_v49 = vpop.f32.mrb[34].mxu1  ;;  %3320 = vtanh.f32 %v1124_v41 }
 0x1f3   :  { %v3299_v12 = vpop.eup %3298  ;;  %v1016_v58 = vpop.f32.mrb[35].mxu0  ;;  %v1380_v50 = vpack.c.bf16 %v3297_v3, %v3289_v34  ;;  %v1128_v44 = vadd.f32 %v1127_v49, %v4760_v56  ;;  %3322 = vtanh.f32 %v1013_v10 }
 0x1f4   :  { %v3301_v30 = vpop.eup %3300  ;;  %v1129_v2 = vpop.f32.mrb[35].mxu1  ;;  %v1379_v23 = vpack.c.bf16 %v3299_v12, %v3291_v47  ;;  %v1017_v42 = vadd.f32 %v1016_v58, %v4760_v56  ;;  %3324 = vtanh.f32 %v1126_v0 }
 0x1f5   :  { %v3303_v1 = vpop.eup %3302  ;;  %v1381_v51 = vpack.c.bf16 %v3301_v30, %v3293_v62  ;;  %v1130_v48 = vadd.f32 %v1129_v2, %v4760_v56  ;;  %3326 = vtanh.f32 %v1015_v20  ;;  %v1020_v45 = vpop.f32.mrb[36].mxu0 }
 0x1f6   :  { %v3305_v8 = vpop.eup %3304  ;;  %1518 = vmatprep.subr.bf16.mxu0 %v1379_v23  ;;  %3328 = vtanh.f32 %v1128_v44  ;;  %v1021_v38 = vadd.f32 %v1020_v45, %v4769_v11  ;;  %v1133_v5 = vpop.f32.mrb[36].mxu1 }
 0x1f7   :  { %v3307_v57 = vpop.eup %3306  ;;  %1631 = vmatprep.subr.bf16.mxu1 %v1381_v51  ;;  %1519 = vmatpush1.bf16.msra.mxu0 %v1378_v63  ;;  %3330 = vtanh.f32 %v1017_v42  ;;  %v1022_v60 = vpop.f32.mrb[37].mxu0  ;;  %v1134_v56 = vadd.f32 %v1133_v5, %v4769_v11  ;;  %v4906_v5 = vld [vmem:[%s5595_s1 + $0x18] ss:$12 sps:$4 sm:$0xff]  }
 0x1f8   :  { %v3309_v17 = vpop.eup %3308  ;;  %1632 = vmatpush1.bf16.msra.mxu1 %v1380_v50  ;;  %3332 = vtanh.f32 %v1130_v48  ;;  %v1023_v22 = vadd.f32 %v1022_v60, %v4769_v11  ;;  %v1135_v19 = vpop.f32.mrb[37].mxu1 }
 0x1f9   :  { %v3311_v35 = vpop.eup %3310  ;;  %v1024_v37 = vpop.f32.mrb[38].mxu0  ;;  %3334 = vtanh.f32 %v1021_v38  ;;  %v1136_v40 = vadd.f32 %v1135_v19, %v4769_v11 }
 0x1fa   :  { %v3313_v7 = vpop.eup %3312  ;;  %v1386_v29 = vpack.c.bf16 %v3311_v35, %v3303_v1  ;;  %v1025_v6 = vadd.f32 %v1024_v37, %v4772_v53  ;;  %v1137_v43 = vpop.f32.mrb[38].mxu1  ;;  %3336 = vtanh.f32 %v1134_v56 }
 0x1fb   :  { %v3315_v16 = vpop.eup %3314  ;;  %v1026_v36 = vpop.f32.mrb[39].mxu0  ;;  %v1388_v34 = vpack.c.bf16 %v3313_v7, %v3305_v8  ;;  %v1138_v18 = vadd.f32 %v1137_v43, %v4772_v53  ;;  %3338 = vtanh.f32 %v1023_v22 }
 0x1fc   :  { %v3317_v33 = vpop.eup %3316  ;;  %v1139_v47 = vpop.f32.mrb[39].mxu1  ;;  %v1387_v62 = vpack.c.bf16 %v3315_v16, %v3307_v57  ;;  %v1027_v25 = vadd.f32 %v1026_v36, %v4772_v53  ;;  %3340 = vtanh.f32 %v1136_v40 }
 0x1fd   :  { %v3319_v54 = vpop.eup %3318  ;;  %v1389_v27 = vpack.c.bf16 %v3317_v33, %v3309_v17  ;;  %v1140_v11 = vadd.f32 %v1139_v47, %v4772_v53  ;;  %3342 = vtanh.f32 %v1025_v6  ;;  %v1030_v10 = vpop.f32.mrb[40].mxu0 }
 0x1fe   :  { %v3321_v4 = vpop.eup %3320  ;;  %1520 = vmatprep.subr.bf16.mxu0 %v1387_v62  ;;  %3344 = vtanh.f32 %v1138_v18  ;;  %v1031_v13 = vadd.f32 %v1030_v10, %v4782_v46  ;;  %v1143_v63 = vpop.f32.mrb[40].mxu1 }
 0x1ff   :  { %v3323_v3 = vpop.eup %3322  ;;  %1633 = vmatprep.subr.bf16.mxu1 %v1389_v27  ;;  %1521 = vmatpush1.bf16.msra.mxu0 %v1386_v29  ;;  %3346 = vtanh.f32 %v1027_v25  ;;  %v1032_v53 = vpop.f32.mrb[41].mxu0  ;;  %v1144_v0 = vadd.f32 %v1143_v63, %v4782_v46 }
 0x200   :  { %v3325_v41 = vpop.eup %3324  ;;  %1634 = vmatpush1.bf16.msra.mxu1 %v1388_v34  ;;  %3348 = vtanh.f32 %v1140_v11  ;;  %v1033_v20 = vadd.f32 %v1032_v53, %v4782_v46  ;;  %v1145_v49 = vpop.f32.mrb[41].mxu1 }
 0x201   :  { %v3327_v28 = vpop.eup %3326  ;;  %v1034_v58 = vpop.f32.mrb[42].mxu0  ;;  %3350 = vtanh.f32 %v1031_v13  ;;  %v1146_v44 = vadd.f32 %v1145_v49, %v4782_v46  ;;  %v4923_v13 = vld [vmem:[%s5595_s1 + $0x30] ss:$12 sps:$4 sm:$0xff]  }
 0x202   :  { %v3329_v12 = vpop.eup %3328  ;;  %1539 = vmatmul.mubr.bf16.vlgmr.msra.gmra.mrb[64].mxu0 %v4889_v24  ;;  %v1334_v50 = vpack.c.bf16 %v3327_v28, %v3319_v54  ;;  %v1035_v2 = vadd.f32 %v1034_v58, %v4784_v39  ;;  %v1147_v23 = vpop.f32.mrb[42].mxu1  ;;  %3352 = vtanh.f32 %v1144_v0 }
 0x203   :  { %v3331_v30 = vpop.eup %3330  ;;  %1652 = vmatmul.mubr.bf16.vlgmr.msra.gmra.mrb[64].mxu1 %v4889_v24  ;;  %v1036_v1 = vpop.f32.mrb[43].mxu0  ;;  %v1336_v42 = vpack.c.bf16 %v3329_v12, %v3321_v4  ;;  %1548 = vmatprep.mubr.bf16.mxu0 %v5679_v26  ;;  %v1148_v8 = vadd.f32 %v1147_v23, %v4784_v39  ;;  %3354 = vtanh.f32 %v1033_v20 }
 0x204   :  { %v3333_v51 = vpop.eup %3332  ;;  %v1149_v48 = vpop.f32.mrb[43].mxu1  ;;  %v1335_v57 = vpack.c.bf16 %v3331_v30, %v3323_v3  ;;  %1661 = vmatprep.mubr.bf16.mxu1 %v5679_v26  ;;  %v1037_v45 = vadd.f32 %v1036_v1, %v4784_v39  ;;  %3356 = vtanh.f32 %v1146_v44 }
 0x205   :  { %v3335_v17 = vpop.eup %3334  ;;  %v1337_v46 = vpack.c.bf16 %v3333_v51, %v3325_v41  ;;  %v1150_v38 = vadd.f32 %v1149_v48, %v4784_v39  ;;  %3358 = vtanh.f32 %v1035_v2  ;;  %v1040_v56 = vpop.f32.mrb[44].mxu0 }
 0x206   :  { %v3337_v35 = vpop.eup %3336  ;;  %1732 = vmatprep.subr.bf16.mxu0 %v1335_v57  ;;  %3360 = vtanh.f32 %v1148_v8  ;;  %v1041_v19 = vadd.f32 %v1040_v56, %v4794_v14  ;;  %v1153_v37 = vpop.f32.mrb[44].mxu1 }
 0x207   :  { %v3339_v60 = vpop.eup %3338  ;;  %1845 = vmatprep.subr.bf16.mxu1 %v1337_v46  ;;  %1733 = vmatpush1.bf16.msra.mxu0 %v1334_v50  ;;  %3362 = vtanh.f32 %v1037_v45  ;;  %v1042_v39 = vpop.f32.mrb[45].mxu0  ;;  %v1154_v16 = vadd.f32 %v1153_v37, %v4794_v14 }
 0x208   :  { %v3341_v7 = vpop.eup %3340  ;;  %1846 = vmatpush1.bf16.msra.mxu1 %v1336_v42  ;;  %3364 = vtanh.f32 %v1150_v38  ;;  %v1043_v40 = vadd.f32 %v1042_v39, %v4794_v14  ;;  %v1155_v6 = vpop.f32.mrb[45].mxu1 }
 0x209   :  { %v3343_v22 = vpop.eup %3342  ;;  %v1044_v43 = vpop.f32.mrb[46].mxu0  ;;  %3366 = vtanh.f32 %v1041_v19  ;;  %v1156_v33 = vadd.f32 %v1155_v6, %v4794_v14 }
 0x20a   :  { %v3345_v29 = vpop.eup %3344  ;;  %1549 = vmatmul.mubr.bf16.gmra.mrb[68].mxu0 %v4906_v5  ;;  %v1342_v36 = vpack.c.bf16 %v3343_v22, %v3335_v17  ;;  %v1045_v18 = vadd.f32 %v1044_v43, %v4796_v21  ;;  %v1157_v47 = vpop.f32.mrb[46].mxu1  ;;  %3368 = vtanh.f32 %v1154_v16  ;;  %v4940_v22 = vld [vmem:[%s5595_s1 + $0x48] ss:$12 sps:$4 sm:$0xff]  }
 0x20b   :  { %v3347_v34 = vpop.eup %3346  ;;  %1662 = vmatmul.mubr.bf16.gmra.mrb[68].mxu1 %v4906_v5  ;;  %v1046_v62 = vpop.f32.mrb[47].mxu0  ;;  %v1344_v54 = vpack.c.bf16 %v3345_v29, %v3337_v35  ;;  %1558 = vmatprep.mubr.bf16.mxu0 %v5679_v26  ;;  %v1158_v27 = vadd.f32 %v1157_v47, %v4796_v21  ;;  %3370 = vtanh.f32 %v1043_v40 }
 0x20c   :  { %v3349_v25 = vpop.eup %3348  ;;  %v1159_v4 = vpop.f32.mrb[47].mxu1  ;;  %v1343_v11 = vpack.c.bf16 %v3347_v34, %v3339_v60  ;;  %1671 = vmatprep.mubr.bf16.mxu1 %v5679_v26  ;;  %v1047_v41 = vadd.f32 %v1046_v62, %v4796_v21  ;;  %3372 = vtanh.f32 %v1156_v33 }
 0x20d   :  { %v3351_v3 = vpop.eup %3350  ;;  %v1345_v14 = vpack.c.bf16 %v3349_v25, %v3341_v7  ;;  %v1160_v28 = vadd.f32 %v1159_v4, %v4796_v21  ;;  %3374 = vtanh.f32 %v1045_v18  ;;  %v1050_v12 = vpop.f32.mrb[48].mxu0 }
 0x20e   :  { %v3353_v10 = vpop.eup %3352  ;;  %1734 = vmatprep.subr.bf16.mxu0 %v1343_v11  ;;  %3376 = vtanh.f32 %v1158_v27  ;;  %v1051_v20 = vadd.f32 %v1050_v12, %v4806_v52  ;;  %v1163_v49 = vpop.f32.mrb[48].mxu1  ;;  %v4957_v12 = vld [vmem:[%s5595_s1 + $0x60] ss:$12 sps:$4 sm:$0xff]  }
 0x20f   :  { %v3355_v63 = vpop.eup %3354  ;;  %1847 = vmatprep.subr.bf16.mxu1 %v1345_v14  ;;  %1735 = vmatpush1.bf16.msra.mxu0 %v1342_v36  ;;  %3378 = vtanh.f32 %v1047_v41  ;;  %v1052_v21 = vpop.f32.mrb[49].mxu0  ;;  %v1164_v50 = vadd.f32 %v1163_v49, %v4806_v52 }
 0x210   :  { %v3357_v53 = vpop.eup %3356  ;;  %1848 = vmatpush1.bf16.msra.mxu1 %v1344_v54  ;;  %3380 = vtanh.f32 %v1160_v28  ;;  %v1053_v30 = vadd.f32 %v1052_v21, %v4806_v52  ;;  %v1165_v44 = vpop.f32.mrb[49].mxu1 }
 0x211   :  { %v3359_v0 = vpop.eup %3358  ;;  %v1054_v2 = vpop.f32.mrb[50].mxu0  ;;  %3382 = vtanh.f32 %v1051_v20  ;;  %v1166_v42 = vadd.f32 %v1165_v44, %v4806_v52 }
 0x212   :  { %v3361_v58 = vpop.eup %3360  ;;  %1559 = vmatmul.mubr.bf16.gmra.mrb[72].mxu0 %v4923_v13  ;;  %v1350_v23 = vpack.c.bf16 %v3359_v0, %v3351_v3  ;;  %v1055_v51 = vadd.f32 %v1054_v2, %v4808_v32  ;;  %v1167_v8 = vpop.f32.mrb[50].mxu1  ;;  %3384 = vtanh.f32 %v1164_v50 }
 0x213   :  { %v3363_v1 = vpop.eup %3362  ;;  %1672 = vmatmul.mubr.bf16.gmra.mrb[72].mxu1 %v4923_v13  ;;  %v1056_v48 = vpop.f32.mrb[51].mxu0  ;;  %v1352_v57 = vpack.c.bf16 %v3361_v58, %v3353_v10  ;;  %1568 = vmatprep.mubr.bf16.mxu0 %v5679_v26  ;;  %v1168_v45 = vadd.f32 %v1167_v8, %v4808_v32  ;;  %3386 = vtanh.f32 %v1053_v30 }
 0x214   :  { %v3365_v17 = vpop.eup %3364  ;;  %v1169_v46 = vpop.f32.mrb[51].mxu1  ;;  %v1351_v35 = vpack.c.bf16 %v3363_v1, %v3355_v63  ;;  %1681 = vmatprep.mubr.bf16.mxu1 %v5679_v26  ;;  %v1057_v60 = vadd.f32 %v1056_v48, %v4808_v32  ;;  %3388 = vtanh.f32 %v1166_v42 }
 0x215   :  { %v3367_v38 = vpop.eup %3366  ;;  %v1353_v52 = vpack.c.bf16 %v3365_v17, %v3357_v53  ;;  %v1170_v56 = vadd.f32 %v1169_v46, %v4808_v32  ;;  %3390 = vtanh.f32 %v1055_v51  ;;  %v1060_v39 = vpop.f32.mrb[52].mxu0 }
 0x216   :  { %v3369_v7 = vpop.eup %3368  ;;  %1736 = vmatprep.subr.bf16.mxu0 %v1351_v35  ;;  %3392 = vtanh.f32 %v1168_v45  ;;  %v1061_v16 = vadd.f32 %v1060_v39, %v4818_v55  ;;  %v1173_v40 = vpop.f32.mrb[52].mxu1 }
 0x217   :  { %v3371_v19 = vpop.eup %3370  ;;  %1849 = vmatprep.subr.bf16.mxu1 %v1353_v52  ;;  %1737 = vmatpush1.bf16.msra.mxu0 %v1350_v23  ;;  %3394 = vtanh.f32 %v1057_v60  ;;  %v1062_v32 = vpop.f32.mrb[53].mxu0  ;;  %v1174_v43 = vadd.f32 %v1173_v40, %v4818_v55 }
 0x218   :  { %v3373_v37 = vpop.eup %3372  ;;  %1850 = vmatpush1.bf16.msra.mxu1 %v1352_v57  ;;  %3396 = vtanh.f32 %v1170_v56  ;;  %v1063_v36 = vadd.f32 %v1062_v32, %v4818_v55  ;;  %v1175_v34 = vpop.f32.mrb[53].mxu1 }
 0x219   :  { %v3375_v29 = vpop.eup %3374  ;;  %v1064_v33 = vpop.f32.mrb[54].mxu0  ;;  %3398 = vtanh.f32 %v1061_v16  ;;  %v1176_v62 = vadd.f32 %v1175_v34, %v4818_v55 }
 0x21a   :  { %v3377_v6 = vpop.eup %3376  ;;  %1569 = vmatmul.mubr.bf16.gmra.mrb[76].mxu0 %v4940_v22  ;;  %v1358_v18 = vpack.c.bf16 %v3375_v29, %v3367_v38  ;;  %v1065_v54 = vadd.f32 %v1064_v33, %v4820_v59  ;;  %v1177_v25 = vpop.f32.mrb[54].mxu1  ;;  %3400 = vtanh.f32 %v1174_v43 }
 0x21b   :  { %v3379_v47 = vpop.eup %3378  ;;  %1682 = vmatmul.mubr.bf16.gmra.mrb[76].mxu1 %v4940_v22  ;;  %v1066_v27 = vpop.f32.mrb[55].mxu0  ;;  %v1360_v4 = vpack.c.bf16 %v3377_v6, %v3369_v7  ;;  %1578 = vmatprep.mubr.bf16.mxu0 %v5679_v26  ;;  %v1178_v3 = vadd.f32 %v1177_v25, %v4820_v59  ;;  %3402 = vtanh.f32 %v1063_v36 }
 0x21c   :  { %v3381_v11 = vpop.eup %3380  ;;  %v1179_v41 = vpop.f32.mrb[55].mxu1  ;;  %v1359_v14 = vpack.c.bf16 %v3379_v47, %v3371_v19  ;;  %1691 = vmatprep.mubr.bf16.mxu1 %v5679_v26  ;;  %v1067_v28 = vadd.f32 %v1066_v27, %v4820_v59  ;;  %3404 = vtanh.f32 %v1176_v62 }
 0x21d   :  { %v3383_v10 = vpop.eup %3382  ;;  %v1361_v55 = vpack.c.bf16 %v3381_v11, %v3373_v37  ;;  %v1180_v53 = vadd.f32 %v1179_v41, %v4820_v59  ;;  %3406 = vtanh.f32 %v1065_v54  ;;  %v1070_v49 = vpop.f32.mrb[56].mxu0  ;;  %v4974_v37 = vld [vmem:[%s5595_s1 + $0x78] ss:$12 sps:$4 sm:$0xff]  }
 0x21e   :  { %v3385_v63 = vpop.eup %3384  ;;  %1738 = vmatprep.subr.bf16.mxu0 %v1359_v14  ;;  %3408 = vtanh.f32 %v1178_v3  ;;  %v1071_v58 = vadd.f32 %v1070_v49, %v4834_v61  ;;  %v1183_v50 = vpop.f32.mrb[56].mxu1 }
 0x21f   :  { %v3387_v0 = vpop.eup %3386  ;;  %1851 = vmatprep.subr.bf16.mxu1 %v1361_v55  ;;  %1739 = vmatpush1.bf16.msra.mxu0 %v1358_v18  ;;  %3410 = vtanh.f32 %v1067_v28  ;;  %v1072_v59 = vpop.f32.mrb[57].mxu0  ;;  %v1184_v44 = vadd.f32 %v1183_v50, %v4834_v61 }
 0x220   :  { %v3389_v20 = vpop.eup %3388  ;;  %1852 = vmatpush1.bf16.msra.mxu1 %v1360_v4  ;;  %3412 = vtanh.f32 %v1180_v53  ;;  %v1073_v2 = vadd.f32 %v1072_v59, %v4834_v61  ;;  %v1185_v23 = vpop.f32.mrb[57].mxu1 }
 0x221   :  { %v3391_v21 = vpop.eup %3390  ;;  %v1074_v1 = vpop.f32.mrb[58].mxu0  ;;  %3414 = vtanh.f32 %v1071_v58  ;;  %v1186_v8 = vadd.f32 %v1185_v23, %v4834_v61 }
 0x222   :  { %v3393_v30 = vpop.eup %3392  ;;  %1579 = vmatmul.mubr.bf16.gmra.mrb[80].mxu0 %v4957_v12  ;;  %v1366_v42 = vpack.c.bf16 %v3391_v21, %v3383_v10  ;;  %v1075_v48 = vadd.f32 %v1074_v1, %v4836_v31  ;;  %v1187_v57 = vpop.f32.mrb[58].mxu1  ;;  %3416 = vtanh.f32 %v1184_v44 }
 0x223   :  { %v3395_v51 = vpop.eup %3394  ;;  %1692 = vmatmul.mubr.bf16.gmra.mrb[80].mxu1 %v4957_v12  ;;  %v1076_v17 = vpop.f32.mrb[59].mxu0  ;;  %v1368_v45 = vpack.c.bf16 %v3393_v30, %v3385_v63  ;;  %1588 = vmatprep.mubr.bf16.mxu0 %v5679_v26  ;;  %v1188_v35 = vadd.f32 %v1187_v57, %v4836_v31  ;;  %3418 = vtanh.f32 %v1073_v2 }
 0x224   :  { %v3397_v46 = vpop.eup %3396  ;;  %v1189_v38 = vpop.f32.mrb[59].mxu1  ;;  %v1367_v60 = vpack.c.bf16 %v3395_v51, %v3387_v0  ;;  %1701 = vmatprep.mubr.bf16.mxu1 %v5679_v26  ;;  %v1077_v7 = vadd.f32 %v1076_v17, %v4836_v31  ;;  %3420 = vtanh.f32 %v1186_v8  ;;  %v4991_v0 = vld [vmem:[%s5595_s1 + $0x90] ss:$12 sps:$4 sm:$0xff]  }
 0x225   :  { %v3399_v52 = vpop.eup %3398  ;;  %v1369_v61 = vpack.c.bf16 %v3397_v46, %v3389_v20  ;;  %v1190_v19 = vadd.f32 %v1189_v38, %v4836_v31  ;;  %3422 = vtanh.f32 %v1075_v48  ;;  %v1080_v16 = vpop.f32.mrb[60].mxu0 }
 0x226   :  { %v3401_v56 = vpop.eup %3400  ;;  %1740 = vmatprep.subr.bf16.mxu0 %v1367_v60  ;;  %3424 = vtanh.f32 %v1188_v35  ;;  %v1081_v32 = vadd.f32 %v1080_v16, %v4850_v15  ;;  %v1193_v6 = vpop.f32.mrb[60].mxu1 }
 0x227   :  { %v3403_v39 = vpop.eup %3402  ;;  %1853 = vmatprep.subr.bf16.mxu1 %v1369_v61  ;;  %1741 = vmatpush1.bf16.msra.mxu0 %v1366_v42  ;;  %3426 = vtanh.f32 %v1077_v7  ;;  %v1082_v31 = vpop.f32.mrb[61].mxu0  ;;  %v1194_v36 = vadd.f32 %v1193_v6, %v4850_v15  ;;  %v3057_v42 = vld [vmem:[%s5595_s1 + $0xa8] ss:$12 sps:$4 sm:$0xff]  }
 0x228   :  { %v3405_v29 = vpop.eup %3404  ;;  %1854 = vmatpush1.bf16.msra.mxu1 %v1368_v45  ;;  %3428 = vtanh.f32 %v1190_v19  ;;  %v1083_v34 = vadd.f32 %v1082_v31, %v4850_v15  ;;  %v1195_v33 = vpop.f32.mrb[61].mxu1 }
 0x229   :  { %v3407_v40 = vpop.eup %3406  ;;  %v1084_v18 = vpop.f32.mrb[62].mxu0  ;;  %3430 = vtanh.f32 %v1081_v32  ;;  %v1196_v54 = vadd.f32 %v1195_v33, %v4850_v15 }
 0x22a   :  { %v3409_v43 = vpop.eup %3408  ;;  %1589 = vmatmul.mubr.bf16.gmra.mrb[84].mxu0 %v4974_v37  ;;  %v1374_v47 = vpack.c.bf16 %v3407_v40, %v3399_v52  ;;  %v1085_v25 = vadd.f32 %v1084_v18, %v4852_v9  ;;  %v1197_v27 = vpop.f32.mrb[62].mxu1  ;;  %3432 = vtanh.f32 %v1194_v36 }
 0x22b   :  { %v3411_v62 = vpop.eup %3410  ;;  %1702 = vmatmul.mubr.bf16.gmra.mrb[84].mxu1 %v4974_v37  ;;  %v1086_v4 = vpop.f32.mrb[63].mxu0  ;;  %v1376_v11 = vpack.c.bf16 %v3409_v43, %v3401_v56  ;;  %1598 = vmatprep.mubr.bf16.mxu0 %v5679_v26  ;;  %v1198_v41 = vadd.f32 %v1197_v27, %v4852_v9  ;;  %3434 = vtanh.f32 %v1083_v34 }
 0x22c   :  { %v3413_v3 = vpop.eup %3412  ;;  %v1199_v14 = vpop.f32.mrb[63].mxu1  ;;  %v1375_v10 = vpack.c.bf16 %v3411_v62, %v3403_v39  ;;  %1711 = vmatprep.mubr.bf16.mxu1 %v5679_v26  ;;  %v1087_v55 = vadd.f32 %v1086_v4, %v4852_v9  ;;  %3436 = vtanh.f32 %v1196_v54 }
 0x22d   :  { %v3415_v28 = vpop.eup %3414  ;;  %v1377_v15 = vpack.c.bf16 %v3413_v3, %v3405_v29  ;;  %v1200_v53 = vadd.f32 %v1199_v14, %v4852_v9  ;;  %3438 = vtanh.f32 %v1085_v25 }
 0x22e   :  { %v3417_v63 = vpop.eup %3416  ;;  %1742 = vmatprep.subr.bf16.mxu0 %v1375_v10  ;;  %3440 = vtanh.f32 %v1198_v41 }
 0x22f   :  { %v3419_v20 = vpop.eup %3418  ;;  %1855 = vmatprep.subr.bf16.mxu1 %v1377_v15  ;;  %1743 = vmatpush1.bf16.msra.mxu0 %v1374_v47  ;;  %3442 = vtanh.f32 %v1087_v55 }
 0x230   :  { %v3421_v49 = vpop.eup %3420  ;;  %1856 = vmatpush1.bf16.msra.mxu1 %v1376_v11  ;;  %3444 = vtanh.f32 %v1200_v53 }
 0x231   :  { %v3423_v21 = vpop.eup %3422 }
 0x232   :  { %v3425_v58 = vpop.eup %3424  ;;  %1599 = vmatmul.mubr.bf16.gmra.mrb[88].mxu0 %v4991_v0  ;;  %v1382_v9 = vpack.c.bf16 %v3423_v21, %v3415_v28 }
 0x233   :  { %v3427_v50 = vpop.eup %3426  ;;  %1712 = vmatmul.mubr.bf16.gmra.mrb[88].mxu1 %v4991_v0  ;;  %v1384_v59 = vpack.c.bf16 %v3425_v58, %v3417_v63  ;;  %1608 = vmatprep.mubr.bf16.mxu0 %v5679_v26 }
 0x234   :  { %v3429_v30 = vpop.eup %3428  ;;  %v1383_v44 = vpack.c.bf16 %v3427_v50, %v3419_v20  ;;  %1721 = vmatprep.mubr.bf16.mxu1 %v5679_v26 }
 0x235   :  { %v3431_v2 = vpop.eup %3430  ;;  %v1385_v23 = vpack.c.bf16 %v3429_v30, %v3421_v49 }
 0x236   :  { %v3433_v1 = vpop.eup %3432  ;;  %1744 = vmatprep.subr.bf16.mxu0 %v1383_v44 }
 0x237   :  { %v3435_v51 = vpop.eup %3434  ;;  %1857 = vmatprep.subr.bf16.mxu1 %v1385_v23  ;;  %1745 = vmatpush1.bf16.msra.mxu0 %v1382_v9 }
 0x238   :  { %v3437_v8 = vpop.eup %3436  ;;  %1858 = vmatpush1.bf16.msra.mxu1 %v1384_v59 }
 0x239   :  { %v3439_v48 = vpop.eup %3438 }
 0x23a   :  { %v3441_v57 = vpop.eup %3440  ;;  %1609 = vmatmul.mubr.bf16.gmra.mrb[92].mxu0 %v3057_v42  ;;  %v1390_v17 = vpack.c.bf16 %v3439_v48, %v3431_v2 }
 0x23b   :  { %v3443_v45 = vpop.eup %3442  ;;  %1722 = vmatmul.mubr.bf16.gmra.mrb[92].mxu1 %v3057_v42  ;;  %v1392_v46 = vpack.c.bf16 %v3441_v57, %v3433_v1  ;;  %1764 = vmatprep.mubr.bf16.mxu0 %v5679_v26 }
 0x23c   :  { %v3445_v35 = vpop.eup %3444  ;;  %v1391_v38 = vpack.c.bf16 %v3443_v45, %v3435_v51  ;;  %1877 = vmatprep.mubr.bf16.mxu1 %v5679_v26 }
 0x23d   :  { %v1393_v60 = vpack.c.bf16 %v3445_v35, %v3437_v8 }
 0x23e   :  { %1746 = vmatprep.subr.bf16.mxu0 %v1391_v38 }
 0x23f   :  { %1859 = vmatprep.subr.bf16.mxu1 %v1393_v60  ;;  %1747 = vmatpush1.bf16.msra.mxu0 %v1390_v17 }
 0x240   :  { %1860 = vmatpush1.bf16.msra.mxu1 %v1392_v46 }
 0x242   :  { %1765 = vmatmul.mubr.bf16.vlgmr.msra.gmra.mrb[96].mxu0 %v4889_v24 }
 0x243   :  { %1878 = vmatmul.mubr.bf16.vlgmr.msra.gmra.mrb[96].mxu1 %v4889_v24  ;;  %1774 = vmatprep.mubr.bf16.mxu0 %v5679_v26 }
 0x244   :  { %1887 = vmatprep.mubr.bf16.mxu1 %v5679_v26 }
 0x24a   :  { %1775 = vmatmul.mubr.bf16.gmra.mrb[100].mxu0 %v4906_v5 }
 0x24b   :  { %1888 = vmatmul.mubr.bf16.gmra.mrb[100].mxu1 %v4906_v5  ;;  %1784 = vmatprep.mubr.bf16.mxu0 %v5679_v26  ;;  %v5032_v24 = vpop.permute.xlu1 %1395 }
 0x24c   :  { %1897 = vmatprep.mubr.bf16.mxu1 %v5679_v26  ;;  %v5034_v5 = vpop.permute.xlu0 %1399 }
 0x250   :  { %v5055_v63 = vpop.permute.xlu0 %1411 }
 0x252   :  { %1785 = vmatmul.mubr.bf16.gmra.mrb[104].mxu0 %v4923_v13 }
 0x253   :  { %1898 = vmatmul.mubr.bf16.gmra.mrb[104].mxu1 %v4923_v13  ;;  %1794 = vmatprep.mubr.bf16.mxu0 %v5679_v26 }
 0x254   :  { %1907 = vmatprep.mubr.bf16.mxu1 %v5679_v26 }
 0x25a   :  { %1795 = vmatmul.mubr.bf16.gmra.mrb[108].mxu0 %v4940_v22 }
 0x25b   :  { %1908 = vmatmul.mubr.bf16.gmra.mrb[108].mxu1 %v4940_v22  ;;  %1804 = vmatprep.mubr.bf16.mxu0 %v5679_v26  ;;  %v5036_v22 = vpop.permute.xlu1 %1403 }
 0x25c   :  { %1917 = vmatprep.mubr.bf16.mxu1 %v5679_v26 }
 0x25f   :  { %v5046_v34 = vpop.permute.xlu1 %1407 }
 0x262   :  { %1805 = vmatmul.mubr.bf16.gmra.mrb[112].mxu0 %v4957_v12 }
 0x263   :  { %1918 = vmatmul.mubr.bf16.gmra.mrb[112].mxu1 %v4957_v12  ;;  %1814 = vmatprep.mubr.bf16.mxu0 %v5679_v26  ;;  %v5058_v49 = vpop.permute.xlu1 %1415 }
 0x264   :  { %1927 = vmatprep.mubr.bf16.mxu1 %v5679_v26 }
 0x26a   :  { %1815 = vmatmul.mubr.bf16.gmra.mrb[116].mxu0 %v4974_v37 }
 0x26b   :  { %1928 = vmatmul.mubr.bf16.gmra.mrb[116].mxu1 %v4974_v37  ;;  %1824 = vmatprep.mubr.bf16.mxu0 %v5679_v26 }
 0x26c   :  { %1937 = vmatprep.mubr.bf16.mxu1 %v5679_v26 }
 0x272   :  { %1825 = vmatmul.mubr.bf16.gmra.mrb[120].mxu0 %v4991_v0 }
 0x273   :  { %1938 = vmatmul.mubr.bf16.gmra.mrb[120].mxu1 %v4991_v0  ;;  %1834 = vmatprep.mubr.bf16.mxu0 %v5679_v26 }
 0x274   :  { %1947 = vmatprep.mubr.bf16.mxu1 %v5679_v26 }
 0x27a   :  { %1835 = vmatmul.mubr.bf16.gmra.mrb[124].mxu0 %v3057_v42 }
 0x27b   :  { %1948 = vmatmul.mubr.bf16.gmra.mrb[124].mxu1 %v3057_v42  ;;  %2238 = vmatprep.mubr.bf16.mxu0 %v5679_v26 }
 0x27c   :  { %2311 = vmatprep.mubr.bf16.mxu1 %v5679_v26 }
 0x2d5   :  { %v1540_v13 = vpop.f32.mrb[64].mxu0 }
 0x2d6   :  { %v1653_v12 = vpop.f32.mrb[64].mxu1  ;;  %v1542_v52 = vpop.f32.mrb[65].mxu0  ;;  %v1541_v7 = vadd.f32 %v1540_v13, %v5032_v24 }
 0x2d7   :  { %v1655_v61 = vpop.f32.mrb[65].mxu1  ;;  %v1544_v56 = vpop.f32.mrb[66].mxu0  ;;  %v1543_v19 = vadd.f32 %v1542_v52, %v5032_v24  ;;  %v1654_v31 = vadd.f32 %v1653_v12, %v5032_v24 }
 0x2d8   :  { %v1657_v37 = vpop.f32.mrb[66].mxu1  ;;  %v1546_v39 = vpop.f32.mrb[67].mxu0  ;;  %v1656_v29 = vadd.f32 %v1655_v61, %v5032_v24  ;;  %3446 = vtanh.f32 %v1541_v7  ;;  %v1545_v32 = vadd.f32 %v1544_v56, %v5034_v5 }
 0x2d9   :  { %v1547_v16 = vadd.f32 %v1546_v39, %v5034_v5  ;;  %v1659_v40 = vpop.f32.mrb[67].mxu1  ;;  %3448 = vtanh.f32 %v1543_v19  ;;  %v1658_v43 = vadd.f32 %v1657_v37, %v5034_v5  ;;  %v5067_v61 = vpop.permute.xlu0 %1419 }
 0x2da   :  { %v1660_v6 = vadd.f32 %v1659_v40, %v5034_v5  ;;  %3450 = vtanh.f32 %v1656_v29  ;;  %v5070_v39 = vpop.permute.xlu1 %1423 }
 0x2db   :  { %3452 = vtanh.f32 %v1547_v16 }
 0x2dc   :  { %3454 = vtanh.f32 %v1660_v6 }
 0x2dd   :  { %v1550_v36 = vpop.f32.mrb[68].mxu0  ;;  %3456 = vtanh.f32 %v1545_v32 }
 0x2de   :  { %v1551_v33 = vadd.f32 %v1550_v36, %v5036_v22  ;;  %v1663_v18 = vpop.f32.mrb[68].mxu1  ;;  %v1552_v47 = vpop.f32.mrb[69].mxu0  ;;  %3458 = vtanh.f32 %v1654_v31 }
 0x2df   :  { %v1664_v62 = vadd.f32 %v1663_v18, %v5036_v22  ;;  %v1553_v54 = vadd.f32 %v1552_v47, %v5036_v22  ;;  %v1665_v25 = vpop.f32.mrb[69].mxu1  ;;  %v1554_v27 = vpop.f32.mrb[70].mxu0  ;;  %3460 = vtanh.f32 %v1658_v43 }
 0x2e0   :  { %3462 = vtanh.f32 %v1551_v33  ;;  %v1666_v4 = vadd.f32 %v1665_v25, %v5036_v22  ;;  %v1667_v11 = vpop.f32.mrb[70].mxu1  ;;  %v1556_v3 = vpop.f32.mrb[71].mxu0  ;;  %v1555_v55 = vadd.f32 %v1554_v27, %v5046_v34 }
 0x2e1   :  { %3464 = vtanh.f32 %v1664_v62  ;;  %v1557_v41 = vadd.f32 %v1556_v3, %v5046_v34  ;;  %v1669_v14 = vpop.f32.mrb[71].mxu1  ;;  %v1668_v53 = vadd.f32 %v1667_v11, %v5046_v34 }
 0x2e2   :  { %v3447_v10 = vpop.eup %3446  ;;  %3466 = vtanh.f32 %v1553_v54  ;;  %v1670_v28 = vadd.f32 %v1669_v14, %v5046_v34 }
 0x2e3   :  { %v3449_v15 = vpop.eup %3448  ;;  %3468 = vtanh.f32 %v1666_v4 }
 0x2e4   :  { %v3451_v0 = vpop.eup %3450  ;;  %3470 = vtanh.f32 %v1557_v41 }
 0x2e5   :  { %v3453_v20 = vpop.eup %3452  ;;  %3472 = vtanh.f32 %v1670_v28  ;;  %v1560_v21 = vpop.f32.mrb[72].mxu0 }
 0x2e6   :  { %v3455_v58 = vpop.eup %3454  ;;  %v1561_v9 = vadd.f32 %v1560_v21, %v5055_v63  ;;  %v1673_v50 = vpop.f32.mrb[72].mxu1  ;;  %v2087_v30 = vpack.c.bf16 %v3453_v20, %v3449_v15  ;;  %3474 = vtanh.f32 %v1555_v55 }
 0x2e7   :  { %v1562_v59 = vpop.f32.mrb[73].mxu0  ;;  %v3457_v44 = vpop.eup %3456  ;;  %v1674_v2 = vadd.f32 %v1673_v50, %v5055_v63  ;;  %v2089_v51 = vpack.c.bf16 %v3455_v58, %v3451_v0  ;;  %3476 = vtanh.f32 %v1668_v53 }
 0x2e8   :  { %v1563_v23 = vadd.f32 %v1562_v59, %v5055_v63  ;;  %v1675_v1 = vpop.f32.mrb[73].mxu1  ;;  %v1564_v42 = vpop.f32.mrb[74].mxu0  ;;  %3478 = vtanh.f32 %v1561_v9  ;;  %2206 = vmatprep.subr.bf16.mxu0 %v2087_v30  ;;  %v2086_v46 = vpack.c.bf16 %v3457_v44, %v3447_v10 }
 0x2e9   :  { %v3459_v8 = vpop.eup %3458  ;;  %v1676_v48 = vadd.f32 %v1675_v1, %v5055_v63  ;;  %v1565_v57 = vadd.f32 %v1564_v42, %v5058_v49  ;;  %v1677_v17 = vpop.f32.mrb[74].mxu1  ;;  %3480 = vtanh.f32 %v1674_v2  ;;  %2279 = vmatprep.subr.bf16.mxu1 %v2089_v51 }
 0x2ea   :  { %v1566_v45 = vpop.f32.mrb[75].mxu0  ;;  %v3461_v35 = vpop.eup %3460  ;;  %v1678_v38 = vadd.f32 %v1677_v17, %v5058_v49  ;;  %3482 = vtanh.f32 %v1563_v23  ;;  %2207 = vmatpush1.bf16.msra.mxu0 %v2086_v46 }
 0x2eb   :  { %v1679_v60 = vpop.f32.mrb[75].mxu1  ;;  %v3463_v13 = vpop.eup %3462  ;;  %v1567_v12 = vadd.f32 %v1566_v45, %v5058_v49  ;;  %v2088_v52 = vpack.c.bf16 %v3461_v35, %v3459_v8  ;;  %3484 = vtanh.f32 %v1676_v48 }
 0x2ec   :  { %v3465_v7 = vpop.eup %3464  ;;  %v1680_v56 = vadd.f32 %v1679_v60, %v5058_v49  ;;  %3486 = vtanh.f32 %v1565_v57  ;;  %v5079_v0 = vpop.permute.xlu0 %1427 }
 0x2ed   :  { %v3467_v19 = vpop.eup %3466  ;;  %2280 = vmatpush1.bf16.msra.mxu1 %v2088_v52  ;;  %3488 = vtanh.f32 %v1678_v38  ;;  %v1570_v29 = vpop.f32.mrb[76].mxu0 }
 0x2ee   :  { %v3469_v37 = vpop.eup %3468  ;;  %3490 = vtanh.f32 %v1567_v12  ;;  %v1571_v40 = vadd.f32 %v1570_v29, %v5067_v61  ;;  %v1683_v32 = vpop.f32.mrb[76].mxu1 }
 0x2ef   :  { %v3471_v16 = vpop.eup %3470  ;;  %v1572_v6 = vpop.f32.mrb[77].mxu0  ;;  %3492 = vtanh.f32 %v1680_v56  ;;  %v1684_v43 = vadd.f32 %v1683_v32, %v5067_v61 }
 0x2f0   :  { %v3473_v31 = vpop.eup %3472  ;;  %v1573_v36 = vadd.f32 %v1572_v6, %v5067_v61  ;;  %v1685_v33 = vpop.f32.mrb[77].mxu1  ;;  %v2095_v47 = vpack.c.bf16 %v3471_v16, %v3467_v19  ;;  %3494 = vtanh.f32 %v1571_v40 }
 0x2f1   :  { %v1574_v18 = vpop.f32.mrb[78].mxu0  ;;  %v3475_v62 = vpop.eup %3474  ;;  %v1686_v54 = vadd.f32 %v1685_v33, %v5067_v61  ;;  %v2097_v11 = vpack.c.bf16 %v3473_v31, %v3469_v37  ;;  %3496 = vtanh.f32 %v1684_v43 }
 0x2f2   :  { %v1575_v25 = vadd.f32 %v1574_v18, %v5070_v39  ;;  %v1687_v27 = vpop.f32.mrb[78].mxu1  ;;  %v1576_v4 = vpop.f32.mrb[79].mxu0  ;;  %2208 = vmatprep.subr.bf16.mxu0 %v2095_v47  ;;  %v2094_v10 = vpack.c.bf16 %v3475_v62, %v3463_v13  ;;  %3498 = vtanh.f32 %v1573_v36 }
 0x2f3   :  { %v3477_v3 = vpop.eup %3476  ;;  %v1688_v41 = vadd.f32 %v1687_v27, %v5070_v39  ;;  %v1689_v14 = vpop.f32.mrb[79].mxu1  ;;  %v1577_v55 = vadd.f32 %v1576_v4, %v5070_v39  ;;  %2281 = vmatprep.subr.bf16.mxu1 %v2097_v11  ;;  %3500 = vtanh.f32 %v1686_v54 }
 0x2f4   :  { %v3479_v28 = vpop.eup %3478  ;;  %v2096_v15 = vpack.c.bf16 %v3477_v3, %v3465_v7  ;;  %v1690_v20 = vadd.f32 %v1689_v14, %v5070_v39  ;;  %2209 = vmatpush1.bf16.msra.mxu0 %v2094_v10  ;;  %3502 = vtanh.f32 %v1575_v25  ;;  %v5082_v9 = vpop.permute.xlu1 %1431 }
 0x2f5   :  { %v3481_v53 = vpop.eup %3480  ;;  %3504 = vtanh.f32 %v1688_v41  ;;  %v1580_v50 = vpop.f32.mrb[80].mxu0 }
 0x2f6   :  { %v3483_v21 = vpop.eup %3482  ;;  %2282 = vmatpush1.bf16.msra.mxu1 %v2096_v15  ;;  %3506 = vtanh.f32 %v1577_v55  ;;  %v1581_v30 = vadd.f32 %v1580_v50, %v5079_v0  ;;  %v1693_v44 = vpop.f32.mrb[80].mxu1 }
 0x2f7   :  { %v3485_v58 = vpop.eup %3484  ;;  %v1582_v2 = vpop.f32.mrb[81].mxu0  ;;  %3508 = vtanh.f32 %v1690_v20  ;;  %v1694_v1 = vadd.f32 %v1693_v44, %v5079_v0 }
 0x2f8   :  { %v3487_v59 = vpop.eup %3486  ;;  %v1583_v42 = vadd.f32 %v1582_v2, %v5079_v0  ;;  %v1695_v51 = vpop.f32.mrb[81].mxu1  ;;  %3510 = vtanh.f32 %v1581_v30  ;;  %v3883_v2 = vmov 6  }
 0x2f9   :  { %v3489_v23 = vpop.eup %3488  ;;  %v1584_v8 = vpop.f32.mrb[82].mxu0  ;;  %v2102_v48 = vpack.c.bf16 %v3487_v59, %v3479_v28  ;;  %v1696_v17 = vadd.f32 %v1695_v51, %v5079_v0  ;;  %3512 = vtanh.f32 %v1694_v1  ;;  %3038 = vset.pattern.permute.xlu1 %v3883_v2  ;;  %3037 = vset.pattern.permute.xlu0 %v3883_v2  ;;  %v5165_v2 = vld [vmem:[%s5594_s2 + $0x28] sm:$0xff] }
 0x2fa   :  { %v3491_v57 = vpop.eup %3490  ;;  %v1585_v45 = vadd.f32 %v1584_v8, %v5082_v9  ;;  %v1697_v46 = vpop.f32.mrb[82].mxu1  ;;  %v2104_v38 = vpack.c.bf16 %v3489_v23, %v3481_v53  ;;  %3514 = vtanh.f32 %v1583_v42  ;;  %v5115_v8 = vld [vmem:[%s5594_s2 + $0x8] sm:$0xff] }
 0x2fb   :  { %v1586_v35 = vpop.f32.mrb[83].mxu0  ;;  %v3493_v60 = vpop.eup %3492  ;;  %v1698_v13 = vadd.f32 %v1697_v46, %v5082_v9  ;;  %v2103_v52 = vpack.c.bf16 %v3491_v57, %v3483_v21  ;;  %3516 = vtanh.f32 %v1696_v17  ;;  %2155 = vperm.xlu1 %3038, %v5115_v8  }
 0x2fc   :  { %v1699_v12 = vpop.f32.mrb[83].mxu1  ;;  %v3495_v7 = vpop.eup %3494  ;;  %v1587_v56 = vadd.f32 %v1586_v35, %v5082_v9  ;;  %v2105_v19 = vpack.c.bf16 %v3493_v60, %v3485_v58  ;;  %3518 = vtanh.f32 %v1585_v45 }
 0x2fd   :  { %v3497_v37 = vpop.eup %3496  ;;  %v5091_v29 = vpop.permute.xlu0 %1435  ;;  %v1700_v16 = vadd.f32 %v1699_v12, %v5082_v9  ;;  %2210 = vmatprep.subr.bf16.mxu0 %v2103_v52  ;;  %3520 = vtanh.f32 %v1698_v13  ;;  %v5125_v52 = vld [vmem:[%s5594_s2] sm:$0xff] }
 0x2fe   :  { %v3499_v40 = vpop.eup %3498  ;;  %2283 = vmatprep.subr.bf16.mxu1 %v2105_v19  ;;  %2211 = vmatpush1.bf16.msra.mxu0 %v2102_v48  ;;  %v5094_v6 = vpop.permute.xlu1 %1439  ;;  %3522 = vtanh.f32 %v1587_v56 }
 0x2ff   :  { %v3501_v32 = vpop.eup %3500  ;;  %2284 = vmatpush1.bf16.msra.mxu1 %v2104_v38  ;;  %v1590_v31 = vpop.f32.mrb[84].mxu0  ;;  %3524 = vtanh.f32 %v1700_v16  ;;  %2151 = vperm.xlu0 %3037, %v5125_v52  }
 0x300   :  { %v3503_v43 = vpop.eup %3502  ;;  %v1591_v36 = vadd.f32 %v1590_v31, %v5091_v29  ;;  %v1703_v33 = vpop.f32.mrb[84].mxu1 }
 0x301   :  { %v1592_v18 = vpop.f32.mrb[85].mxu0  ;;  %v3505_v47 = vpop.eup %3504  ;;  %v1704_v62 = vadd.f32 %v1703_v33, %v5091_v29  ;;  %v2110_v4 = vpack.c.bf16 %v3503_v43, %v3495_v7  ;;  %v5135_v33 = vld [vmem:[%s5594_s2 + $0x10] sm:$0xff] }
 0x302   :  { %v1593_v54 = vadd.f32 %v1592_v18, %v5091_v29  ;;  %v1705_v25 = vpop.f32.mrb[85].mxu1  ;;  %v1594_v27 = vpop.f32.mrb[86].mxu0  ;;  %3526 = vtanh.f32 %v1591_v36  ;;  %v2112_v28 = vpack.c.bf16 %v3505_v47, %v3497_v37  ;;  %2159 = vperm.xlu1 %3038, %v5135_v33  }
 0x303   :  { %v3507_v11 = vpop.eup %3506  ;;  %v1706_v3 = vadd.f32 %v1705_v25, %v5091_v29  ;;  %v1595_v41 = vadd.f32 %v1594_v27, %v5094_v6  ;;  %v1707_v14 = vpop.f32.mrb[86].mxu1  ;;  %3528 = vtanh.f32 %v1704_v62 }
 0x304   :  { %v1596_v10 = vpop.f32.mrb[87].mxu0  ;;  %v3509_v55 = vpop.eup %3508  ;;  %v1708_v15 = vadd.f32 %v1707_v14, %v5094_v6  ;;  %v2111_v20 = vpack.c.bf16 %v3507_v11, %v3499_v40  ;;  %3530 = vtanh.f32 %v1593_v54 }
 0x305   :  { %v1709_v53 = vpop.f32.mrb[87].mxu1  ;;  %v5102_v21 = vpop.eup %3510  ;;  %v1597_v58 = vadd.f32 %v1596_v10, %v5094_v6  ;;  %v2113_v50 = vpack.c.bf16 %v3509_v55, %v3501_v32  ;;  %3532 = vtanh.f32 %v1706_v3  ;;  %v5155_v10 = vld [vmem:[%s5594_s2 + $0x20] sm:$0xff] }
 0x306   :  { %v5105_v59 = vpop.eup %3512  ;;  %v5107_v30 = vpop.permute.xlu0 %1443  ;;  %v1710_v44 = vadd.f32 %v1709_v53, %v5094_v6  ;;  %2212 = vmatprep.subr.bf16.mxu0 %v2111_v20  ;;  %3534 = vtanh.f32 %v1595_v41  ;;  %2167 = vperm.xlu1 %3038, %v5155_v10  }
 0x307   :  { %v3515_v23 = vpop.eup %3514  ;;  %2285 = vmatprep.subr.bf16.mxu1 %v2113_v50  ;;  %2213 = vmatpush1.bf16.msra.mxu0 %v2110_v4  ;;  %v5110_v42 = vpop.permute.xlu1 %1447  ;;  %3536 = vtanh.f32 %v1708_v15  ;;  %v5147_v4 = vld [vmem:[%s5594_s2 + $0x18] sm:$0xff] }
 0x308   :  { %v3517_v1 = vpop.eup %3516  ;;  %2286 = vmatpush1.bf16.msra.mxu1 %v2112_v28  ;;  %v1600_v51 = vpop.f32.mrb[88].mxu0  ;;  %3538 = vtanh.f32 %v1597_v58  ;;  %2163 = vperm.xlu0 %3037, %v5147_v4  }
 0x309   :  { %v3519_v48 = vpop.eup %3518  ;;  %v1601_v57 = vadd.f32 %v1600_v51, %v5107_v30  ;;  %v1713_v17 = vpop.f32.mrb[88].mxu1  ;;  %3540 = vtanh.f32 %v1710_v44 }
 0x30a   :  { %v1602_v45 = vpop.f32.mrb[89].mxu0  ;;  %v3521_v46 = vpop.eup %3520  ;;  %v1714_v35 = vadd.f32 %v1713_v17, %v5107_v30  ;;  %v2118_v12 = vpack.c.bf16 %v3519_v48, %v5102_v21 }
 0x30b   :  { %v1603_v38 = vadd.f32 %v1602_v45, %v5107_v30  ;;  %v1715_v60 = vpop.f32.mrb[89].mxu1  ;;  %v1604_v13 = vpop.f32.mrb[90].mxu0  ;;  %3542 = vtanh.f32 %v1601_v57  ;;  %v2120_v40 = vpack.c.bf16 %v3521_v46, %v5105_v59 }
 0x30c   :  { %v3523_v7 = vpop.eup %3522  ;;  %v1716_v56 = vadd.f32 %v1715_v60, %v5107_v30  ;;  %v1605_v19 = vadd.f32 %v1604_v13, %v5110_v42  ;;  %v1717_v37 = vpop.f32.mrb[90].mxu1  ;;  %3544 = vtanh.f32 %v1714_v35  ;;  %2171 = vperm.xlu0 %3037, %v5165_v2   ;;  %v5174_v60 = vld [vmem:[%s5594_s2 + $0x30] sm:$0xff] }
 0x30d   :  { %v1606_v16 = vpop.f32.mrb[91].mxu0  ;;  %v3525_v32 = vpop.eup %3524  ;;  %v1718_v31 = vadd.f32 %v1717_v37, %v5110_v42  ;;  %v2119_v36 = vpack.c.bf16 %v3523_v7, %v3515_v23  ;;  %3546 = vtanh.f32 %v1603_v38  ;;  %2175 = vperm.xlu1 %3038, %v5174_v60   ;;  %v5182_v37 = vld [vmem:[%s5594_s2 + $0x38] sm:$0xff] }
 0x30e   :  { %v1719_v43 = vpop.f32.mrb[91].mxu1  ;;  %v5138_v18 = vpop.eup %3526  ;;  %v1607_v47 = vadd.f32 %v1606_v16, %v5110_v42  ;;  %v2121_v62 = vpack.c.bf16 %v3525_v32, %v3517_v1  ;;  %3548 = vtanh.f32 %v1716_v56 }
 0x30f   :  { %v3529_v54 = vpop.eup %3528  ;;  %v5141_v25 = vpop.permute.xlu0 %1451  ;;  %v1720_v27 = vadd.f32 %v1719_v43, %v5110_v42  ;;  %2214 = vmatprep.subr.bf16.mxu0 %v2119_v36  ;;  %3550 = vtanh.f32 %v1605_v19 }
 0x310   :  { %v3531_v11 = vpop.eup %3530  ;;  %2287 = vmatprep.subr.bf16.mxu1 %v2121_v62  ;;  %2215 = vmatpush1.bf16.msra.mxu0 %v2118_v12  ;;  %v5150_v41 = vpop.permute.xlu1 %1455  ;;  %3552 = vtanh.f32 %v1718_v31  ;;  %v3884_v31 = vmov 2  }
 0x311   :  { %v3533_v3 = vpop.eup %3532  ;;  %2288 = vmatpush1.bf16.msra.mxu1 %v2120_v40  ;;  %v1610_v14 = vpop.f32.mrb[92].mxu0  ;;  %3554 = vtanh.f32 %v1607_v47  ;;  %2179 = vperm.xlu0 %3037, %v5182_v37  }
 0x312   :  { %v3535_v28 = vpop.eup %3534  ;;  %v1611_v55 = vadd.f32 %v1610_v14, %v5141_v25  ;;  %v1723_v15 = vpop.f32.mrb[92].mxu1  ;;  %3556 = vtanh.f32 %v1720_v27  ;;  %3039 = vset.pattern.permute.xlu1 %v3884_v31 }
 0x313   :  { %v1612_v53 = vpop.f32.mrb[93].mxu0  ;;  %v3537_v20 = vpop.eup %3536  ;;  %v1724_v21 = vadd.f32 %v1723_v15, %v5141_v25  ;;  %v2126_v44 = vpack.c.bf16 %v3535_v28, %v5138_v18  ;;  %2563 = vperm.xlu1 %3039, %v5125_v52  }
 0x314   :  { %v1613_v58 = vadd.f32 %v1612_v53, %v5141_v25  ;;  %v1725_v50 = vpop.f32.mrb[93].mxu1  ;;  %v1614_v59 = vpop.f32.mrb[94].mxu0  ;;  %3558 = vtanh.f32 %v1611_v55  ;;  %v2128_v17 = vpack.c.bf16 %v3537_v20, %v3529_v54 }
 0x315   :  { %v3539_v23 = vpop.eup %3538  ;;  %v1726_v1 = vadd.f32 %v1725_v50, %v5141_v25  ;;  %v1615_v51 = vadd.f32 %v1614_v59, %v5150_v41  ;;  %v1727_v48 = vpop.f32.mrb[94].mxu1  ;;  %3560 = vtanh.f32 %v1724_v21  ;;  %3040 = vset.pattern.permute.xlu0 %v3884_v31 }
 0x316   :  { %v1616_v57 = vpop.f32.mrb[95].mxu0  ;;  %v3541_v45 = vpop.eup %3540  ;;  %v1728_v46 = vadd.f32 %v1727_v48, %v5150_v41  ;;  %v2127_v38 = vpack.c.bf16 %v3539_v23, %v3531_v11  ;;  %3562 = vtanh.f32 %v1613_v58  ;;  %2567 = vperm.xlu0 %3040, %v5115_v8  }
 0x317   :  { %v1729_v35 = vpop.f32.mrb[95].mxu1  ;;  %v3543_v13 = vpop.eup %3542  ;;  %v1617_v12 = vadd.f32 %v1616_v57, %v5150_v41  ;;  %v2129_v7 = vpack.c.bf16 %v3541_v45, %v3533_v3  ;;  %3564 = vtanh.f32 %v1726_v1  ;;  %2571 = vperm.xlu1 %3039, %v5135_v33  }
 0x318   :  { %v3545_v56 = vpop.eup %3544  ;;  %v1730_v19 = vadd.f32 %v1729_v35, %v5150_v41  ;;  %2216 = vmatprep.subr.bf16.mxu0 %v2127_v38  ;;  %3566 = vtanh.f32 %v1615_v51  ;;  %v1766_v32 = vpop.f32.mrb[96].mxu0 }
 0x319   :  { %v3547_v16 = vpop.eup %3546  ;;  %2289 = vmatprep.subr.bf16.mxu1 %v2129_v7  ;;  %2217 = vmatpush1.bf16.msra.mxu0 %v2126_v44  ;;  %3568 = vtanh.f32 %v1728_v46  ;;  %v1767_v36 = vadd.f32 %v1766_v32, %v5032_v24  ;;  %v1879_v18 = vpop.f32.mrb[96].mxu1 }
 0x31a   :  { %v3549_v40 = vpop.eup %3548  ;;  %2290 = vmatpush1.bf16.msra.mxu1 %v2128_v17  ;;  %3570 = vtanh.f32 %v1617_v12  ;;  %v1768_v47 = vpop.f32.mrb[97].mxu0  ;;  %v1880_v54 = vadd.f32 %v1879_v18, %v5032_v24  ;;  %2579 = vperm.xlu0 %3040, %v5155_v10  }
 0x31b   :  { %v3551_v43 = vpop.eup %3550  ;;  %3572 = vtanh.f32 %v1730_v19  ;;  %v1769_v27 = vadd.f32 %v1768_v47, %v5032_v24  ;;  %v1881_v11 = vpop.f32.mrb[97].mxu1  ;;  %2575 = vperm.xlu1 %3039, %v5147_v4  }
 0x31c   :  { %v3553_v62 = vpop.eup %3552  ;;  %v1770_v3 = vpop.f32.mrb[98].mxu0  ;;  %v2134_v14 = vpack.c.bf16 %v3551_v43, %v3543_v13  ;;  %3574 = vtanh.f32 %v1767_v36  ;;  %v1882_v55 = vadd.f32 %v1881_v11, %v5032_v24 }
 0x31d   :  { %v3555_v28 = vpop.eup %3554  ;;  %v1771_v15 = vadd.f32 %v1770_v3, %v5034_v5  ;;  %v1883_v53 = vpop.f32.mrb[98].mxu1  ;;  %v2136_v21 = vpack.c.bf16 %v3553_v62, %v3545_v56  ;;  %3576 = vtanh.f32 %v1880_v54 }
 0x31e   :  { %v1772_v20 = vpop.f32.mrb[99].mxu0  ;;  %v3557_v52 = vpop.eup %3556  ;;  %v1884_v58 = vadd.f32 %v1883_v53, %v5034_v5  ;;  %v2135_v59 = vpack.c.bf16 %v3555_v28, %v3547_v16  ;;  %3578 = vtanh.f32 %v1769_v27  ;;  %2587 = vperm.xlu0 %3040, %v5174_v60   ;;  %v5213_v27 = vld [vmem:[%s5595_s1 + $0x4] ss:$12 sps:$4 sm:$0xff]   ;;  %v34_v60 = vld [vmem:[%s5594_s2] sm:$0x1] }
 0x31f   :  { %v1885_v50 = vpop.f32.mrb[99].mxu1  ;;  %v3559_v44 = vpop.eup %3558  ;;  %v1773_v23 = vadd.f32 %v1772_v20, %v5034_v5  ;;  %v2137_v1 = vpack.c.bf16 %v3557_v52, %v3549_v40  ;;  %3580 = vtanh.f32 %v1882_v55  ;;  %2583 = vperm.xlu1 %3039, %v5165_v2  }
 0x320   :  { %v3561_v24 = vpop.eup %3560  ;;  %v1886_v51 = vadd.f32 %v1885_v50, %v5034_v5  ;;  %2218 = vmatprep.subr.bf16.mxu0 %v2135_v59  ;;  %3582 = vtanh.f32 %v1771_v15  ;;  %v1776_v57 = vpop.f32.mrb[100].mxu0 }
 0x321   :  { %v3563_v48 = vpop.eup %3562  ;;  %2291 = vmatprep.subr.bf16.mxu1 %v2137_v1  ;;  %2219 = vmatpush1.bf16.msra.mxu0 %v2134_v14  ;;  %3584 = vtanh.f32 %v1884_v58  ;;  %v1777_v45 = vadd.f32 %v1776_v57, %v5036_v22  ;;  %v1889_v33 = vpop.f32.mrb[100].mxu1  ;;  %v3885_v14 = vmov 7  }
 0x322   :  { %v3565_v8 = vpop.eup %3564  ;;  %2292 = vmatpush1.bf16.msra.mxu1 %v2136_v21  ;;  %3586 = vtanh.f32 %v1773_v23  ;;  %v1778_v46 = vpop.f32.mrb[101].mxu0  ;;  %v1890_v35 = vadd.f32 %v1889_v33, %v5036_v22  ;;  %3041 = vset.pattern.permute.xlu0 %v3885_v14 }
 0x323   :  { %v3567_v17 = vpop.eup %3566  ;;  %3588 = vtanh.f32 %v1886_v51  ;;  %v1779_v38 = vadd.f32 %v1778_v46, %v5036_v22  ;;  %v1891_v13 = vpop.f32.mrb[101].mxu1  ;;  %2591 = vperm.xlu1 %3039, %v5182_v37   ;;  %2764 = vperm.xlu0 %3041, %v34_v60  }
 0x324   :  { %v3569_v5 = vpop.eup %3568  ;;  %v1780_v12 = vpop.f32.mrb[102].mxu0  ;;  %v2142_v7 = vpack.c.bf16 %v3567_v17, %v3559_v44  ;;  %3590 = vtanh.f32 %v1777_v45  ;;  %v1892_v10 = vadd.f32 %v1891_v13, %v5036_v22 }
 0x325   :  { %v3571_v56 = vpop.eup %3570  ;;  %v1781_v19 = vadd.f32 %v1780_v12, %v5046_v34  ;;  %v1893_v16 = vpop.f32.mrb[102].mxu1  ;;  %v2144_v32 = vpack.c.bf16 %v3569_v5, %v3561_v24  ;;  %3592 = vtanh.f32 %v1890_v35  ;;  %v5235_v5 = vld [vmem:[%s5595_s1 + $0x1c] ss:$12 sps:$4 sm:$0xff]  }
 0x326   :  { %v1782_v40 = vpop.f32.mrb[103].mxu0  ;;  %v3573_v31 = vpop.eup %3572  ;;  %v1894_v4 = vadd.f32 %v1893_v16, %v5046_v34  ;;  %v2143_v36 = vpack.c.bf16 %v3571_v56, %v3563_v48  ;;  %3594 = vtanh.f32 %v1779_v38 }
 0x327   :  { %v1895_v43 = vpop.f32.mrb[103].mxu1  ;;  %v5205_v18 = vpop.eup %3574  ;;  %v1783_v47 = vadd.f32 %v1782_v40, %v5046_v34  ;;  %v2145_v62 = vpack.c.bf16 %v3573_v31, %v3565_v8  ;;  %3596 = vtanh.f32 %v1892_v10 }
 0x328   :  { %v3577_v22 = vpop.eup %3576  ;;  %v1896_v54 = vadd.f32 %v1895_v43, %v5046_v34  ;;  %2220 = vmatprep.subr.bf16.mxu0 %v2143_v36  ;;  %3598 = vtanh.f32 %v1781_v19  ;;  %v1786_v2 = vpop.f32.mrb[104].mxu0 }
 0x329   :  { %v3579_v11 = vpop.eup %3578  ;;  %2293 = vmatprep.subr.bf16.mxu1 %v2145_v62  ;;  %2221 = vmatpush1.bf16.msra.mxu0 %v2142_v7  ;;  %3600 = vtanh.f32 %v1894_v4  ;;  %v1787_v28 = vadd.f32 %v1786_v2, %v5055_v63  ;;  %v1899_v55 = vpop.f32.mrb[104].mxu1 }
 0x32a   :  { %v3581_v3 = vpop.eup %3580  ;;  %2294 = vmatpush1.bf16.msra.mxu1 %v2144_v32  ;;  %3602 = vtanh.f32 %v1783_v47  ;;  %v1788_v15 = vpop.f32.mrb[105].mxu0  ;;  %v1900_v20 = vadd.f32 %v1899_v55, %v5055_v63 }
 0x32b   :  { %v3583_v34 = vpop.eup %3582  ;;  %3604 = vtanh.f32 %v1896_v54  ;;  %v1789_v21 = vadd.f32 %v1788_v15, %v5055_v63  ;;  %v1901_v52 = vpop.f32.mrb[105].mxu1 }
 0x32c   :  { %v3585_v53 = vpop.eup %3584  ;;  %2239 = vmatmul.mubr.bf16.vlgmr.msra.gmra.mrb[128].mxu0 %v5213_v27  ;;  %v1790_v58 = vpop.f32.mrb[106].mxu0  ;;  %v2090_v50 = vpack.c.bf16 %v3583_v34, %v5205_v18  ;;  %3606 = vtanh.f32 %v1787_v28  ;;  %v1902_v44 = vadd.f32 %v1901_v52, %v5055_v63  ;;  %v5252_v28 = vld [vmem:[%s5595_s1 + $0x34] ss:$12 sps:$4 sm:$0xff]  }
 0x32d   :  { %v3587_v59 = vpop.eup %3586  ;;  %2312 = vmatmul.mubr.bf16.vlgmr.msra.gmra.mrb[128].mxu1 %v5213_v27  ;;  %v1791_v37 = vadd.f32 %v1790_v58, %v5058_v49  ;;  %v1903_v23 = vpop.f32.mrb[106].mxu1  ;;  %v2092_v24 = vpack.c.bf16 %v3585_v53, %v3577_v22  ;;  %2248 = vmatprep.mubr.bf16.mxu0 %v5679_v26  ;;  %3608 = vtanh.f32 %v1900_v20 }
 0x32e   :  { %v1792_v1 = vpop.f32.mrb[107].mxu0  ;;  %v3589_v51 = vpop.eup %3588  ;;  %v1904_v48 = vadd.f32 %v1903_v23, %v5058_v49  ;;  %v2091_v57 = vpack.c.bf16 %v3587_v59, %v3579_v11  ;;  %2321 = vmatprep.mubr.bf16.mxu1 %v5679_v26  ;;  %3610 = vtanh.f32 %v1789_v21 }
 0x32f   :  { %v1905_v8 = vpop.f32.mrb[107].mxu1  ;;  %v3591_v17 = vpop.eup %3590  ;;  %v1793_v45 = vadd.f32 %v1792_v1, %v5058_v49  ;;  %v2093_v63 = vpack.c.bf16 %v3589_v51, %v3581_v3  ;;  %3612 = vtanh.f32 %v1902_v44 }
 0x330   :  { %v3593_v33 = vpop.eup %3592  ;;  %v1906_v46 = vadd.f32 %v1905_v8, %v5058_v49  ;;  %2352 = vmatprep.subr.bf16.mxu0 %v2091_v57  ;;  %3614 = vtanh.f32 %v1791_v37  ;;  %v1796_v13 = vpop.f32.mrb[108].mxu0 }
 0x331   :  { %v3595_v35 = vpop.eup %3594  ;;  %2425 = vmatprep.subr.bf16.mxu1 %v2093_v63  ;;  %2353 = vmatpush1.bf16.msra.mxu0 %v2090_v50  ;;  %3616 = vtanh.f32 %v1904_v48  ;;  %v1797_v7 = vadd.f32 %v1796_v13, %v5067_v61  ;;  %v1909_v56 = vpop.f32.mrb[108].mxu1 }
 0x332   :  { %v3597_v38 = vpop.eup %3596  ;;  %2426 = vmatpush1.bf16.msra.mxu1 %v2092_v24  ;;  %3618 = vtanh.f32 %v1793_v45  ;;  %v1798_v49 = vpop.f32.mrb[109].mxu0  ;;  %v1910_v19 = vadd.f32 %v1909_v56, %v5067_v61 }
 0x333   :  { %v3599_v12 = vpop.eup %3598  ;;  %3620 = vtanh.f32 %v1906_v46  ;;  %v1799_v16 = vadd.f32 %v1798_v49, %v5067_v61  ;;  %v1911_v40 = vpop.f32.mrb[109].mxu1 }
 0x334   :  { %v3601_v10 = vpop.eup %3600  ;;  %2249 = vmatmul.mubr.bf16.gmra.mrb[132].mxu0 %v5235_v5  ;;  %v1800_v32 = vpop.f32.mrb[110].mxu0  ;;  %v2098_v31 = vpack.c.bf16 %v3599_v12, %v3591_v17  ;;  %3622 = vtanh.f32 %v1797_v7  ;;  %v1912_v43 = vadd.f32 %v1911_v40, %v5067_v61  ;;  %v5269_v12 = vld [vmem:[%s5595_s1 + $0x4c] ss:$12 sps:$4 sm:$0xff]  }
 0x335   :  { %v3603_v4 = vpop.eup %3602  ;;  %2322 = vmatmul.mubr.bf16.gmra.mrb[132].mxu1 %v5235_v5  ;;  %v1801_v36 = vadd.f32 %v1800_v32, %v5070_v39  ;;  %v1913_v18 = vpop.f32.mrb[110].mxu1  ;;  %v2100_v62 = vpack.c.bf16 %v3601_v10, %v3593_v33  ;;  %2258 = vmatprep.mubr.bf16.mxu0 %v5679_v26  ;;  %3624 = vtanh.f32 %v1910_v19 }
 0x336   :  { %v1802_v47 = vpop.f32.mrb[111].mxu0  ;;  %v3605_v22 = vpop.eup %3604  ;;  %v1914_v54 = vadd.f32 %v1913_v18, %v5070_v39  ;;  %v2099_v11 = vpack.c.bf16 %v3603_v4, %v3595_v35  ;;  %2331 = vmatprep.mubr.bf16.mxu1 %v5679_v26  ;;  %3626 = vtanh.f32 %v1799_v16 }
 0x337   :  { %v1915_v60 = vpop.f32.mrb[111].mxu1  ;;  %v3607_v3 = vpop.eup %3606  ;;  %v1803_v2 = vadd.f32 %v1802_v47, %v5070_v39  ;;  %v2101_v61 = vpack.c.bf16 %v3605_v22, %v3597_v38  ;;  %3628 = vtanh.f32 %v1912_v43 }
 0x338   :  { %v3609_v14 = vpop.eup %3608  ;;  %v1916_v34 = vadd.f32 %v1915_v60, %v5070_v39  ;;  %2354 = vmatprep.subr.bf16.mxu0 %v2099_v11  ;;  %3630 = vtanh.f32 %v1801_v36  ;;  %v1806_v53 = vpop.f32.mrb[112].mxu0 }
 0x339   :  { %v3611_v55 = vpop.eup %3610  ;;  %2427 = vmatprep.subr.bf16.mxu1 %v2101_v61  ;;  %2355 = vmatpush1.bf16.msra.mxu0 %v2098_v31  ;;  %3632 = vtanh.f32 %v1914_v54  ;;  %v1807_v21 = vadd.f32 %v1806_v53, %v5079_v0  ;;  %v1919_v52 = vpop.f32.mrb[112].mxu1 }
 0x33a   :  { %v3613_v15 = vpop.eup %3612  ;;  %2428 = vmatpush1.bf16.msra.mxu1 %v2100_v62  ;;  %3634 = vtanh.f32 %v1803_v2  ;;  %v1808_v39 = vpop.f32.mrb[113].mxu0  ;;  %v1920_v50 = vadd.f32 %v1919_v52, %v5079_v0 }
 0x33b   :  { %v3615_v20 = vpop.eup %3614  ;;  %3636 = vtanh.f32 %v1916_v34  ;;  %v1809_v59 = vadd.f32 %v1808_v39, %v5079_v0  ;;  %v1921_v44 = vpop.f32.mrb[113].mxu1 }
 0x33c   :  { %v3617_v58 = vpop.eup %3616  ;;  %2259 = vmatmul.mubr.bf16.gmra.mrb[136].mxu0 %v5252_v28  ;;  %v1810_v37 = vpop.f32.mrb[114].mxu0  ;;  %v2106_v23 = vpack.c.bf16 %v3615_v20, %v3607_v3  ;;  %3638 = vtanh.f32 %v1807_v21  ;;  %v1922_v24 = vadd.f32 %v1921_v44, %v5079_v0 }
 0x33d   :  { %v3619_v1 = vpop.eup %3618  ;;  %2332 = vmatmul.mubr.bf16.gmra.mrb[136].mxu1 %v5252_v28  ;;  %v1811_v51 = vadd.f32 %v1810_v37, %v5082_v9  ;;  %v1923_v48 = vpop.f32.mrb[114].mxu1  ;;  %v2108_v57 = vpack.c.bf16 %v3617_v58, %v3609_v14  ;;  %2268 = vmatprep.mubr.bf16.mxu0 %v5679_v26  ;;  %3640 = vtanh.f32 %v1920_v50 }
 0x33e   :  { %v1812_v8 = vpop.f32.mrb[115].mxu0  ;;  %v3621_v17 = vpop.eup %3620  ;;  %v1924_v45 = vadd.f32 %v1923_v48, %v5082_v9  ;;  %v2107_v33 = vpack.c.bf16 %v3619_v1, %v3611_v55  ;;  %2341 = vmatprep.mubr.bf16.mxu1 %v5679_v26  ;;  %3642 = vtanh.f32 %v1809_v59 }
 0x33f   :  { %v1925_v63 = vpop.f32.mrb[115].mxu1  ;;  %v3623_v46 = vpop.eup %3622  ;;  %v1813_v35 = vadd.f32 %v1812_v8, %v5082_v9  ;;  %v2109_v0 = vpack.c.bf16 %v3621_v17, %v3613_v15  ;;  %3644 = vtanh.f32 %v1922_v24 }
 0x340   :  { %v3625_v38 = vpop.eup %3624  ;;  %v1926_v13 = vadd.f32 %v1925_v63, %v5082_v9  ;;  %2356 = vmatprep.subr.bf16.mxu0 %v2107_v33  ;;  %3646 = vtanh.f32 %v1811_v51  ;;  %v1816_v49 = vpop.f32.mrb[116].mxu0 }
 0x341   :  { %v3627_v7 = vpop.eup %3626  ;;  %2429 = vmatprep.subr.bf16.mxu1 %v2109_v0  ;;  %2357 = vmatpush1.bf16.msra.mxu0 %v2106_v23  ;;  %3648 = vtanh.f32 %v1924_v45  ;;  %v1817_v19 = vadd.f32 %v1816_v49, %v5091_v29  ;;  %v1929_v16 = vpop.f32.mrb[116].mxu1 }
 0x342   :  { %v3629_v56 = vpop.eup %3628  ;;  %2430 = vmatpush1.bf16.msra.mxu1 %v2108_v57  ;;  %3650 = vtanh.f32 %v1813_v35  ;;  %v1818_v9 = vpop.f32.mrb[117].mxu0  ;;  %v1930_v32 = vadd.f32 %v1929_v16, %v5091_v29 }
 0x343   :  { %v3631_v10 = vpop.eup %3630  ;;  %3652 = vtanh.f32 %v1926_v13  ;;  %v1819_v31 = vadd.f32 %v1818_v9, %v5091_v29  ;;  %v1931_v4 = vpop.f32.mrb[117].mxu1 }
 0x344   :  { %v3633_v40 = vpop.eup %3632  ;;  %2269 = vmatmul.mubr.bf16.gmra.mrb[140].mxu0 %v5269_v12  ;;  %v1820_v43 = vpop.f32.mrb[118].mxu0  ;;  %v2114_v36 = vpack.c.bf16 %v3631_v10, %v3623_v46  ;;  %3654 = vtanh.f32 %v1817_v19  ;;  %v1932_v47 = vadd.f32 %v1931_v4, %v5091_v29 }
 0x345   :  { %v3635_v18 = vpop.eup %3634  ;;  %2342 = vmatmul.mubr.bf16.gmra.mrb[140].mxu1 %v5269_v12  ;;  %v1821_v62 = vadd.f32 %v1820_v43, %v5094_v6  ;;  %v1933_v22 = vpop.f32.mrb[118].mxu1  ;;  %v2116_v60 = vpack.c.bf16 %v3633_v40, %v3625_v38  ;;  %2384 = vmatprep.mubr.bf16.mxu0 %v5679_v26  ;;  %3656 = vtanh.f32 %v1930_v32 }
 0x346   :  { %v1822_v54 = vpop.f32.mrb[119].mxu0  ;;  %v3637_v11 = vpop.eup %3636  ;;  %v1934_v3 = vadd.f32 %v1933_v22, %v5094_v6  ;;  %v2115_v61 = vpack.c.bf16 %v3635_v18, %v3627_v7  ;;  %2457 = vmatprep.mubr.bf16.mxu1 %v5679_v26  ;;  %3658 = vtanh.f32 %v1819_v31 }
 0x347   :  { %v1935_v2 = vpop.f32.mrb[119].mxu1  ;;  %v3639_v14 = vpop.eup %3638  ;;  %v1823_v34 = vadd.f32 %v1822_v54, %v5094_v6  ;;  %v2117_v29 = vpack.c.bf16 %v3637_v11, %v3629_v56  ;;  %3660 = vtanh.f32 %v1932_v47 }
 0x348   :  { %v3641_v55 = vpop.eup %3640  ;;  %v1936_v15 = vadd.f32 %v1935_v2, %v5094_v6  ;;  %2358 = vmatprep.subr.bf16.mxu0 %v2115_v61  ;;  %3662 = vtanh.f32 %v1821_v62  ;;  %v1826_v21 = vpop.f32.mrb[120].mxu0 }
 0x349   :  { %v3643_v53 = vpop.eup %3642  ;;  %2431 = vmatprep.subr.bf16.mxu1 %v2117_v29  ;;  %2359 = vmatpush1.bf16.msra.mxu0 %v2114_v36  ;;  %3664 = vtanh.f32 %v1934_v3  ;;  %v1827_v39 = vadd.f32 %v1826_v21, %v5107_v30  ;;  %v1939_v58 = vpop.f32.mrb[120].mxu1 }
 0x34a   :  { %v3645_v20 = vpop.eup %3644  ;;  %2432 = vmatpush1.bf16.msra.mxu1 %v2116_v60  ;;  %3666 = vtanh.f32 %v1823_v34  ;;  %v1828_v50 = vpop.f32.mrb[121].mxu0  ;;  %v1940_v44 = vadd.f32 %v1939_v58, %v5107_v30 }
 0x34b   :  { %v3647_v52 = vpop.eup %3646  ;;  %3668 = vtanh.f32 %v1936_v15  ;;  %v1829_v6 = vadd.f32 %v1828_v50, %v5107_v30  ;;  %v1941_v37 = vpop.f32.mrb[121].mxu1 }
 0x34c   :  { %v3649_v59 = vpop.eup %3648  ;;  %v1830_v23 = vpop.f32.mrb[122].mxu0  ;;  %v2122_v1 = vpack.c.bf16 %v3647_v52, %v3639_v14  ;;  %3670 = vtanh.f32 %v1827_v39  ;;  %v1942_v51 = vadd.f32 %v1941_v37, %v5107_v30 }
 0x34d   :  { %v3651_v24 = vpop.eup %3650  ;;  %v1831_v48 = vadd.f32 %v1830_v23, %v5110_v42  ;;  %v1943_v8 = vpop.f32.mrb[122].mxu1  ;;  %v2124_v17 = vpack.c.bf16 %v3649_v59, %v3641_v55  ;;  %3672 = vtanh.f32 %v1940_v44 }
 0x34e   :  { %v1832_v57 = vpop.f32.mrb[123].mxu0  ;;  %v3653_v45 = vpop.eup %3652  ;;  %v1944_v63 = vadd.f32 %v1943_v8, %v5110_v42  ;;  %v2123_v46 = vpack.c.bf16 %v3651_v24, %v3643_v53  ;;  %3674 = vtanh.f32 %v1829_v6 }
 0x34f   :  { %v1945_v33 = vpop.f32.mrb[123].mxu1  ;;  %v3655_v35 = vpop.eup %3654  ;;  %v1833_v0 = vadd.f32 %v1832_v57, %v5110_v42  ;;  %v2125_v38 = vpack.c.bf16 %v3653_v45, %v3645_v20  ;;  %3676 = vtanh.f32 %v1942_v51 }
 0x350   :  { %v3657_v13 = vpop.eup %3656  ;;  %v1946_v30 = vadd.f32 %v1945_v33, %v5110_v42  ;;  %2360 = vmatprep.subr.bf16.mxu0 %v2123_v46  ;;  %3678 = vtanh.f32 %v1831_v48  ;;  %v1836_v49 = vpop.f32.mrb[124].mxu0 }
 0x351   :  { %v3659_v7 = vpop.eup %3658  ;;  %2433 = vmatprep.subr.bf16.mxu1 %v2125_v38  ;;  %2361 = vmatpush1.bf16.msra.mxu0 %v2122_v1  ;;  %3680 = vtanh.f32 %v1944_v63  ;;  %v1837_v19 = vadd.f32 %v1836_v49, %v5141_v25  ;;  %v1949_v16 = vpop.f32.mrb[124].mxu1 }
 0x352   :  { %v3661_v56 = vpop.eup %3660  ;;  %2434 = vmatpush1.bf16.msra.mxu1 %v2124_v17  ;;  %3682 = vtanh.f32 %v1833_v0  ;;  %v1838_v9 = vpop.f32.mrb[125].mxu0  ;;  %v1950_v32 = vadd.f32 %v1949_v16, %v5141_v25 }
 0x353   :  { %v3663_v10 = vpop.eup %3662  ;;  %3684 = vtanh.f32 %v1946_v30  ;;  %v1839_v42 = vadd.f32 %v1838_v9, %v5141_v25  ;;  %v1951_v31 = vpop.f32.mrb[125].mxu1 }
 0x354   :  { %v3665_v40 = vpop.eup %3664  ;;  %v1840_v4 = vpop.f32.mrb[126].mxu0  ;;  %v2130_v43 = vpack.c.bf16 %v3663_v10, %v3655_v35  ;;  %3686 = vtanh.f32 %v1837_v19  ;;  %v1952_v18 = vadd.f32 %v1951_v31, %v5141_v25 }
 0x355   :  { %v3667_v36 = vpop.eup %3666  ;;  %v1841_v47 = vadd.f32 %v1840_v4, %v5150_v41  ;;  %v1953_v62 = vpop.f32.mrb[126].mxu1  ;;  %v2132_v54 = vpack.c.bf16 %v3665_v40, %v3657_v13  ;;  %3688 = vtanh.f32 %v1950_v32 }
 0x356   :  { %v1842_v22 = vpop.f32.mrb[127].mxu0  ;;  %v3669_v60 = vpop.eup %3668  ;;  %v1954_v11 = vadd.f32 %v1953_v62, %v5150_v41  ;;  %v2131_v2 = vpack.c.bf16 %v3667_v36, %v3659_v7  ;;  %3690 = vtanh.f32 %v1839_v42 }
 0x357   :  { %v1955_v3 = vpop.f32.mrb[127].mxu1  ;;  %v3671_v61 = vpop.eup %3670  ;;  %v1843_v14 = vadd.f32 %v1842_v22, %v5150_v41  ;;  %v2133_v34 = vpack.c.bf16 %v3669_v60, %v3661_v56  ;;  %3692 = vtanh.f32 %v1952_v18 }
 0x358   :  { %v3673_v29 = vpop.eup %3672  ;;  %v1956_v25 = vadd.f32 %v1955_v3, %v5150_v41  ;;  %2362 = vmatprep.subr.bf16.mxu0 %v2131_v2  ;;  %3694 = vtanh.f32 %v1841_v47 }
 0x359   :  { %v3675_v55 = vpop.eup %3674  ;;  %2435 = vmatprep.subr.bf16.mxu1 %v2133_v34  ;;  %2363 = vmatpush1.bf16.msra.mxu0 %v2130_v43  ;;  %3696 = vtanh.f32 %v1954_v11 }
 0x35a   :  { %v3677_v15 = vpop.eup %3676  ;;  %2436 = vmatpush1.bf16.msra.mxu1 %v2132_v54  ;;  %3698 = vtanh.f32 %v1843_v14 }
 0x35b   :  { %v3679_v53 = vpop.eup %3678  ;;  %3700 = vtanh.f32 %v1956_v25 }
 0x35c   :  { %v3681_v20 = vpop.eup %3680  ;;  %v2138_v21 = vpack.c.bf16 %v3679_v53, %v3671_v61 }
 0x35d   :  { %v3683_v52 = vpop.eup %3682  ;;  %v2140_v39 = vpack.c.bf16 %v3681_v20, %v3673_v29 }
 0x35e   :  { %v3685_v58 = vpop.eup %3684  ;;  %v2139_v50 = vpack.c.bf16 %v3683_v52, %v3675_v55 }
 0x35f   :  { %v3687_v59 = vpop.eup %3686  ;;  %v2141_v44 = vpack.c.bf16 %v3685_v58, %v3677_v15 }
 0x360   :  { %v3689_v41 = vpop.eup %3688  ;;  %2364 = vmatprep.subr.bf16.mxu0 %v2139_v50 }
 0x361   :  { %v3691_v6 = vpop.eup %3690  ;;  %2437 = vmatprep.subr.bf16.mxu1 %v2141_v44  ;;  %2365 = vmatpush1.bf16.msra.mxu0 %v2138_v21 }
 0x362   :  { %v3693_v37 = vpop.eup %3692  ;;  %2438 = vmatpush1.bf16.msra.mxu1 %v2140_v39 }
 0x363   :  { %v3695_v23 = vpop.eup %3694 }
 0x364   :  { %v3697_v1 = vpop.eup %3696  ;;  %v2146_v24 = vpack.c.bf16 %v3695_v23, %v3687_v59 }
 0x365   :  { %v3699_v51 = vpop.eup %3698  ;;  %v2148_v48 = vpack.c.bf16 %v3697_v1, %v3689_v41 }
 0x366   :  { %v3701_v8 = vpop.eup %3700  ;;  %v2147_v57 = vpack.c.bf16 %v3699_v51, %v3691_v6 }
 0x367   :  { %v2149_v17 = vpack.c.bf16 %v3701_v8, %v3693_v37 }
 0x368   :  { %2366 = vmatprep.subr.bf16.mxu0 %v2147_v57 }
 0x369   :  { %2439 = vmatprep.subr.bf16.mxu1 %v2149_v17  ;;  %2367 = vmatpush1.bf16.msra.mxu0 %v2146_v24 }
 0x36a   :  { %2440 = vmatpush1.bf16.msra.mxu1 %v2148_v48 }
 0x36c   :  { %2385 = vmatmul.mubr.bf16.vlgmr.msra.gmra.mrb[144].mxu0 %v5213_v27 }
 0x36d   :  { %2458 = vmatmul.mubr.bf16.vlgmr.msra.gmra.mrb[144].mxu1 %v5213_v27  ;;  %2394 = vmatprep.mubr.bf16.mxu0 %v5679_v26 }
 0x36e   :  { %2467 = vmatprep.mubr.bf16.mxu1 %v5679_v26 }
 0x374   :  { %2395 = vmatmul.mubr.bf16.gmra.mrb[148].mxu0 %v5235_v5 }
 0x375   :  { %2468 = vmatmul.mubr.bf16.gmra.mrb[148].mxu1 %v5235_v5  ;;  %2404 = vmatprep.mubr.bf16.mxu0 %v5679_v26 }
 0x376   :  { %2477 = vmatprep.mubr.bf16.mxu1 %v5679_v26 }
 0x37a   :  { %v5313_v27 = vpop.permute.xlu1 %2155 }
 0x37c   :  { %2405 = vmatmul.mubr.bf16.gmra.mrb[152].mxu0 %v5252_v28 }
 0x37d   :  { %2478 = vmatmul.mubr.bf16.gmra.mrb[152].mxu1 %v5252_v28  ;;  %2414 = vmatprep.mubr.bf16.mxu0 %v5679_v26 }
 0x37e   :  { %2487 = vmatprep.mubr.bf16.mxu1 %v5679_v26  ;;  %v5315_v45 = vpop.permute.xlu0 %2151 }
 0x381   :  { %v5317_v5 = vpop.permute.xlu1 %2159 }
 0x384   :  { %2415 = vmatmul.mubr.bf16.gmra.mrb[156].mxu0 %v5269_v12 }
 0x385   :  { %2488 = vmatmul.mubr.bf16.gmra.mrb[156].mxu1 %v5269_v12  ;;  %v5321_v33 = vpop.permute.xlu1 %2167 }
 0x387   :  { %v5319_v63 = vpop.permute.xlu0 %2163 }
 0x38b   :  { %v5323_v46 = vpop.permute.xlu0 %2171 }
 0x38c   :  { %v5325_v35 = vpop.permute.xlu1 %2175 }
 0x390   :  { %v5335_v42 = vpop.permute.xlu0 %2179 }
 0x392   :  { %v5337_v4 = vpop.permute.xlu1 %2563 }
 0x395   :  { %v5347_v53 = vpop.permute.xlu0 %2567 }
 0x396   :  { %v5351_v58 = vpop.permute.xlu1 %2571 }
 0x3ff   :  { %v2240_v28 = vpop.f32.mrb[128].mxu0 }
 0x400   :  { %v2241_v26 = vadd.f32 %v2240_v28, %v5315_v45  ;;  %v2313_v0 = vpop.f32.mrb[128].mxu1  ;;  %v2242_v38 = vpop.f32.mrb[129].mxu0 }
 0x401   :  { %v2314_v12 = vadd.f32 %v2313_v0, %v5315_v45  ;;  %v2243_v13 = vadd.f32 %v2242_v38, %v5315_v45  ;;  %v2315_v30 = vpop.f32.mrb[129].mxu1  ;;  %v2244_v7 = vpop.f32.mrb[130].mxu0 }
 0x402   :  { %3702 = vtanh.f32 %v2241_v26  ;;  %v2316_v56 = vadd.f32 %v2315_v30, %v5315_v45  ;;  %v2245_v49 = vadd.f32 %v2244_v7, %v5313_v27  ;;  %v2317_v10 = vpop.f32.mrb[130].mxu1  ;;  %v2246_v19 = vpop.f32.mrb[131].mxu0 }
 0x403   :  { %3704 = vtanh.f32 %v2314_v12  ;;  %v2318_v16 = vadd.f32 %v2317_v10, %v5313_v27  ;;  %v2319_v9 = vpop.f32.mrb[131].mxu1  ;;  %v2247_v40 = vadd.f32 %v2246_v19, %v5313_v27 }
 0x404   :  { %3706 = vtanh.f32 %v2243_v13  ;;  %v2320_v32 = vadd.f32 %v2319_v9, %v5313_v27 }
 0x405   :  { %3708 = vtanh.f32 %v2316_v56 }
 0x406   :  { %3710 = vtanh.f32 %v2245_v49 }
 0x407   :  { %3712 = vtanh.f32 %v2318_v16  ;;  %v2250_v31 = vpop.f32.mrb[132].mxu0 }
 0x408   :  { %3714 = vtanh.f32 %v2247_v40  ;;  %v2251_v43 = vadd.f32 %v2250_v31, %v5317_v5  ;;  %v2323_v36 = vpop.f32.mrb[132].mxu1  ;;  %v2252_v18 = vpop.f32.mrb[133].mxu0 }
 0x409   :  { %3716 = vtanh.f32 %v2320_v32  ;;  %v2324_v47 = vadd.f32 %v2323_v36, %v5317_v5  ;;  %v2253_v62 = vadd.f32 %v2252_v18, %v5317_v5  ;;  %v2325_v22 = vpop.f32.mrb[133].mxu1  ;;  %v2254_v54 = vpop.f32.mrb[134].mxu0 }
 0x40a   :  { %3718 = vtanh.f32 %v2251_v43  ;;  %v2326_v60 = vadd.f32 %v2325_v22, %v5317_v5  ;;  %v2255_v11 = vadd.f32 %v2254_v54, %v5319_v63  ;;  %v2327_v3 = vpop.f32.mrb[134].mxu1  ;;  %v2256_v2 = vpop.f32.mrb[135].mxu0 }
 0x40b   :  { %3720 = vtanh.f32 %v2324_v47  ;;  %v2328_v61 = vadd.f32 %v2327_v3, %v5319_v63  ;;  %v2329_v14 = vpop.f32.mrb[135].mxu1  ;;  %v2257_v29 = vadd.f32 %v2256_v2, %v5319_v63  ;;  %v5369_v47 = vpop.permute.xlu1 %2575 }
 0x40c   :  { %v3703_v34 = vpop.eup %3702  ;;  %3722 = vtanh.f32 %v2253_v62  ;;  %v2330_v55 = vadd.f32 %v2329_v14, %v5319_v63 }
 0x40d   :  { %v3705_v25 = vpop.eup %3704  ;;  %3724 = vtanh.f32 %v2326_v60  ;;  %v2594_v52 = vmul.f32 %v3703_v34, %v5337_v4 }
 0x40e   :  { %v3707_v15 = vpop.eup %3706  ;;  %3726 = vtanh.f32 %v2255_v11  ;;  %v2596_v39 = vmul.f32 %v3705_v25, %v5337_v4 }
 0x40f   :  { %v3709_v20 = vpop.eup %3708  ;;  %3728 = vtanh.f32 %v2328_v61  ;;  %v2260_v21 = vpop.f32.mrb[136].mxu0  ;;  %v2595_v6 = vmul.f32 %v3707_v15, %v5337_v4 }
 0x410   :  { %v3711_v50 = vpop.eup %3710  ;;  %3730 = vtanh.f32 %v2257_v29  ;;  %v2261_v59 = vadd.f32 %v2260_v21, %v5321_v33  ;;  %v2333_v44 = vpop.f32.mrb[136].mxu1  ;;  %v2597_v37 = vmul.f32 %v3709_v20, %v5337_v4 }
 0x411   :  { %v2262_v41 = vpop.f32.mrb[137].mxu0  ;;  %v3713_v23 = vpop.eup %3712  ;;  %3732 = vtanh.f32 %v2330_v55  ;;  %v2334_v1 = vadd.f32 %v2333_v44, %v5321_v33  ;;  %v2602_v8 = vmul.f32 %v3711_v50, %v5347_v53 }
 0x412   :  { %v2263_v24 = vadd.f32 %v2262_v41, %v5321_v33  ;;  %v2335_v51 = vpop.f32.mrb[137].mxu1  ;;  %v2264_v48 = vpop.f32.mrb[138].mxu0  ;;  %3734 = vtanh.f32 %v2261_v59  ;;  %v2604_v38 = vmul.f32 %v3713_v23, %v5347_v53 }
 0x413   :  { %v3715_v57 = vpop.eup %3714  ;;  %v2336_v17 = vadd.f32 %v2335_v51, %v5321_v33  ;;  %v2265_v28 = vadd.f32 %v2264_v48, %v5323_v46  ;;  %v2337_v26 = vpop.f32.mrb[138].mxu1  ;;  %3736 = vtanh.f32 %v2334_v1  ;;  %v2658_v16 = vadd.f32 %v2602_v8, %v2594_v52 }
 0x414   :  { %v2266_v0 = vpop.f32.mrb[139].mxu0  ;;  %v3717_v12 = vpop.eup %3716  ;;  %v2338_v13 = vadd.f32 %v2337_v26, %v5323_v46  ;;  %v2603_v56 = vmul.f32 %v3715_v57, %v5347_v53  ;;  %3738 = vtanh.f32 %v2263_v24  ;;  %v2684_v31 = vadd.f32 %v2604_v38, %v2596_v39 }
 0x415   :  { %v2267_v30 = vadd.f32 %v2266_v0, %v5323_v46  ;;  %v2339_v7 = vpop.f32.mrb[139].mxu1  ;;  %v3719_v49 = vpop.eup %3718  ;;  %v2605_v19 = vmul.f32 %v3717_v12, %v5347_v53  ;;  %3740 = vtanh.f32 %v2336_v17 }
 0x416   :  { %v2340_v10 = vadd.f32 %v2339_v7, %v5323_v46  ;;  %v3721_v9 = vpop.eup %3720  ;;  %v2610_v40 = vmul.f32 %v3719_v49, %v5351_v58  ;;  %v2671_v32 = vadd.f32 %v2603_v56, %v2595_v6  ;;  %3742 = vtanh.f32 %v2265_v28  ;;  %v5383_v51 = vpop.permute.xlu0 %2579 }
 0x417   :  { %v3723_v43 = vpop.eup %3722  ;;  %v2612_v36 = vmul.f32 %v3721_v9, %v5351_v58  ;;  %v2697_v18 = vadd.f32 %v2605_v19, %v2597_v37  ;;  %3744 = vtanh.f32 %v2338_v13  ;;  %v2270_v22 = vpop.f32.mrb[140].mxu0 }
 0x418   :  { %v3725_v62 = vpop.eup %3724  ;;  %v2611_v54 = vmul.f32 %v3723_v43, %v5351_v58  ;;  %v2659_v60 = vadd.f32 %v2658_v16, %v2610_v40  ;;  %3746 = vtanh.f32 %v2267_v30  ;;  %v2271_v3 = vadd.f32 %v2270_v22, %v5325_v35  ;;  %v2343_v2 = vpop.f32.mrb[140].mxu1 }
 0x419   :  { %v3727_v11 = vpop.eup %3726  ;;  %v2272_v61 = vpop.f32.mrb[141].mxu0  ;;  %v2613_v14 = vmul.f32 %v3725_v62, %v5351_v58  ;;  %v2685_v34 = vadd.f32 %v2684_v31, %v2612_v36  ;;  %3748 = vtanh.f32 %v2340_v10  ;;  %v2344_v25 = vadd.f32 %v2343_v2, %v5325_v35 }
 0x41a   :  { %v3729_v29 = vpop.eup %3728  ;;  %v2273_v55 = vadd.f32 %v2272_v61, %v5325_v35  ;;  %v2345_v15 = vpop.f32.mrb[141].mxu1  ;;  %v2618_v21 = vmul.f32 %v3727_v11, %v5369_v47  ;;  %3750 = vtanh.f32 %v2271_v3  ;;  %v2672_v26 = vadd.f32 %v2671_v32, %v2611_v54 }
 0x41b   :  { %v2274_v20 = vpop.f32.mrb[142].mxu0  ;;  %v3731_v52 = vpop.eup %3730  ;;  %v2346_v39 = vadd.f32 %v2345_v15, %v5325_v35  ;;  %v2620_v41 = vmul.f32 %v3729_v29, %v5369_v47  ;;  %3752 = vtanh.f32 %v2344_v25  ;;  %v2698_v38 = vadd.f32 %v2697_v18, %v2613_v14 }
 0x41c   :  { %v2275_v50 = vadd.f32 %v2274_v20, %v5335_v42  ;;  %v2347_v59 = vpop.f32.mrb[142].mxu1  ;;  %v2276_v44 = vpop.f32.mrb[143].mxu0  ;;  %v2619_v24 = vmul.f32 %v3731_v52, %v5369_v47  ;;  %3754 = vtanh.f32 %v2273_v55  ;;  %v2660_v17 = vadd.f32 %v2659_v60, %v2618_v21 }
 0x41d   :  { %v3733_v6 = vpop.eup %3732  ;;  %v2348_v37 = vadd.f32 %v2347_v59, %v5335_v42  ;;  %v2277_v23 = vadd.f32 %v2276_v44, %v5335_v42  ;;  %v2349_v1 = vpop.f32.mrb[143].mxu1  ;;  %3756 = vtanh.f32 %v2346_v39  ;;  %v2686_v0 = vadd.f32 %v2685_v34, %v2620_v41 }
 0x41e   :  { %v3735_v48 = vpop.eup %3734  ;;  %v2350_v8 = vadd.f32 %v2349_v1, %v5335_v42  ;;  %v2621_v57 = vmul.f32 %v3733_v6, %v5369_v47  ;;  %3758 = vtanh.f32 %v2275_v50  ;;  %v5389_v7 = vpop.permute.xlu1 %2583  ;;  %v2673_v49 = vadd.f32 %v2672_v26, %v2619_v24 }
 0x41f   :  { %v3737_v28 = vpop.eup %3736  ;;  %v2626_v13 = vmul.f32 %v3735_v48, %v5383_v51  ;;  %3760 = vtanh.f32 %v2348_v37  ;;  %v5395_v54 = vpop.permute.xlu0 %2587 }
 0x420   :  { %v3739_v12 = vpop.eup %3738  ;;  %v2628_v30 = vmul.f32 %v3737_v28, %v5383_v51  ;;  %v2699_v10 = vadd.f32 %v2698_v38, %v2621_v57  ;;  %3762 = vtanh.f32 %v2277_v23 }
 0x421   :  { %v3741_v56 = vpop.eup %3740  ;;  %v2627_v19 = vmul.f32 %v3739_v12, %v5383_v51  ;;  %v2661_v40 = vadd.f32 %v2660_v17, %v2626_v13  ;;  %3764 = vtanh.f32 %v2350_v8 }
 0x422   :  { %v3743_v16 = vpop.eup %3742  ;;  %v2629_v9 = vmul.f32 %v3741_v56, %v5383_v51  ;;  %v2687_v32 = vadd.f32 %v2686_v0, %v2628_v30  ;;  %v5401_v20 = vpop.permute.xlu1 %2591 }
 0x423   :  { %v3745_v31 = vpop.eup %3744  ;;  %v2674_v43 = vadd.f32 %v2673_v49, %v2627_v19  ;;  %v2634_v36 = vmul.f32 %v3743_v16, %v5389_v7 }
 0x424   :  { %v3747_v18 = vpop.eup %3746  ;;  %v2700_v62 = vadd.f32 %v2699_v10, %v2629_v9  ;;  %v2636_v22 = vmul.f32 %v3745_v31, %v5389_v7 }
 0x425   :  { %v3749_v60 = vpop.eup %3748  ;;  %v2635_v11 = vmul.f32 %v3747_v18, %v5389_v7  ;;  %v2662_v3 = vadd.f32 %v2661_v40, %v2634_v36 }
 0x426   :  { %v3751_v2 = vpop.eup %3750  ;;  %v2637_v61 = vmul.f32 %v3749_v60, %v5389_v7  ;;  %v2688_v14 = vadd.f32 %v2687_v32, %v2636_v22  ;;  %v5409_v22 = vpop.permute.xlu0 %2764 }
 0x427   :  { %v3753_v34 = vpop.eup %3752  ;;  %v2642_v29 = vmul.f32 %v3751_v2, %v5395_v54  ;;  %v2675_v25 = vadd.f32 %v2674_v43, %v2635_v11 }
 0x428   :  { %v3755_v55 = vpop.eup %3754  ;;  %v2644_v15 = vmul.f32 %v3753_v34, %v5395_v54  ;;  %v2701_v21 = vadd.f32 %v2700_v62, %v2637_v61 }
 0x429   :  { %v3757_v52 = vpop.eup %3756  ;;  %v2643_v39 = vmul.f32 %v3755_v55, %v5395_v54  ;;  %v2663_v50 = vadd.f32 %v2662_v3, %v2642_v29 }
 0x42a   :  { %v3759_v59 = vpop.eup %3758  ;;  %v2645_v44 = vmul.f32 %v3757_v52, %v5395_v54  ;;  %v2689_v41 = vadd.f32 %v2688_v14, %v2644_v15 }
 0x42b   :  { %v3761_v6 = vpop.eup %3760  ;;  %v2650_v37 = vmul.f32 %v3759_v59, %v5401_v20  ;;  %v2676_v23 = vadd.f32 %v2675_v25, %v2643_v39 }
 0x42c   :  { %v3763_v1 = vpop.eup %3762  ;;  %v2652_v24 = vmul.f32 %v3761_v6, %v5401_v20  ;;  %v2702_v48 = vadd.f32 %v2701_v21, %v2645_v44 }
 0x42d   :  { %v3765_v8 = vpop.eup %3764  ;;  %v2651_v57 = vmul.f32 %v3763_v1, %v5401_v20  ;;  %v2664_v17 = vadd.f32 %v2663_v50, %v2650_v37  ;;  %v3886_v1 = vmov 1966171168  }
 0x42e   :  { %v2653_v28 = vmul.f32 %v3765_v8, %v5401_v20  ;;  %v2690_v26 = vadd.f32 %v2689_v41, %v2652_v24  ;;  %v2908_v24 = vunpack.c.l.s4 %v3886_v1 }
 0x42f   :  { %v2665_v0 = vrot.slane %v2664_v17, 4  ;;  %v2677_v38 = vadd.f32 %v2676_v23, %v2651_v57 }
 0x430   :  { %v2691_v12 = vrot.slane %v2690_v26, 4  ;;  %v2703_v13 = vadd.f32 %v2702_v48, %v2653_v28 }
 0x431   :  { %v2666_v30 = vadd.f32 %v2665_v0, %v2664_v17  ;;  %v2678_v56 = vrot.slane %v2677_v38, 4 }
 0x432   :  { %v2692_v49 = vadd.f32 %v2691_v12, %v2690_v26  ;;  %v2704_v10 = vrot.slane %v2703_v13, 4 }
 0x433   :  { %v2679_v19 = vadd.f32 %v2678_v56, %v2677_v38  ;;  %v2667_v16 = vrot.slane %v2666_v30, 2 }
 0x434   :  { %v2705_v9 = vadd.f32 %v2704_v10, %v2703_v13  ;;  %v2693_v40 = vrot.slane %v2692_v49, 2 }
 0x435   :  { %v2668_v32 = vadd.f32 %v2667_v16, %v2666_v30  ;;  %v2680_v31 = vrot.slane %v2679_v19, 2 }
 0x436   :  { %v2694_v43 = vadd.f32 %v2693_v40, %v2692_v49  ;;  %v2706_v36 = vrot.slane %v2705_v9, 2 }
 0x437   :  { %v2669_v18 = vrot.slane %v2668_v32, 1  ;;  %v2681_v62 = vadd.f32 %v2680_v31, %v2679_v19  ;;  %v2909_v19 = vunpack.c.0.s8 %v2908_v24 }
 0x438   :  { %v2695_v60 = vrot.slane %v2694_v43, 1  ;;  %v2707_v11 = vadd.f32 %v2706_v36, %v2705_v9 }
 0x439   :  { %v2670_v3 = vadd.f32 %v2669_v18, %v2668_v32  ;;  %v2682_v2 = vrot.slane %v2681_v62, 1 }
 0x43a   :  { %v2696_v61 = vadd.f32 %v2695_v60, %v2694_v43  ;;  %v2708_v14 = vrot.slane %v2707_v11, 1  ;;  %v5680_v43 = vld [vmem:[#allocation2_spill] sm:$0xff] }
 0x43b   :  { %v2683_v34 = vadd.f32 %v2682_v2, %v2681_v62  ;;  %v5412_v29 = vadd.f32 %v5409_v22, %v2670_v3  ;;  %v5435_v36 = vsub.s32 %v2909_v19, %v5680_v43 }
 0x43c   :  { %v2709_v25 = vadd.f32 %v2708_v14, %v2707_v11  ;;  %v5415_v55 = vadd.f32 %v5409_v22, %v2696_v61 }
 0x43d   :  { %v5418_v15 = vadd.f32 %v5409_v22, %v2683_v34  ;;  %v2783_v21 = vand.u32 2147483647, %v5412_v29  ;;  %v2775_v18 = vmax.f32 %v5412_v29, 0.0 }
 0x43e   :  { %v5422_v52 = vadd.f32 %v5409_v22, %v2709_v25  ;;  %v2785_v39 = vand.u32 2147483647, %v5415_v55  ;;  %v2777_v3 = vmax.f32 %v5415_v55, 0.0 }
 0x43f   :  { %v2784_v50 = vand.u32 2147483647, %v5418_v15  ;;  %v2791_v59 = vsub.f32 0.0, %v2783_v21  ;;  %v2386_v23 = vpop.f32.mrb[144].mxu0  ;;  %v2776_v11 = vmax.f32 %v5418_v15, 0.0 }
 0x440   :  { %v2786_v44 = vand.u32 2147483647, %v5422_v52  ;;  %v2793_v41 = vsub.f32 0.0, %v2785_v39  ;;  %v2459_v57 = vpop.f32.mrb[144].mxu1  ;;  %v2388_v17 = vpop.f32.mrb[145].mxu0  ;;  %v2387_v26 = vadd.f32 %v2386_v23, %v5315_v45  ;;  %v2778_v34 = vmax.f32 %v5422_v52, 0.0 }
 0x441   :  { %v2792_v6 = vsub.f32 0.0, %v2784_v50  ;;  %v2799_v37 = vmul.f32 1.442695, %v2791_v59  ;;  %v2461_v0 = vpop.f32.mrb[145].mxu1  ;;  %v2390_v38 = vpop.f32.mrb[146].mxu0  ;;  %v2460_v13 = vadd.f32 %v2459_v57, %v5315_v45  ;;  %v2389_v49 = vadd.f32 %v2388_v17, %v5315_v45 }
 0x442   :  { %v2794_v48 = vsub.f32 0.0, %v2786_v44  ;;  %v2803_v8 = vmul.f32 1.442695, %v2793_v41  ;;  %v2463_v30 = vpop.f32.mrb[146].mxu1  ;;  %v2392_v56 = vpop.f32.mrb[147].mxu0  ;;  %v2462_v16 = vadd.f32 %v2461_v0, %v5315_v45  ;;  %v2391_v9 = vadd.f32 %v2390_v38, %v5313_v27 }
 0x443   :  { %3766 = vpow2.f32 %v2799_v37  ;;  %v2801_v28 = vmul.f32 1.442695, %v2792_v6  ;;  %v2465_v10 = vpop.f32.mrb[147].mxu1  ;;  %v2464_v40 = vadd.f32 %v2463_v30, %v5313_v27  ;;  %v2393_v32 = vadd.f32 %v2392_v56, %v5313_v27 }
 0x444   :  { %3768 = vpow2.f32 %v2803_v8  ;;  %v2805_v12 = vmul.f32 1.442695, %v2794_v48  ;;  %v2466_v62 = vadd.f32 %v2465_v10, %v5313_v27 }
 0x445   :  { %3770 = vpow2.f32 %v2801_v28 }
 0x446   :  { %3772 = vpow2.f32 %v2805_v12 }
 0x447   :  { %3774 = vtanh.f32 %v2387_v26  ;;  %v2396_v31 = vpop.f32.mrb[148].mxu0 }
 0x448   :  { %3776 = vtanh.f32 %v2460_v13  ;;  %v2469_v60 = vpop.f32.mrb[148].mxu1  ;;  %v2398_v45 = vpop.f32.mrb[149].mxu0  ;;  %v2397_v2 = vadd.f32 %v2396_v31, %v5317_v5 }
 0x449   :  { %3778 = vtanh.f32 %v2389_v49  ;;  %v2471_v61 = vpop.f32.mrb[149].mxu1  ;;  %v2400_v14 = vpop.f32.mrb[150].mxu0  ;;  %v2470_v25 = vadd.f32 %v2469_v60, %v5317_v5  ;;  %v5445_v21 = vadd.f32 %v2398_v45, %v5317_v5 }
 0x44a   :  { %3780 = vtanh.f32 %v2462_v16  ;;  %v2473_v27 = vpop.f32.mrb[150].mxu1  ;;  %v2402_v39 = vpop.f32.mrb[151].mxu0  ;;  %v5448_v59 = vadd.f32 %v2471_v61, %v5317_v5  ;;  %v5451_v44 = vadd.f32 %v2400_v14, %v5319_v63 }
 0x44b   :  { %3782 = vtanh.f32 %v2391_v9  ;;  %v5454_v41 = vadd.f32 %v2473_v27, %v5319_v63  ;;  %v2475_v6 = vpop.f32.mrb[151].mxu1  ;;  %v5457_v0 = vadd.f32 %v2402_v39, %v5319_v63 }
 0x44c   :  { %3784 = vtanh.f32 %v2464_v40 }
 0x44d   :  { %v3767_v50 = vpop.eup %3766  ;;  %3786 = vtanh.f32 %v2393_v32 }
 0x44e   :  { %v3769_v37 = vpop.eup %3768  ;;  %v2815_v23 = vadd.f32 1.0, %v3767_v50  ;;  %v2818_v1 = vmul.f32 -0.5, %v3767_v50  ;;  %v2821_v24 = vand.u32 2147483647, %v3767_v50  ;;  %3788 = vtanh.f32 %v2466_v62 }
 0x44f   :  { %v3771_v48 = vpop.eup %3770  ;;  %v2833_v8 = vadd.f32 1.0, %v3769_v37  ;;  %v2836_v57 = vmul.f32 -0.5, %v3769_v37  ;;  %v2839_v17 = vand.u32 2147483647, %v3769_v37  ;;  %3790 = vtanh.f32 %v2397_v2  ;;  %v2406_v56 = vpop.f32.mrb[152].mxu0 }
 0x450   :  { %v3773_v28 = vpop.eup %3772  ;;  %3792 = vlog2.f32 %v2815_v23  ;;  %v2819_v5 = vadd.f32 1.0, %v2818_v1  ;;  %v2824_v26 = vadd.f32 1.0, %v3771_v48  ;;  %v2827_v12 = vmul.f32 -0.5, %v3771_v48  ;;  %v2479_v9 = vpop.f32.mrb[152].mxu1 }
 0x451   :  { %v3775_v38 = vpop.eup %3774  ;;  %v2830_v13 = vand.u32 2147483647, %v3771_v48  ;;  %3794 = vlog2.f32 %v2833_v8  ;;  %v2837_v30 = vadd.f32 1.0, %v2836_v57  ;;  %vm5461_vm1 = vcmp.lt.f32.partialorder %v2821_v24, 0.0004427343  ;;  %v2408_v40 = vpop.f32.mrb[153].mxu0 }
 0x452   :  { %v3777_v49 = vpop.eup %3776  ;;  %v5459_v10 = vmul.f32 %v3767_v50, %v2819_v5  ;;  %3796 = vlog2.f32 %v2824_v26  ;;  %v2842_v16 = vadd.f32 1.0, %v3773_v28  ;;  %v2828_v31 = vadd.f32 1.0, %v2827_v12  ;;  %v2481_v45 = vpop.f32.mrb[153].mxu1 }
 0x453   :  { %v3779_v32 = vpop.eup %3778  ;;  %v5465_v43 = vmul.f32 %v3769_v37, %v2837_v30  ;;  %vm5467_vm2 = vcmp.lt.f32.partialorder %v2839_v17, 0.0004427343  ;;  %v2845_v60 = vmul.f32 -0.5, %v3773_v28  ;;  %v2410_v2 = vpop.f32.mrb[154].mxu0  ;;  %vm5471_vm3 = vcmp.lt.f32.partialorder %v2830_v13, 0.0004427343 }
 0x454   :  { %v3781_v61 = vpop.eup %3780  ;;  %3798 = vlog2.f32 %v2842_v16  ;;  %v2848_v27 = vand.u32 2147483647, %v3773_v28  ;;  %v2598_v39 = vmul.f32 %v3775_v38, %v5337_v4  ;;  %v2600_v50 = vmul.f32 %v3777_v49, %v5337_v4  ;;  %v2483_v37 = vpop.f32.mrb[154].mxu1 }
 0x455   :  { %v2412_v23 = vpop.f32.mrb[155].mxu0  ;;  %v3783_v1 = vpop.eup %3782  ;;  %v5477_v24 = vmul.f32 %v3771_v48, %v2828_v31  ;;  %v2846_v8 = vadd.f32 1.0, %v2845_v60  ;;  %v2599_v57 = vmul.f32 %v3779_v32, %v5337_v4  ;;  %v2601_v17 = vmul.f32 %v3781_v61, %v5337_v4 }
 0x456   :  { %v2485_v5 = vpop.f32.mrb[155].mxu1  ;;  %v3785_v26 = vpop.eup %3784  ;;  %vm5481_vm4 = vcmp.lt.f32.partialorder %v2848_v27, 0.0004427343  ;;  %v2606_v38 = vmul.f32 %v3783_v1, %v5347_v53  ;;  %3800 = vtanh.f32 %v2470_v25  ;;  %v2476_v13 = vadd.f32 %v2475_v6, %v5319_v63 }
 0x457   :  { %v3787_v30 = vpop.eup %3786  ;;  %v2847_v49 = vmul.f32 %v3773_v28, %v2846_v8  ;;  %v2608_v48 = vmul.f32 %v3785_v26, %v5347_v53  ;;  %3802 = vtanh.f32 %v5445_v21  ;;  %v2407_v16 = vadd.f32 %v2406_v56, %v5321_v33  ;;  %v2416_v28 = vpop.f32.mrb[156].mxu0 }
 0x458   :  { %v3789_v4 = vpop.eup %3788  ;;  %v2710_v32 = vadd.f32 %v2606_v38, %v2598_v39  ;;  %v2607_v31 = vmul.f32 %v3787_v30, %v5347_v53  ;;  %3804 = vtanh.f32 %v5448_v59  ;;  %v2480_v60 = vadd.f32 %v2479_v9, %v5321_v33  ;;  %v2489_v59 = vpop.f32.mrb[156].mxu1 }
 0x459   :  { %v3791_v61 = vpop.eup %3790  ;;  %v2736_v25 = vadd.f32 %v2608_v48, %v2600_v50  ;;  %v2609_v63 = vmul.f32 %v3789_v4, %v5347_v53  ;;  %3806 = vtanh.f32 %v5451_v44  ;;  %v2409_v6 = vadd.f32 %v2408_v40, %v5321_v33  ;;  %v2418_v1 = vpop.f32.mrb[157].mxu0 }
 0x45a   :  { %v3793_v21 = vpop.eup %3792  ;;  %v2723_v27 = vadd.f32 %v2607_v31, %v2599_v57  ;;  %v2614_v56 = vmul.f32 %v3791_v61, %v5351_v58  ;;  %3808 = vtanh.f32 %v5454_v41  ;;  %v2482_v39 = vadd.f32 %v2481_v45, %v5321_v33  ;;  %v2491_v44 = vpop.f32.mrb[157].mxu1 }
 0x45b   :  { %v3795_v9 = vpop.eup %3794  ;;  %v2817_v8 = vmul.f32 0.6931472, %v3793_v21  ;;  %v2749_v50 = vadd.f32 %v2609_v63, %v2601_v17  ;;  %3810 = vtanh.f32 %v5457_v0  ;;  %v2411_v53 = vadd.f32 %v2410_v2, %v5323_v46  ;;  %v2420_v40 = vpop.f32.mrb[158].mxu0 }
 0x45c   :  { %v3797_v26 = vpop.eup %3796  ;;  %v2835_v38 = vmul.f32 0.6931472, %v3795_v9  ;;  %v2711_v57 = vadd.f32 %v2710_v32, %v2614_v56  ;;  %3812 = vtanh.f32 %v2476_v13  ;;  %v2484_v30 = vadd.f32 %v2483_v37, %v5323_v46  ;;  %v2493_v41 = vpop.f32.mrb[158].mxu1 }
 0x45d   :  { %v5502_v48 = vpop.f32.mrb[159].mxu0  ;;  %v2823_v33 = vsel %vm5461_vm1, %v5459_v10, %v2817_v8  ;;  %v2826_v45 = vmul.f32 0.6931472, %v3797_v26  ;;  %3814 = vtanh.f32 %v2407_v16  ;;  %v2413_v0 = vadd.f32 %v2412_v23, %v5323_v46  ;;  %v5508_v2 = vpop.f32.mrb[159].mxu1 }
 0x45e   :  { %v3799_v17 = vpop.eup %3798  ;;  %v2841_v13 = vsel %vm5467_vm2, %v5465_v43, %v2835_v38  ;;  %v2887_v37 = vadd.f32 %v2823_v33, %v2775_v18  ;;  %3816 = vtanh.f32 %v2480_v60  ;;  %v2486_v4 = vadd.f32 %v2485_v5, %v5323_v46 }
 0x45f   :  { %v2832_v10 = vsel %vm5471_vm3, %v5477_v24, %v2826_v45  ;;  %v2844_v19 = vmul.f32 0.6931472, %v3799_v17  ;;  %v2889_v23 = vadd.f32 %v2841_v13, %v2777_v3  ;;  %3818 = vtanh.f32 %v2409_v6 }
 0x460   :  { %v3801_v16 = vpop.eup %3800  ;;  %v2888_v62 = vadd.f32 %v2832_v10, %v2776_v11  ;;  %3820 = vtanh.f32 %v2482_v39  ;;  %v2417_v29 = vadd.f32 %v2416_v28, %v5325_v35  ;;  %v2490_v18 = vadd.f32 %v2489_v59, %v5325_v35 }
 0x461   :  { %v3803_v43 = vpop.eup %3802  ;;  %v2850_v46 = vsel %vm5481_vm4, %v2847_v49, %v2844_v19  ;;  %v2616_v14 = vmul.f32 %v3801_v16, %v5351_v58  ;;  %3822 = vtanh.f32 %v2411_v53  ;;  %v2419_v55 = vadd.f32 %v2418_v1, %v5325_v35 }
 0x462   :  { %v3805_v3 = vpop.eup %3804  ;;  %v2890_v24 = vadd.f32 %v2850_v46, %v2778_v34  ;;  %v2903_v15 = vcombine.low %v2887_v37, %v2888_v62  ;;  %v2615_v11 = vmul.f32 %v3803_v43, %v5351_v58  ;;  %3824 = vtanh.f32 %v2484_v30 }
 0x463   :  { %v3807_v5 = vpop.eup %3806  ;;  %v2737_v32 = vadd.f32 %v2736_v25, %v2616_v14  ;;  %v2617_v31 = vmul.f32 %v3805_v3, %v5351_v58  ;;  %3826 = vtanh.f32 %v2413_v0  ;;  %v2492_v12 = vadd.f32 %v2491_v44, %v5325_v35 }
 0x464   :  { %v3809_v49 = vpop.eup %3808  ;;  %v2904_v60 = vcombine.low %v2889_v23, %v2890_v24  ;;  %v5535_v61 = vrot.slane %v2903_v15, %v5435_v36  ;;  %v2724_v63 = vadd.f32 %v2723_v27, %v2615_v11  ;;  %v2622_v52 = vmul.f32 %v3807_v5, %v5369_v47 }
 0x465   :  { %v3811_v34 = vpop.eup %3810  ;;  %v2750_v6 = vadd.f32 %v2749_v50, %v2617_v31  ;;  %v2624_v28 = vmul.f32 %v3809_v49, %v5369_v47  ;;  %3828 = vtanh.f32 %v2486_v4  ;;  %v2421_v25 = vadd.f32 %v2420_v40, %v5335_v42 }
 0x466   :  { %v3813_v21 = vpop.eup %3812  ;;  %v5541_v58 = vrot.slane %v2904_v60, %v5435_v36  ;;  %v2712_v35 = vadd.f32 %v2711_v57, %v2622_v52  ;;  %v2623_v56 = vmul.f32 %v3811_v34, %v5369_v47  ;;  %3830 = vtanh.f32 %v2417_v29 }
 0x467   :  { %v3815_v39 = vpop.eup %3814  ;;  %v2738_v59 = vadd.f32 %v2737_v32, %v2624_v28  ;;  %v2625_v27 = vmul.f32 %v3813_v21, %v5369_v47  ;;  %3832 = vtanh.f32 %v2490_v18  ;;  %v2494_v1 = vadd.f32 %v2493_v41, %v5335_v42 }
 0x468   :  { %v3817_v9 = vpop.eup %3816  ;;  %v2935_v8 = vcombine.low %v5535_v61, %v5541_v58  ;;  %v2725_v50 = vadd.f32 %v2724_v63, %v2623_v56  ;;  %v2630_v53 = vmul.f32 %v3815_v39, %v5383_v51  ;;  %3834 = vtanh.f32 %v2419_v55 }
 0x469   :  { %v3819_v44 = vpop.eup %3818  ;;  %v2751_v40 = vadd.f32 %v2750_v6, %v2625_v27  ;;  %v2632_v26 = vmul.f32 %v3817_v9, %v5383_v51  ;;  %3836 = vtanh.f32 %v2492_v12  ;;  %v2423_v38 = vadd.f32 %v5502_v48, %v5335_v42 }
 0x46a   :  { %v3821_v47 = vpop.eup %3820  ;;  %v2713_v57 = vadd.f32 %v2712_v35, %v2630_v53  ;;  %v2631_v30 = vmul.f32 %v3819_v44, %v5383_v51  ;;  %3838 = vtanh.f32 %v2421_v25  ;;  %v2496_v0 = vadd.f32 %v5508_v2, %v5335_v42 }
 0x46b   :  { %v3823_v41 = vpop.eup %3822  ;;  %v2739_v33 = vadd.f32 %v2738_v59, %v2632_v26  ;;  %v2633_v45 = vmul.f32 %v3821_v47, %v5383_v51  ;;  %3840 = vtanh.f32 %v2494_v1 }
 0x46c   :  { %v3825_v17 = vpop.eup %3824  ;;  %v2726_v13 = vadd.f32 %v2725_v50, %v2631_v30  ;;  %v2638_v37 = vmul.f32 %v3823_v41, %v5389_v7  ;;  %3842 = vtanh.f32 %v2423_v38 }
 0x46d   :  { %v3827_v4 = vpop.eup %3826  ;;  %v2752_v48 = vadd.f32 %v2751_v40, %v2633_v45  ;;  %v2640_v10 = vmul.f32 %v3825_v17, %v5389_v7  ;;  %3844 = vtanh.f32 %v2496_v0 }
 0x46e   :  { %v2714_v19 = vadd.f32 %v2713_v57, %v2638_v37  ;;  %v2639_v23 = vmul.f32 %v3827_v4, %v5389_v7 }
 0x46f   :  { %v3829_v16 = vpop.eup %3828  ;;  %v2740_v62 = vadd.f32 %v2739_v33, %v2640_v10 }
 0x470   :  { %v3831_v51 = vpop.eup %3830  ;;  %v2727_v29 = vadd.f32 %v2726_v13, %v2639_v23  ;;  %v2641_v18 = vmul.f32 %v3829_v16, %v5389_v7 }
 0x471   :  { %v3833_v42 = vpop.eup %3832  ;;  %v2646_v2 = vmul.f32 %v3831_v51, %v5395_v54 }
 0x472   :  { %v3835_v43 = vpop.eup %3834  ;;  %v2753_v46 = vadd.f32 %v2752_v48, %v2641_v18  ;;  %v2648_v14 = vmul.f32 %v3833_v42, %v5395_v54 }
 0x473   :  { %v3837_v55 = vpop.eup %3836  ;;  %v2715_v3 = vadd.f32 %v2714_v19, %v2646_v2  ;;  %v2647_v24 = vmul.f32 %v3835_v43, %v5395_v54 }
 0x474   :  { %v3839_v15 = vpop.eup %3838  ;;  %v2741_v11 = vadd.f32 %v2740_v62, %v2648_v14  ;;  %v2649_v5 = vmul.f32 %v3837_v55, %v5395_v54 }
 0x475   :  { %v3841_v32 = vpop.eup %3840  ;;  %v2728_v31 = vadd.f32 %v2727_v29, %v2647_v24  ;;  %v2654_v12 = vmul.f32 %v3839_v15, %v5401_v20 }
 0x476   :  { %v3843_v7 = vpop.eup %3842  ;;  %v2754_v49 = vadd.f32 %v2753_v46, %v2649_v5  ;;  %v2656_v60 = vmul.f32 %v3841_v32, %v5401_v20 }
 0x477   :  { %v3845_v63 = vpop.eup %3844  ;;  %v2716_v52 = vadd.f32 %v2715_v3, %v2654_v12  ;;  %v2655_v34 = vmul.f32 %v3843_v7, %v5401_v20 }
 0x478   :  { %v2742_v6 = vadd.f32 %v2741_v11, %v2656_v60  ;;  %v2657_v28 = vmul.f32 %v3845_v63, %v5401_v20 }
 0x479   :  { %v2717_v25 = vrot.slane %v2716_v52, 4  ;;  %v2729_v21 = vadd.f32 %v2728_v31, %v2655_v34 }
 0x47a   :  { %v2743_v35 = vrot.slane %v2742_v6, 4  ;;  %v2755_v56 = vadd.f32 %v2754_v49, %v2657_v28 }
 0x47b   :  { %v2718_v54 = vadd.f32 %v2717_v25, %v2716_v52  ;;  %v2730_v39 = vrot.slane %v2729_v21, 4 }
 0x47c   :  { %v2744_v59 = vadd.f32 %v2743_v35, %v2742_v6  ;;  %v2756_v27 = vrot.slane %v2755_v56, 4 }
 0x47d   :  { %v2719_v1 = vrot.slane %v2718_v54, 2  ;;  %v2731_v9 = vadd.f32 %v2730_v39, %v2729_v21 }
 0x47e   :  { %v2745_v50 = vrot.slane %v2744_v59, 2  ;;  %v2757_v53 = vadd.f32 %v2756_v27, %v2755_v56 }
 0x47f   :  { %v2720_v44 = vadd.f32 %v2719_v1, %v2718_v54  ;;  %v2732_v40 = vrot.slane %v2731_v9, 2 }
 0x480   :  { %v2746_v26 = vadd.f32 %v2745_v50, %v2744_v59  ;;  %v2758_v38 = vrot.slane %v2757_v53, 2 }
 0x481   :  { %v2721_v47 = vrot.slane %v2720_v44, 1  ;;  %v2733_v57 = vadd.f32 %v2732_v40, %v2731_v9 }
 0x482   :  { %v2747_v30 = vrot.slane %v2746_v26, 1  ;;  %v2759_v20 = vadd.f32 %v2758_v38, %v2757_v53 }
 0x483   :  { %v2722_v41 = vadd.f32 %v2721_v47, %v2720_v44  ;;  %v2734_v33 = vrot.slane %v2733_v57, 1 }
 0x484   :  { %v2748_v45 = vadd.f32 %v2747_v30, %v2746_v26  ;;  %v2760_v0 = vrot.slane %v2759_v20, 1 }
 0x485   :  { %v2771_v17 = vadd.f32 %v5409_v22, %v2722_v41  ;;  %v2735_v13 = vadd.f32 %v2734_v33, %v2733_v57 }
 0x486   :  { %v5570_v37 = vadd.f32 %v5409_v22, %v2748_v45  ;;  %v2761_v4 = vadd.f32 %v2760_v0, %v2759_v20 }
 0x487   :  { %v2787_v48 = vand.u32 2147483647, %v2771_v17  ;;  %v5573_v10 = vadd.f32 %v5409_v22, %v2735_v13  ;;  %v2779_v25 = vmax.f32 %v2771_v17, 0.0 }
 0x488   :  { %v2789_v19 = vand.u32 2147483647, %v5570_v37  ;;  %v5577_v23 = vadd.f32 %v5409_v22, %v2761_v4  ;;  %v2781_v39 = vmax.f32 %v5570_v37, 0.0 }
 0x489   :  { %v2795_v16 = vsub.f32 0.0, %v2787_v48  ;;  %v2788_v62 = vand.u32 2147483647, %v5573_v10  ;;  %v2780_v57 = vmax.f32 %v5573_v10, 0.0  ;;  %v2943_v10 = vrot.slane %v2935_v8, %v5435_v36 }
 0x48a   :  { %v2797_v51 = vsub.f32 0.0, %v2789_v19  ;;  %v2790_v29 = vand.u32 2147483647, %v5577_v23  ;;  %v2782_v0 = vmax.f32 %v5577_v23, 0.0 }
 0x48b   :  { %v2807_v18 = vmul.f32 1.442695, %v2795_v16  ;;  %v2796_v42 = vsub.f32 0.0, %v2788_v62 }
 0x48c   :  { %v2811_v2 = vmul.f32 1.442695, %v2797_v51  ;;  %v2798_v43 = vsub.f32 0.0, %v2790_v29 }
 0x48d   :  { %3846 = vpow2.f32 %v2807_v18  ;;  %v2809_v46 = vmul.f32 1.442695, %v2796_v42 }
 0x48e   :  { %3848 = vpow2.f32 %v2811_v2  ;;  %v2813_v14 = vmul.f32 1.442695, %v2798_v43 }
 0x48f   :  { %3850 = vpow2.f32 %v2809_v46 }
 0x490   :  { %3852 = vpow2.f32 %v2813_v14 }
 0x497   :  { %v3847_v55 = vpop.eup %3846 }
 0x498   :  { %v3849_v3 = vpop.eup %3848  ;;  %v2851_v22 = vadd.f32 1.0, %v3847_v55  ;;  %v2854_v31 = vmul.f32 -0.5, %v3847_v55  ;;  %v2857_v63 = vand.u32 2147483647, %v3847_v55 }
 0x499   :  { %v3851_v24 = vpop.eup %3850  ;;  %v2869_v15 = vadd.f32 1.0, %v3849_v3  ;;  %v2872_v12 = vmul.f32 -0.5, %v3849_v3  ;;  %v2875_v34 = vand.u32 2147483647, %v3849_v3 }
 0x49a   :  { %v3853_v11 = vpop.eup %3852  ;;  %3854 = vlog2.f32 %v2851_v22  ;;  %v2860_v5 = vadd.f32 1.0, %v3851_v24  ;;  %v2863_v7 = vmul.f32 -0.5, %v3851_v24  ;;  %v2855_v49 = vadd.f32 1.0, %v2854_v31 }
 0x49b   :  { %3856 = vlog2.f32 %v2869_v15  ;;  %v2878_v32 = vadd.f32 1.0, %v3853_v11  ;;  %v2881_v60 = vmul.f32 -0.5, %v3853_v11  ;;  %v2873_v52 = vadd.f32 1.0, %v2872_v12 }
 0x49c   :  { %3858 = vlog2.f32 %v2860_v5  ;;  %v2864_v6 = vadd.f32 1.0, %v2863_v7  ;;  %v2866_v21 = vand.u32 2147483647, %v3851_v24  ;;  %v2856_v54 = vmul.f32 %v3847_v55, %v2855_v49 }
 0x49d   :  { %3860 = vlog2.f32 %v2878_v32  ;;  %v2882_v59 = vadd.f32 1.0, %v2881_v60  ;;  %vm2858_vm5 = vcmp.lt.f32.partialorder %v2857_v63, 0.0004427343  ;;  %v2874_v9 = vmul.f32 %v3849_v3, %v2873_v52 }
 0x49e   :  { %v2884_v50 = vand.u32 2147483647, %v3853_v11  ;;  %vm2876_vm6 = vcmp.lt.f32.partialorder %v2875_v34, 0.0004427343  ;;  %v2865_v40 = vmul.f32 %v3851_v24, %v2864_v6  ;;  %vm2867_vm7 = vcmp.lt.f32.partialorder %v2866_v21, 0.0004427343 }
 0x49f   :  { %v2883_v41 = vmul.f32 %v3853_v11, %v2882_v59 }
 0x4a0   :  { %vm2885_vm8 = vcmp.lt.f32.partialorder %v2884_v50, 0.0004427343 }
 0x4a4   :  { %v3855_v28 = vpop.eup %3854 }
 0x4a5   :  { %v3857_v35 = vpop.eup %3856  ;;  %v2853_v56 = vmul.f32 0.6931472, %v3855_v28 }
 0x4a6   :  { %v3859_v27 = vpop.eup %3858  ;;  %v2871_v1 = vmul.f32 0.6931472, %v3857_v35 }
 0x4a7   :  { %v2859_v53 = vsel %vm2858_vm5, %v2856_v54, %v2853_v56  ;;  %v2862_v44 = vmul.f32 0.6931472, %v3859_v27  ;;  %v3861_v26 = vpop.eup %3860 }
 0x4a8   :  { %v2891_v38 = vadd.f32 %v2859_v53, %v2779_v25  ;;  %v2877_v47 = vsel %vm2876_vm6, %v2874_v9, %v2871_v1  ;;  %v2880_v20 = vmul.f32 0.6931472, %v3861_v26 }
 0x4a9   :  { %v2868_v30 = vsel %vm2867_vm7, %v2865_v40, %v2862_v44  ;;  %v2893_v33 = vadd.f32 %v2877_v47, %v2781_v39 }
 0x4aa   :  { %v2892_v45 = vadd.f32 %v2868_v30, %v2780_v57  ;;  %v2886_v17 = vsel %vm2885_vm8, %v2883_v41, %v2880_v20 }
 0x4ab   :  { %v2894_v37 = vadd.f32 %v2886_v17, %v2782_v0 }
 0x4ac   :  { %v2905_v13 = vcombine.low %v2891_v38, %v2892_v45 }
 0x4ad   :  { %v2906_v48 = vcombine.low %v2893_v33, %v2894_v37 }
 0x4ae   :  { %v2927_v4 = vrot.slane %v2905_v13, %v5435_v36 }
 0x4af   :  { %v2934_v19 = vrot.slane %v2906_v48, %v5435_v36 }
 0x4b1   :  { %v2936_v16 = vcombine.low %v2927_v4, %v2934_v19 }
 0x4b3   :  { %v2950_v62 = vrot.slane %v2936_v16, %v5435_v36 }
 0x4b5   :  { %v2951_v51 = vcombine.low %v2943_v10, %v2950_v62 }
 0x4b7   :  { %2953 = vst [vmem:[%s5597_s3] sm:$0xff] %v2951_v51 }

</bundles_post_ra>
